<compile_context>
chip_gen: v5e
topology: v5e:2x2
jax: 0.10.0
libtpu: 0.0.40
codegen_flags: <defaults>
</compile_context>

<pallas_src>
import functools

import jax
import jax.numpy as jnp
from jax import lax
from jax.experimental import pallas as pl
from jax.experimental.pallas import tpu as pltpu


def _round_up(x: int, m: int) -> int:
    return (x + m - 1) // m * m


def _num_tensorcores() -> int:
    # v7x exposes 2 TensorCores per chip; v5e/v6e have 1. Defensive sniff only.
    try:
        kind = jax.devices()[0].device_kind.lower()
    except Exception:
        return 1
    return 2 if "v7" in kind else 1


def _vmem_limit_bytes(weight_bytes: int, act_tile_bytes: int) -> int:
    try:
        cap = int(pltpu.get_tpu_info().vmem_capacity_bytes)
    except Exception:
        cap = 64 * 1024 * 1024
    want = weight_bytes + 2 * act_tile_bytes + (4 << 20)   # activations are double-buffered
    return int(max(16 << 20, min(cap - (2 << 20), want)))


# ----------------------------------------------------------------------------- kernel
def _fce_kernel(q_ref, s_ref, w0_ref, wb_ref, whh_ref, b_ref, o_ref, *,
                d_pad, n_support, s_rows):
    Dp = d_pad
    q = q_ref[...].astype(jnp.float32)            # (TQ, Dp)
    s = s_ref[...].astype(jnp.float32)            # (Sp, Dp)
    b = b_ref[...].astype(jnp.float32)            # (1, 4Dp)
    wdt = w0_ref.dtype                            # f32 or bf16 (MXU-native)

    # --- attention re-weighting of queries over the support set ----------------------
    # contract last dims of both operands: no in-kernel transpose of `support`.
    logits = lax.dot_general(q, s, dimension_numbers=(((1,), (1,)), ((), ())),
                             preferred_element_type=jnp.float32)        # (TQ, Sp)
    if s_rows > n_support:                        # mask padded support rows
        col = lax.broadcasted_iota(jnp.int32, logits.shape, 1)
        logits = jnp.where(col < n_support, logits, -1e30)
    m = jnp.max(logits, axis=-1, keepdims=True)
    e = jnp.exp(logits - m)
    denom = jnp.sum(e, axis=-1, keepdims=True)
    inv = pl.reciprocal(denom, approx=True)       # EUP slot (otherwise idle)
    inv = inv * (2.0 - denom * inv)               # one Newton step -> ~exact f32
    scores = e * inv
    q_rw = jnp.dot(scores, s, preferred_element_type=jnp.float32)       # (TQ, Dp)

    # --- input projection with the first LSTM step folded in (h0 == q) ---------------
    #   xg = q @ (w_ih_a + w_hh) + q_rw @ w_ih_b + (b_ih + b_hh)
    xg = (jnp.dot(q.astype(wdt), w0_ref[...], preferred_element_type=jnp.float32)
          + jnp.dot(q_rw.astype(wdt), wb_ref[...], preferred_element_type=jnp.float32)
          + b)                                                           # (TQ, 4Dp)

    # --- LSTMCell recurrence (PyTorch gate order i, f, g, o) --------------------------
    # Carry r = h - q; the hidden state that feeds back is h = r + q, and the
    # q @ w_hh contribution already lives in xg, so each step only needs r @ w_hh.
    # TODO(synk): on v6e/v7x the gate nonlinearities could run in bf16 (2x EUP rate).
    def gates_to_state(gates, c_prev):
        i_g = jax.nn.sigmoid(gates[:, 0 * Dp:1 * Dp])
        f_g = jax.nn.sigmoid(gates[:, 1 * Dp:2 * Dp])
        g_g = jnp.tanh(gates[:, 2 * Dp:3 * Dp])
        o_g = jax.nn.sigmoid(gates[:, 3 * Dp:4 * Dp])
        c_new = f_g * c_prev + i_g * g_g
        r_new = o_g * jnp.tanh(c_new)
        return r_new, c_new

    r0, c0 = gates_to_state(xg, jnp.zeros_like(q))            # peeled step 0 (r=0, c=0)

    def step(_, carry):
        r_prev, c_prev = carry
        gates = xg + jnp.dot(r_prev.astype(whh_ref.dtype), whh_ref[...],
                             preferred_element_type=jnp.float32)
        return gates_to_state(gates, c_prev)

    unroll = True if n_support <= 8 else 2        # full unroll only for small S
    r_fin, _ = lax.fori_loop(1, n_support, step, (r0, c0), unroll=unroll)

    o_ref[...] = (r_fin + q).astype(o_ref.dtype)              # residual "+ queries"


# ----------------------------------------------------------------------------- params
def prepare_fce_params(w_ih, w_hh, b_ih, b_hh, *, weights_dtype=jnp.float32):
    """Repack nn.LSTMCell(2D, D) parameters ONCE (hoisted out of the forward path).

    Returns gate-blocked, pre-transposed, lane-dense-padded weight slabs; gate g
    occupies lane-aligned columns [g*Dp, (g+1)*Dp) so in-kernel gate slicing is free.
      w0  = T(w_ih[:, :D]) + T(w_hh)   (first-step fold, queries half)
      wb  = T(w_ih[:, D:])             (re-weighted-queries half)
      whh = T(w_hh)
    """
    four_d = w_ih.shape[0]
    D = four_d // 4
    Dp = _round_up(D, 128)

    def blocked_t(w):   # (4D, D) -> (Dp, 4Dp), [in, g*Dp + out] = w[g*D + out, in]
        wg = jnp.pad(w.reshape(4, D, D), ((0, 0), (0, Dp - D), (0, Dp - D)))
        return jnp.transpose(wg, (2, 0, 1)).reshape(Dp, 4 * Dp)

    w_ih_a = blocked_t(w_ih[:, :D])
    w_ih_b = blocked_t(w_ih[:, D:])
    w_hh_t = blocked_t(w_hh)
    bias = jnp.pad((b_ih + b_hh).reshape(4, D), ((0, 0), (0, Dp - D))).reshape(1, 4 * Dp)

    return {
        "w0": (w_ih_a + w_hh_t).astype(weights_dtype),
        "wb": w_ih_b.astype(weights_dtype),
        "whh": w_hh_t.astype(weights_dtype),
        "bias": bias.astype(jnp.float32),
        "feat_dim": D,
        "d_pad": Dp,
    }


# ----------------------------------------------------------------------------- forward
def fully_contextual_embedding(queries, support, params, *, num_query_blocks=None,
                               max_row_tile=128):
    """queries: (Q, D), support: (S, D); params from prepare_fce_params()."""
    Q, D = queries.shape
    S = support.shape[0]
    Dp = int(params["d_pad"])
    assert D == int(params["feat_dim"])

    Sp = _round_up(max(S, 8), 8)
    Qp = _round_up(max(Q, 8), 8)

    # Split query rows across TensorCores when the part has more than one (v7x);
    # single tile (plus pipelining tiles for very large Q) on 1-TC parts.
    if num_query_blocks is None:
        n_tc = _num_tensorcores()
        num_query_blocks = n_tc if (n_tc > 1 and Qp >= 8 * n_tc) else 1
    TQ = min(max_row_tile, max(8, _round_up(pl.cdiv(Qp, num_query_blocks), 8)))
    Qp = _round_up(Qp, TQ)

    # zero padding is exact: padded feature columns hit zero-padded weight rows/cols.
    q_pad = jnp.pad(queries.astype(jnp.float32), ((0, Qp - Q), (0, Dp - D)))
    s_pad = jnp.pad(support.astype(jnp.float32), ((0, Sp - S), (0, Dp - D)))

    w0, wb, whh, bias = params["w0"], params["wb"], params["whh"], params["bias"]
    kernel = functools.partial(_fce_kernel, d_pad=Dp, n_support=S, s_rows=Sp)

    weight_bytes = ((w0.size + wb.size + whh.size) * w0.dtype.itemsize
                    + bias.size * 4 + Sp * Dp * 4)
    act_tile_bytes = 2 * TQ * Dp * 4             # query tile + output tile

    # TODO(synk): for very large feat_dim (e.g. D >= ~1024 f32 / ~2048 bf16 on v7x's
    # 64 MiB VMEM) stream w0/wb over an extra gate-block grid axis instead of keeping
    # all three (Dp, 4Dp) slabs resident.

    def run(single_buffer_weights: bool):
        if single_buffer_weights:
            # grid-invariant inputs: one VMEM buffer is enough (index_map is constant).
            def shared(shape):
                return pl.BlockSpec(shape, lambda i: (0, 0),
                                    pipeline_mode=pl.Buffered(buffer_count=1))
            wfac = 1
        else:
            def shared(shape):
                return pl.BlockSpec(shape, lambda i: (0, 0))
            wfac = 2
        return pl.pallas_call(
            kernel,
            out_shape=jax.ShapeDtypeStruct((Qp, Dp), jnp.float32),
            grid=(Qp // TQ,),
            in_specs=[
                pl.BlockSpec((TQ, Dp), lambda i: (i, 0)),      # queries (row-tiled)
                shared((Sp, Dp)),                              # support (shared)
                shared((Dp, 4 * Dp)),                          # w0  = w_ih_a + w_hh
                shared((Dp, 4 * Dp)),                          # wb  = w_ih_b
                shared((Dp, 4 * Dp)),                          # whh
                shared((1, 4 * Dp)),                           # bias
            ],
            out_specs=pl.BlockSpec((TQ, Dp), lambda i: (i, 0)),
            compiler_params=pltpu.CompilerParams(
                dimension_semantics=("parallel",),             # 2-TC split on v7x
                vmem_limit_bytes=_vmem_limit_bytes(wfac * weight_bytes, act_tile_bytes),
            ),
        )(q_pad, s_pad, w0, wb, whh, bias)

    try:
        out = run(single_buffer_weights=True)
    except Exception:   # jax without BlockSpec pipeline_mode / Buffered(1): default buffering
        out = run(single_buffer_weights=False)

    return out[:Q, :D]


# ----------------------------------------------------------------------------- reference
def _reference(queries, support, w_ih, w_hh, b_ih, b_hh):
    """Pure-JAX reference mirroring the PyTorch forward pass."""
    D = queries.shape[1]
    h = queries
    c = jnp.zeros_like(queries)
    scores = jax.nn.softmax(queries @ support.T, axis=1)
    q_rw = scores @ support
    x = jnp.concatenate([queries, q_rw], axis=1)
    for _ in range(support.shape[0]):
        gates = x @ w_ih.T + b_ih + h @ w_hh.T + b_hh
        i_g = jax.nn.sigmoid(gates[:, 0 * D:1 * D])
        f_g = jax.nn.sigmoid(gates[:, 1 * D:2 * D])
        g_g = jnp.tanh(gates[:, 2 * D:3 * D])
        o_g = jax.nn.sigmoid(gates[:, 3 * D:4 * D])
        c = f_g * c + i_g * g_g
        h = o_g * jnp.tanh(c) + queries
    return h


if __name__ == "__main__":
    feat_dim = 32
    n_queries = 8      # n_way * n_query
    n_support = 8      # n_way * n_support

    key = jax.random.PRNGKey(0)
    k_q, k_s, k_wi, k_wh, k_bi, k_bh = jax.random.split(key, 6)

    queries = jax.random.normal(k_q, (n_queries, feat_dim), dtype=jnp.float32)
    support = jax.random.normal(k_s, (n_support, feat_dim), dtype=jnp.float32)

    # nn.LSTMCell(feat_dim * 2, feat_dim) parameters, uniform(-1/sqrt(H), 1/sqrt(H))
    bound = 1.0 / float(feat_dim) ** 0.5
    w_ih = jax.random.uniform(k_wi, (4 * feat_dim, 2 * feat_dim), jnp.float32, -bound, bound)
    w_hh = jax.random.uniform(k_wh, (4 * feat_dim, feat_dim), jnp.float32, -bound, bound)
    b_ih = jax.random.uniform(k_bi, (4 * feat_dim,), jnp.float32, -bound, bound)
    b_hh = jax.random.uniform(k_bh, (4 * feat_dim,), jnp.float32, -bound, bound)

    ref = _reference(queries, support, w_ih, w_hh, b_ih, b_hh)

    # f32 weights: numerically faithful path. The Newton-refined softmax reciprocal
    # removes the vrcp approximation; remaining tolerance covers matmul precision
    # differences vs. the XLA reference.
    params = prepare_fce_params(w_ih, w_hh, b_ih, b_hh, weights_dtype=jnp.float32)
    out = jax.block_until_ready(fully_contextual_embedding(queries, support, params))
    assert out.shape == (n_queries, feat_dim)
    assert jnp.allclose(out, ref, atol=2e-3, rtol=2e-3), float(jnp.max(jnp.abs(out - ref)))

    # bf16 weights: MXU-native matmuls, half the weight VMEM/DMA (loose sanity check).
    params_bf16 = prepare_fce_params(w_ih, w_hh, b_ih, b_hh, weights_dtype=jnp.bfloat16)
    out_bf16 = jax.block_until_ready(fully_contextual_embedding(queries, support, params_bf16))
    assert jnp.allclose(out_bf16, ref, atol=5e-2, rtol=5e-2)

    print("KERNEL_OK")
</pallas_src>

<mosaic_0001>
module attributes {stable_mosaic.version = 11 : i64} {
  func.func @_fce_kernel(%arg0: i32, %arg1: memref<8x128xf32, #tpu.memory_space<vmem>>, %arg2: memref<8x128xf32, #tpu.memory_space<vmem>>, %arg3: memref<128x512xf32, #tpu.memory_space<vmem>>, %arg4: memref<128x512xf32, #tpu.memory_space<vmem>>, %arg5: memref<128x512xf32, #tpu.memory_space<vmem>>, %arg6: memref<1x512xf32, #tpu.memory_space<vmem>>, %arg7: memref<8x128xf32, #tpu.memory_space<vmem>>) attributes {dimension_semantics = [#tpu.dimension_semantics<parallel>], iteration_bounds = array<i64: 1>, scalar_prefetch = 0 : i64, scratch_operands = 0 : i64, tpu.core_type = #tpu.core_type<tc>, window_params = [{transform_indices = @transform_0, window_bounds = array<i64: 8, 128>}, {pipeline_mode = #tpu.pipeline_mode<synchronous>, transform_indices = @transform_1, window_bounds = array<i64: 8, 128>}, {pipeline_mode = #tpu.pipeline_mode<synchronous>, transform_indices = @transform_2, window_bounds = array<i64: 128, 512>}, {pipeline_mode = #tpu.pipeline_mode<synchronous>, transform_indices = @transform_3, window_bounds = array<i64: 128, 512>}, {pipeline_mode = #tpu.pipeline_mode<synchronous>, transform_indices = @transform_4, window_bounds = array<i64: 128, 512>}, {pipeline_mode = #tpu.pipeline_mode<synchronous>, transform_indices = @transform_5, window_bounds = array<i64: 1, 512>}, {transform_indices = @transform_6, window_bounds = array<i64: 8, 128>}]} {
    %c0 = arith.constant 0 : index
    %c0_0 = arith.constant 0 : index
    %0 = vector.load %arg1[%c0, %c0_0] : memref<8x128xf32, #tpu.memory_space<vmem>>, vector<8x128xf32>
    %c0_1 = arith.constant 0 : index
    %c0_2 = arith.constant 0 : index
    %1 = vector.load %arg2[%c0_1, %c0_2] : memref<8x128xf32, #tpu.memory_space<vmem>>, vector<8x128xf32>
    %c0_3 = arith.constant 0 : index
    %c0_4 = arith.constant 0 : index
    %2 = vector.load %arg6[%c0_3, %c0_4] : memref<1x512xf32, #tpu.memory_space<vmem>>, vector<1x512xf32>
    %cst = arith.constant dense<0.000000e+00> : vector<8x8xf32>
    %3 = tpu.matmul %0, %1, %cst {dimension_numbers = #tpu.dot_dimension_numbers<[1], [1], [0], [0], [0, 0, 1, 0], [], []>} : vector<8x128xf32>, vector<8x128xf32>, vector<8x8xf32> -> vector<8x8xf32>
    %cst_5 = arith.constant dense<0xFF800000> : vector<8xf32>
    %4 = vector.multi_reduction <maximumf>, %3, %cst_5 [1] : vector<8x8xf32> to vector<8xf32>
    %5 = vector.shape_cast %4 : vector<8xf32> to vector<8x1xf32>
    %6 = vector.broadcast %5 : vector<8x1xf32> to vector<8x8xf32>
    %7 = arith.subf %3, %6 : vector<8x8xf32>
    %8 = math.exp %7 : vector<8x8xf32>
    %cst_6 = arith.constant dense<0.000000e+00> : vector<8xf32>
    %9 = vector.multi_reduction <add>, %8, %cst_6 [1] : vector<8x8xf32> to vector<8xf32>
    %10 = vector.shape_cast %9 : vector<8xf32> to vector<8x1xf32>
    %11 = tpu.reciprocal %10 {approx = true} : vector<8x1xf32> -> vector<8x1xf32>
    %12 = arith.mulf %10, %11 : vector<8x1xf32>
    %cst_7 = arith.constant 2.000000e+00 : f32
    %13 = vector.broadcast %cst_7 : f32 to vector<8x1xf32>
    %14 = arith.subf %13, %12 : vector<8x1xf32>
    %15 = arith.mulf %11, %14 : vector<8x1xf32>
    %16 = vector.broadcast %15 : vector<8x1xf32> to vector<8x8xf32>
    %17 = arith.mulf %8, %16 : vector<8x8xf32>
    %cst_8 = arith.constant dense<0.000000e+00> : vector<8x128xf32>
    %18 = tpu.matmul %17, %1, %cst_8 {dimension_numbers = #tpu.dot_dimension_numbers<[1], [0], [0], [1], [0, 0, 1, 1], [], []>} : vector<8x8xf32>, vector<8x128xf32>, vector<8x128xf32> -> vector<8x128xf32>
    %c0_9 = arith.constant 0 : index
    %c0_10 = arith.constant 0 : index
    %19 = vector.load %arg3[%c0_9, %c0_10] : memref<128x512xf32, #tpu.memory_space<vmem>>, vector<128x512xf32>
    %cst_11 = arith.constant dense<0.000000e+00> : vector<8x512xf32>
    %20 = tpu.matmul %0, %19, %cst_11 {dimension_numbers = #tpu.dot_dimension_numbers<[1], [0], [0], [1], [0, 0, 1, 1], [], []>} : vector<8x128xf32>, vector<128x512xf32>, vector<8x512xf32> -> vector<8x512xf32>
    %c0_12 = arith.constant 0 : index
    %c0_13 = arith.constant 0 : index
    %21 = vector.load %arg4[%c0_12, %c0_13] : memref<128x512xf32, #tpu.memory_space<vmem>>, vector<128x512xf32>
    %cst_14 = arith.constant dense<0.000000e+00> : vector<8x512xf32>
    %22 = tpu.matmul %18, %21, %cst_14 {dimension_numbers = #tpu.dot_dimension_numbers<[1], [0], [0], [1], [0, 0, 1, 1], [], []>} : vector<8x128xf32>, vector<128x512xf32>, vector<8x512xf32> -> vector<8x512xf32>
    %23 = arith.addf %20, %22 : vector<8x512xf32>
    %24 = vector.broadcast %2 : vector<1x512xf32> to vector<8x512xf32>
    %25 = arith.addf %23, %24 : vector<8x512xf32>
    %cst_15 = arith.constant 0.000000e+00 : f32
    %26 = vector.broadcast %cst_15 : f32 to vector<8x128xf32>
    %27 = vector.extract_strided_slice %25 {offsets = [0, 0], sizes = [8, 128], strides = [1, 1]} : vector<8x512xf32> to vector<8x128xf32>
    %28 = arith.negf %27 : vector<8x128xf32>
    %29 = math.exp %28 : vector<8x128xf32>
    %cst_16 = arith.constant 1.000000e+00 : f32
    %30 = vector.broadcast %cst_16 : f32 to vector<8x128xf32>
    %31 = arith.addf %30, %29 : vector<8x128xf32>
    %32 = arith.divf %30, %31 : vector<8x128xf32>
    %33 = vector.extract_strided_slice %25 {offsets = [0, 128], sizes = [8, 128], strides = [1, 1]} : vector<8x512xf32> to vector<8x128xf32>
    %34 = arith.negf %33 : vector<8x128xf32>
    %35 = math.exp %34 : vector<8x128xf32>
    %cst_17 = arith.constant 1.000000e+00 : f32
    %36 = vector.broadcast %cst_17 : f32 to vector<8x128xf32>
    %37 = arith.addf %36, %35 : vector<8x128xf32>
    %38 = arith.divf %36, %37 : vector<8x128xf32>
    %39 = vector.extract_strided_slice %25 {offsets = [0, 256], sizes = [8, 128], strides = [1, 1]} : vector<8x512xf32> to vector<8x128xf32>
    %40 = math.tanh %39 : vector<8x128xf32>
    %41 = vector.extract_strided_slice %25 {offsets = [0, 384], sizes = [8, 128], strides = [1, 1]} : vector<8x512xf32> to vector<8x128xf32>
    %42 = arith.negf %41 : vector<8x128xf32>
    %43 = math.exp %42 : vector<8x128xf32>
    %cst_18 = arith.constant 1.000000e+00 : f32
    %44 = vector.broadcast %cst_18 : f32 to vector<8x128xf32>
    %45 = arith.addf %44, %43 : vector<8x128xf32>
    %46 = arith.divf %44, %45 : vector<8x128xf32>
    %47 = arith.mulf %38, %26 : vector<8x128xf32>
    %48 = arith.mulf %32, %40 : vector<8x128xf32>
    %49 = arith.addf %47, %48 : vector<8x128xf32>
    %50 = math.tanh %49 : vector<8x128xf32>
    %51 = arith.mulf %46, %50 : vector<8x128xf32>
    %c0_i32 = arith.constant 0 : i32
    %c0_19 = arith.constant 0 : index
    %c0_20 = arith.constant 0 : index
    %52 = vector.load %arg5[%c0_19, %c0_20] : memref<128x512xf32, #tpu.memory_space<vmem>>, vector<128x512xf32>
    %cst_21 = arith.constant dense<0.000000e+00> : vector<8x512xf32>
    %53 = tpu.matmul %51, %52, %cst_21 {dimension_numbers = #tpu.dot_dimension_numbers<[1], [0], [0], [1], [0, 0, 1, 1], [], []>} : vector<8x128xf32>, vector<128x512xf32>, vector<8x512xf32> -> vector<8x512xf32>
    %54 = arith.addf %25, %53 : vector<8x512xf32>
    %55 = vector.extract_strided_slice %54 {offsets = [0, 0], sizes = [8, 128], strides = [1, 1]} : vector<8x512xf32> to vector<8x128xf32>
    %56 = arith.negf %55 : vector<8x128xf32>
    %57 = math.exp %56 : vector<8x128xf32>
    %cst_22 = arith.constant 1.000000e+00 : f32
    %58 = vector.broadcast %cst_22 : f32 to vector<8x128xf32>
    %59 = arith.addf %58, %57 : vector<8x128xf32>
    %60 = arith.divf %58, %59 : vector<8x128xf32>
    %61 = vector.extract_strided_slice %54 {offsets = [0, 128], sizes = [8, 128], strides = [1, 1]} : vector<8x512xf32> to vector<8x128xf32>
    %62 = arith.negf %61 : vector<8x128xf32>
    %63 = math.exp %62 : vector<8x128xf32>
    %cst_23 = arith.constant 1.000000e+00 : f32
    %64 = vector.broadcast %cst_23 : f32 to vector<8x128xf32>
    %65 = arith.addf %64, %63 : vector<8x128xf32>
    %66 = arith.divf %64, %65 : vector<8x128xf32>
    %67 = vector.extract_strided_slice %54 {offsets = [0, 256], sizes = [8, 128], strides = [1, 1]} : vector<8x512xf32> to vector<8x128xf32>
    %68 = math.tanh %67 : vector<8x128xf32>
    %69 = vector.extract_strided_slice %54 {offsets = [0, 384], sizes = [8, 128], strides = [1, 1]} : vector<8x512xf32> to vector<8x128xf32>
    %70 = arith.negf %69 : vector<8x128xf32>
    %71 = math.exp %70 : vector<8x128xf32>
    %cst_24 = arith.constant 1.000000e+00 : f32
    %72 = vector.broadcast %cst_24 : f32 to vector<8x128xf32>
    %73 = arith.addf %72, %71 : vector<8x128xf32>
    %74 = arith.divf %72, %73 : vector<8x128xf32>
    %75 = arith.mulf %66, %49 : vector<8x128xf32>
    %76 = arith.mulf %60, %68 : vector<8x128xf32>
    %77 = arith.addf %75, %76 : vector<8x128xf32>
    %78 = math.tanh %77 : vector<8x128xf32>
    %79 = arith.mulf %74, %78 : vector<8x128xf32>
    %c1_i32 = arith.constant 1 : i32
    %c0_25 = arith.constant 0 : index
    %c0_26 = arith.constant 0 : index
    %80 = vector.load %arg5[%c0_25, %c0_26] : memref<128x512xf32, #tpu.memory_space<vmem>>, vector<128x512xf32>
    %cst_27 = arith.constant dense<0.000000e+00> : vector<8x512xf32>
    %81 = tpu.matmul %79, %80, %cst_27 {dimension_numbers = #tpu.dot_dimension_numbers<[1], [0], [0], [1], [0, 0, 1, 1], [], []>} : vector<8x128xf32>, vector<128x512xf32>, vector<8x512xf32> -> vector<8x512xf32>
    %82 = arith.addf %25, %81 : vector<8x512xf32>
    %83 = vector.extract_strided_slice %82 {offsets = [0, 0], sizes = [8, 128], strides = [1, 1]} : vector<8x512xf32> to vector<8x128xf32>
    %84 = arith.negf %83 : vector<8x128xf32>
    %85 = math.exp %84 : vector<8x128xf32>
    %cst_28 = arith.constant 1.000000e+00 : f32
    %86 = vector.broadcast %cst_28 : f32 to vector<8x128xf32>
    %87 = arith.addf %86, %85 : vector<8x128xf32>
    %88 = arith.divf %86, %87 : vector<8x128xf32>
    %89 = vector.extract_strided_slice %82 {offsets = [0, 128], sizes = [8, 128], strides = [1, 1]} : vector<8x512xf32> to vector<8x128xf32>
    %90 = arith.negf %89 : vector<8x128xf32>
    %91 = math.exp %90 : vector<8x128xf32>
    %cst_29 = arith.constant 1.000000e+00 : f32
    %92 = vector.broadcast %cst_29 : f32 to vector<8x128xf32>
    %93 = arith.addf %92, %91 : vector<8x128xf32>
    %94 = arith.divf %92, %93 : vector<8x128xf32>
    %95 = vector.extract_strided_slice %82 {offsets = [0, 256], sizes = [8, 128], strides = [1, 1]} : vector<8x512xf32> to vector<8x128xf32>
    %96 = math.tanh %95 : vector<8x128xf32>
    %97 = vector.extract_strided_slice %82 {offsets = [0, 384], sizes = [8, 128], strides = [1, 1]} : vector<8x512xf32> to vector<8x128xf32>
    %98 = arith.negf %97 : vector<8x128xf32>
    %99 = math.exp %98 : vector<8x128xf32>
    %cst_30 = arith.constant 1.000000e+00 : f32
    %100 = vector.broadcast %cst_30 : f32 to vector<8x128xf32>
    %101 = arith.addf %100, %99 : vector<8x128xf32>
    %102 = arith.divf %100, %101 : vector<8x128xf32>
    %103 = arith.mulf %94, %77 : vector<8x128xf32>
    %104 = arith.mulf %88, %96 : vector<8x128xf32>
    %105 = arith.addf %103, %104 : vector<8x128xf32>
    %106 = math.tanh %105 : vector<8x128xf32>
    %107 = arith.mulf %102, %106 : vector<8x128xf32>
    %c2_i32 = arith.constant 2 : i32
    %c0_31 = arith.constant 0 : index
    %c0_32 = arith.constant 0 : index
    %108 = vector.load %arg5[%c0_31, %c0_32] : memref<128x512xf32, #tpu.memory_space<vmem>>, vector<128x512xf32>
    %cst_33 = arith.constant dense<0.000000e+00> : vector<8x512xf32>
    %109 = tpu.matmul %107, %108, %cst_33 {dimension_numbers = #tpu.dot_dimension_numbers<[1], [0], [0], [1], [0, 0, 1, 1], [], []>} : vector<8x128xf32>, vector<128x512xf32>, vector<8x512xf32> -> vector<8x512xf32>
    %110 = arith.addf %25, %109 : vector<8x512xf32>
    %111 = vector.extract_strided_slice %110 {offsets = [0, 0], sizes = [8, 128], strides = [1, 1]} : vector<8x512xf32> to vector<8x128xf32>
    %112 = arith.negf %111 : vector<8x128xf32>
    %113 = math.exp %112 : vector<8x128xf32>
    %cst_34 = arith.constant 1.000000e+00 : f32
    %114 = vector.broadcast %cst_34 : f32 to vector<8x128xf32>
    %115 = arith.addf %114, %113 : vector<8x128xf32>
    %116 = arith.divf %114, %115 : vector<8x128xf32>
    %117 = vector.extract_strided_slice %110 {offsets = [0, 128], sizes = [8, 128], strides = [1, 1]} : vector<8x512xf32> to vector<8x128xf32>
    %118 = arith.negf %117 : vector<8x128xf32>
    %119 = math.exp %118 : vector<8x128xf32>
    %cst_35 = arith.constant 1.000000e+00 : f32
    %120 = vector.broadcast %cst_35 : f32 to vector<8x128xf32>
    %121 = arith.addf %120, %119 : vector<8x128xf32>
    %122 = arith.divf %120, %121 : vector<8x128xf32>
    %123 = vector.extract_strided_slice %110 {offsets = [0, 256], sizes = [8, 128], strides = [1, 1]} : vector<8x512xf32> to vector<8x128xf32>
    %124 = math.tanh %123 : vector<8x128xf32>
    %125 = vector.extract_strided_slice %110 {offsets = [0, 384], sizes = [8, 128], strides = [1, 1]} : vector<8x512xf32> to vector<8x128xf32>
    %126 = arith.negf %125 : vector<8x128xf32>
    %127 = math.exp %126 : vector<8x128xf32>
    %cst_36 = arith.constant 1.000000e+00 : f32
    %128 = vector.broadcast %cst_36 : f32 to vector<8x128xf32>
    %129 = arith.addf %128, %127 : vector<8x128xf32>
    %130 = arith.divf %128, %129 : vector<8x128xf32>
    %131 = arith.mulf %122, %105 : vector<8x128xf32>
    %132 = arith.mulf %116, %124 : vector<8x128xf32>
    %133 = arith.addf %131, %132 : vector<8x128xf32>
    %134 = math.tanh %133 : vector<8x128xf32>
    %135 = arith.mulf %130, %134 : vector<8x128xf32>
    %c3_i32 = arith.constant 3 : i32
    %c0_37 = arith.constant 0 : index
    %c0_38 = arith.constant 0 : index
    %136 = vector.load %arg5[%c0_37, %c0_38] : memref<128x512xf32, #tpu.memory_space<vmem>>, vector<128x512xf32>
    %cst_39 = arith.constant dense<0.000000e+00> : vector<8x512xf32>
    %137 = tpu.matmul %135, %136, %cst_39 {dimension_numbers = #tpu.dot_dimension_numbers<[1], [0], [0], [1], [0, 0, 1, 1], [], []>} : vector<8x128xf32>, vector<128x512xf32>, vector<8x512xf32> -> vector<8x512xf32>
    %138 = arith.addf %25, %137 : vector<8x512xf32>
    %139 = vector.extract_strided_slice %138 {offsets = [0, 0], sizes = [8, 128], strides = [1, 1]} : vector<8x512xf32> to vector<8x128xf32>
    %140 = arith.negf %139 : vector<8x128xf32>
    %141 = math.exp %140 : vector<8x128xf32>
    %cst_40 = arith.constant 1.000000e+00 : f32
    %142 = vector.broadcast %cst_40 : f32 to vector<8x128xf32>
    %143 = arith.addf %142, %141 : vector<8x128xf32>
    %144 = arith.divf %142, %143 : vector<8x128xf32>
    %145 = vector.extract_strided_slice %138 {offsets = [0, 128], sizes = [8, 128], strides = [1, 1]} : vector<8x512xf32> to vector<8x128xf32>
    %146 = arith.negf %145 : vector<8x128xf32>
    %147 = math.exp %146 : vector<8x128xf32>
    %cst_41 = arith.constant 1.000000e+00 : f32
    %148 = vector.broadcast %cst_41 : f32 to vector<8x128xf32>
    %149 = arith.addf %148, %147 : vector<8x128xf32>
    %150 = arith.divf %148, %149 : vector<8x128xf32>
    %151 = vector.extract_strided_slice %138 {offsets = [0, 256], sizes = [8, 128], strides = [1, 1]} : vector<8x512xf32> to vector<8x128xf32>
    %152 = math.tanh %151 : vector<8x128xf32>
    %153 = vector.extract_strided_slice %138 {offsets = [0, 384], sizes = [8, 128], strides = [1, 1]} : vector<8x512xf32> to vector<8x128xf32>
    %154 = arith.negf %153 : vector<8x128xf32>
    %155 = math.exp %154 : vector<8x128xf32>
    %cst_42 = arith.constant 1.000000e+00 : f32
    %156 = vector.broadcast %cst_42 : f32 to vector<8x128xf32>
    %157 = arith.addf %156, %155 : vector<8x128xf32>
    %158 = arith.divf %156, %157 : vector<8x128xf32>
    %159 = arith.mulf %150, %133 : vector<8x128xf32>
    %160 = arith.mulf %144, %152 : vector<8x128xf32>
    %161 = arith.addf %159, %160 : vector<8x128xf32>
    %162 = math.tanh %161 : vector<8x128xf32>
    %163 = arith.mulf %158, %162 : vector<8x128xf32>
    %c4_i32 = arith.constant 4 : i32
    %c0_43 = arith.constant 0 : index
    %c0_44 = arith.constant 0 : index
    %164 = vector.load %arg5[%c0_43, %c0_44] : memref<128x512xf32, #tpu.memory_space<vmem>>, vector<128x512xf32>
    %cst_45 = arith.constant dense<0.000000e+00> : vector<8x512xf32>
    %165 = tpu.matmul %163, %164, %cst_45 {dimension_numbers = #tpu.dot_dimension_numbers<[1], [0], [0], [1], [0, 0, 1, 1], [], []>} : vector<8x128xf32>, vector<128x512xf32>, vector<8x512xf32> -> vector<8x512xf32>
    %166 = arith.addf %25, %165 : vector<8x512xf32>
    %167 = vector.extract_strided_slice %166 {offsets = [0, 0], sizes = [8, 128], strides = [1, 1]} : vector<8x512xf32> to vector<8x128xf32>
    %168 = arith.negf %167 : vector<8x128xf32>
    %169 = math.exp %168 : vector<8x128xf32>
    %cst_46 = arith.constant 1.000000e+00 : f32
    %170 = vector.broadcast %cst_46 : f32 to vector<8x128xf32>
    %171 = arith.addf %170, %169 : vector<8x128xf32>
    %172 = arith.divf %170, %171 : vector<8x128xf32>
    %173 = vector.extract_strided_slice %166 {offsets = [0, 128], sizes = [8, 128], strides = [1, 1]} : vector<8x512xf32> to vector<8x128xf32>
    %174 = arith.negf %173 : vector<8x128xf32>
    %175 = math.exp %174 : vector<8x128xf32>
    %cst_47 = arith.constant 1.000000e+00 : f32
    %176 = vector.broadcast %cst_47 : f32 to vector<8x128xf32>
    %177 = arith.addf %176, %175 : vector<8x128xf32>
    %178 = arith.divf %176, %177 : vector<8x128xf32>
    %179 = vector.extract_strided_slice %166 {offsets = [0, 256], sizes = [8, 128], strides = [1, 1]} : vector<8x512xf32> to vector<8x128xf32>
    %180 = math.tanh %179 : vector<8x128xf32>
    %181 = vector.extract_strided_slice %166 {offsets = [0, 384], sizes = [8, 128], strides = [1, 1]} : vector<8x512xf32> to vector<8x128xf32>
    %182 = arith.negf %181 : vector<8x128xf32>
    %183 = math.exp %182 : vector<8x128xf32>
    %cst_48 = arith.constant 1.000000e+00 : f32
    %184 = vector.broadcast %cst_48 : f32 to vector<8x128xf32>
    %185 = arith.addf %184, %183 : vector<8x128xf32>
    %186 = arith.divf %184, %185 : vector<8x128xf32>
    %187 = arith.mulf %178, %161 : vector<8x128xf32>
    %188 = arith.mulf %172, %180 : vector<8x128xf32>
    %189 = arith.addf %187, %188 : vector<8x128xf32>
    %190 = math.tanh %189 : vector<8x128xf32>
    %191 = arith.mulf %186, %190 : vector<8x128xf32>
    %c5_i32 = arith.constant 5 : i32
    %c0_49 = arith.constant 0 : index
    %c0_50 = arith.constant 0 : index
    %192 = vector.load %arg5[%c0_49, %c0_50] : memref<128x512xf32, #tpu.memory_space<vmem>>, vector<128x512xf32>
    %cst_51 = arith.constant dense<0.000000e+00> : vector<8x512xf32>
    %193 = tpu.matmul %191, %192, %cst_51 {dimension_numbers = #tpu.dot_dimension_numbers<[1], [0], [0], [1], [0, 0, 1, 1], [], []>} : vector<8x128xf32>, vector<128x512xf32>, vector<8x512xf32> -> vector<8x512xf32>
    %194 = arith.addf %25, %193 : vector<8x512xf32>
    %195 = vector.extract_strided_slice %194 {offsets = [0, 0], sizes = [8, 128], strides = [1, 1]} : vector<8x512xf32> to vector<8x128xf32>
    %196 = arith.negf %195 : vector<8x128xf32>
    %197 = math.exp %196 : vector<8x128xf32>
    %cst_52 = arith.constant 1.000000e+00 : f32
    %198 = vector.broadcast %cst_52 : f32 to vector<8x128xf32>
    %199 = arith.addf %198, %197 : vector<8x128xf32>
    %200 = arith.divf %198, %199 : vector<8x128xf32>
    %201 = vector.extract_strided_slice %194 {offsets = [0, 128], sizes = [8, 128], strides = [1, 1]} : vector<8x512xf32> to vector<8x128xf32>
    %202 = arith.negf %201 : vector<8x128xf32>
    %203 = math.exp %202 : vector<8x128xf32>
    %cst_53 = arith.constant 1.000000e+00 : f32
    %204 = vector.broadcast %cst_53 : f32 to vector<8x128xf32>
    %205 = arith.addf %204, %203 : vector<8x128xf32>
    %206 = arith.divf %204, %205 : vector<8x128xf32>
    %207 = vector.extract_strided_slice %194 {offsets = [0, 256], sizes = [8, 128], strides = [1, 1]} : vector<8x512xf32> to vector<8x128xf32>
    %208 = math.tanh %207 : vector<8x128xf32>
    %209 = vector.extract_strided_slice %194 {offsets = [0, 384], sizes = [8, 128], strides = [1, 1]} : vector<8x512xf32> to vector<8x128xf32>
    %210 = arith.negf %209 : vector<8x128xf32>
    %211 = math.exp %210 : vector<8x128xf32>
    %cst_54 = arith.constant 1.000000e+00 : f32
    %212 = vector.broadcast %cst_54 : f32 to vector<8x128xf32>
    %213 = arith.addf %212, %211 : vector<8x128xf32>
    %214 = arith.divf %212, %213 : vector<8x128xf32>
    %215 = arith.mulf %206, %189 : vector<8x128xf32>
    %216 = arith.mulf %200, %208 : vector<8x128xf32>
    %217 = arith.addf %215, %216 : vector<8x128xf32>
    %218 = math.tanh %217 : vector<8x128xf32>
    %219 = arith.mulf %214, %218 : vector<8x128xf32>
    %c6_i32 = arith.constant 6 : i32
    %c0_55 = arith.constant 0 : index
    %c0_56 = arith.constant 0 : index
    %220 = vector.load %arg5[%c0_55, %c0_56] : memref<128x512xf32, #tpu.memory_space<vmem>>, vector<128x512xf32>
    %cst_57 = arith.constant dense<0.000000e+00> : vector<8x512xf32>
    %221 = tpu.matmul %219, %220, %cst_57 {dimension_numbers = #tpu.dot_dimension_numbers<[1], [0], [0], [1], [0, 0, 1, 1], [], []>} : vector<8x128xf32>, vector<128x512xf32>, vector<8x512xf32> -> vector<8x512xf32>
    %222 = arith.addf %25, %221 : vector<8x512xf32>
    %223 = vector.extract_strided_slice %222 {offsets = [0, 0], sizes = [8, 128], strides = [1, 1]} : vector<8x512xf32> to vector<8x128xf32>
    %224 = arith.negf %223 : vector<8x128xf32>
    %225 = math.exp %224 : vector<8x128xf32>
    %cst_58 = arith.constant 1.000000e+00 : f32
    %226 = vector.broadcast %cst_58 : f32 to vector<8x128xf32>
    %227 = arith.addf %226, %225 : vector<8x128xf32>
    %228 = arith.divf %226, %227 : vector<8x128xf32>
    %229 = vector.extract_strided_slice %222 {offsets = [0, 128], sizes = [8, 128], strides = [1, 1]} : vector<8x512xf32> to vector<8x128xf32>
    %230 = arith.negf %229 : vector<8x128xf32>
    %231 = math.exp %230 : vector<8x128xf32>
    %cst_59 = arith.constant 1.000000e+00 : f32
    %232 = vector.broadcast %cst_59 : f32 to vector<8x128xf32>
    %233 = arith.addf %232, %231 : vector<8x128xf32>
    %234 = arith.divf %232, %233 : vector<8x128xf32>
    %235 = vector.extract_strided_slice %222 {offsets = [0, 256], sizes = [8, 128], strides = [1, 1]} : vector<8x512xf32> to vector<8x128xf32>
    %236 = math.tanh %235 : vector<8x128xf32>
    %237 = vector.extract_strided_slice %222 {offsets = [0, 384], sizes = [8, 128], strides = [1, 1]} : vector<8x512xf32> to vector<8x128xf32>
    %238 = arith.negf %237 : vector<8x128xf32>
    %239 = math.exp %238 : vector<8x128xf32>
    %cst_60 = arith.constant 1.000000e+00 : f32
    %240 = vector.broadcast %cst_60 : f32 to vector<8x128xf32>
    %241 = arith.addf %240, %239 : vector<8x128xf32>
    %242 = arith.divf %240, %241 : vector<8x128xf32>
    %243 = arith.mulf %234, %217 : vector<8x128xf32>
    %244 = arith.mulf %228, %236 : vector<8x128xf32>
    %245 = arith.addf %243, %244 : vector<8x128xf32>
    %246 = math.tanh %245 : vector<8x128xf32>
    %247 = arith.mulf %242, %246 : vector<8x128xf32>
    %248 = arith.addf %247, %0 : vector<8x128xf32>
    %c0_61 = arith.constant 0 : index
    %c0_62 = arith.constant 0 : index
    %249 = vector.load %arg7[%c0_61, %c0_62] : memref<8x128xf32, #tpu.memory_space<vmem>>, vector<8x128xf32>
    tpu.vector_store %arg7[%c0_61, %c0_62], %248 {strides = array<i32>} : memref<8x128xf32, #tpu.memory_space<vmem>>, vector<8x128xf32>,
    return
  }
  func.func @transform_0(%arg0: i32) -> (i32, i32) {
    %c0_i32 = arith.constant 0 : i32
    %c0_i32_0 = arith.constant 0 : i32
    return %arg0, %c0_i32 : i32, i32
  }
  func.func @transform_1(%arg0: i32) -> (i32, i32) {
    %c0_i32 = arith.constant 0 : i32
    %c0_i32_0 = arith.constant 0 : i32
    %c0_i32_1 = arith.constant 0 : i32
    return %c0_i32, %c0_i32_0 : i32, i32
  }
  func.func @transform_2(%arg0: i32) -> (i32, i32) {
    %c0_i32 = arith.constant 0 : i32
    %c0_i32_0 = arith.constant 0 : i32
    %c0_i32_1 = arith.constant 0 : i32
    return %c0_i32, %c0_i32_0 : i32, i32
  }
  func.func @transform_3(%arg0: i32) -> (i32, i32) {
    %c0_i32 = arith.constant 0 : i32
    %c0_i32_0 = arith.constant 0 : i32
    %c0_i32_1 = arith.constant 0 : i32
    return %c0_i32, %c0_i32_0 : i32, i32
  }
  func.func @transform_4(%arg0: i32) -> (i32, i32) {
    %c0_i32 = arith.constant 0 : i32
    %c0_i32_0 = arith.constant 0 : i32
    %c0_i32_1 = arith.constant 0 : i32
    return %c0_i32, %c0_i32_0 : i32, i32
  }
  func.func @transform_5(%arg0: i32) -> (i32, i32) {
    %c0_i32 = arith.constant 0 : i32
    %c0_i32_0 = arith.constant 0 : i32
    %c0_i32_1 = arith.constant 0 : i32
    return %c0_i32, %c0_i32_0 : i32, i32
  }
  func.func @transform_6(%arg0: i32) -> (i32, i32) {
    %c0_i32 = arith.constant 0 : i32
    %c0_i32_0 = arith.constant 0 : i32
    return %arg0, %c0_i32 : i32, i32
  }
}

module attributes {stable_mosaic.version = 11 : i64} {
  func.func @_fce_kernel(%arg0: i32, %arg1: memref<8x128xf32, #tpu.memory_space<vmem>>, %arg2: memref<8x128xf32, #tpu.memory_space<vmem>>, %arg3: memref<128x512xf32, #tpu.memory_space<vmem>>, %arg4: memref<128x512xf32, #tpu.memory_space<vmem>>, %arg5: memref<128x512xf32, #tpu.memory_space<vmem>>, %arg6: memref<1x512xf32, #tpu.memory_space<vmem>>, %arg7: memref<8x128xf32, #tpu.memory_space<vmem>>) attributes {dimension_semantics = [#tpu.dimension_semantics<parallel>], iteration_bounds = array<i64: 1>, scalar_prefetch = 0 : i64, scratch_operands = 0 : i64, tpu.core_type = #tpu.core_type<tc>, window_params = [{transform_indices = @transform_0, window_bounds = array<i64: 8, 128>}, {pipeline_mode = #tpu.pipeline_mode<synchronous>, transform_indices = @transform_1, window_bounds = array<i64: 8, 128>}, {pipeline_mode = #tpu.pipeline_mode<synchronous>, transform_indices = @transform_2, window_bounds = array<i64: 128, 512>}, {pipeline_mode = #tpu.pipeline_mode<synchronous>, transform_indices = @transform_3, window_bounds = array<i64: 128, 512>}, {pipeline_mode = #tpu.pipeline_mode<synchronous>, transform_indices = @transform_4, window_bounds = array<i64: 128, 512>}, {pipeline_mode = #tpu.pipeline_mode<synchronous>, transform_indices = @transform_5, window_bounds = array<i64: 1, 512>}, {transform_indices = @transform_6, window_bounds = array<i64: 8, 128>}]} {
    %c0 = arith.constant 0 : index
    %c0_0 = arith.constant 0 : index
    %0 = vector.load %arg1[%c0, %c0_0] : memref<8x128xf32, #tpu.memory_space<vmem>>, vector<8x128xf32>
    %c0_1 = arith.constant 0 : index
    %c0_2 = arith.constant 0 : index
    %1 = vector.load %arg2[%c0_1, %c0_2] : memref<8x128xf32, #tpu.memory_space<vmem>>, vector<8x128xf32>
    %c0_3 = arith.constant 0 : index
    %c0_4 = arith.constant 0 : index
    %2 = vector.load %arg6[%c0_3, %c0_4] : memref<1x512xf32, #tpu.memory_space<vmem>>, vector<1x512xf32>
    %cst = arith.constant dense<0.000000e+00> : vector<8x8xf32>
    %3 = tpu.matmul %0, %1, %cst {dimension_numbers = #tpu.dot_dimension_numbers<[1], [1], [0], [0], [0, 0, 1, 0], [], []>} : vector<8x128xf32>, vector<8x128xf32>, vector<8x8xf32> -> vector<8x8xf32>
    %cst_5 = arith.constant dense<0xFF800000> : vector<8xf32>
    %4 = vector.multi_reduction <maximumf>, %3, %cst_5 [1] : vector<8x8xf32> to vector<8xf32>
    %5 = vector.shape_cast %4 : vector<8xf32> to vector<8x1xf32>
    %6 = vector.broadcast %5 : vector<8x1xf32> to vector<8x8xf32>
    %7 = arith.subf %3, %6 : vector<8x8xf32>
    %8 = math.exp %7 : vector<8x8xf32>
    %cst_6 = arith.constant dense<0.000000e+00> : vector<8xf32>
    %9 = vector.multi_reduction <add>, %8, %cst_6 [1] : vector<8x8xf32> to vector<8xf32>
    %10 = vector.shape_cast %9 : vector<8xf32> to vector<8x1xf32>
    %11 = tpu.reciprocal %10 {approx = true} : vector<8x1xf32> -> vector<8x1xf32>
    %12 = arith.mulf %10, %11 : vector<8x1xf32>
    %cst_7 = arith.constant 2.000000e+00 : f32
    %13 = vector.broadcast %cst_7 : f32 to vector<8x1xf32>
    %14 = arith.subf %13, %12 : vector<8x1xf32>
    %15 = arith.mulf %11, %14 : vector<8x1xf32>
    %16 = vector.broadcast %15 : vector<8x1xf32> to vector<8x8xf32>
    %17 = arith.mulf %8, %16 : vector<8x8xf32>
    %cst_8 = arith.constant dense<0.000000e+00> : vector<8x128xf32>
    %18 = tpu.matmul %17, %1, %cst_8 {dimension_numbers = #tpu.dot_dimension_numbers<[1], [0], [0], [1], [0, 0, 1, 1], [], []>} : vector<8x8xf32>, vector<8x128xf32>, vector<8x128xf32> -> vector<8x128xf32>
    %c0_9 = arith.constant 0 : index
    %c0_10 = arith.constant 0 : index
    %19 = vector.load %arg3[%c0_9, %c0_10] : memref<128x512xf32, #tpu.memory_space<vmem>>, vector<128x512xf32>
    %cst_11 = arith.constant dense<0.000000e+00> : vector<8x512xf32>
    %20 = tpu.matmul %0, %19, %cst_11 {dimension_numbers = #tpu.dot_dimension_numbers<[1], [0], [0], [1], [0, 0, 1, 1], [], []>} : vector<8x128xf32>, vector<128x512xf32>, vector<8x512xf32> -> vector<8x512xf32>
    %c0_12 = arith.constant 0 : index
    %c0_13 = arith.constant 0 : index
    %21 = vector.load %arg4[%c0_12, %c0_13] : memref<128x512xf32, #tpu.memory_space<vmem>>, vector<128x512xf32>
    %cst_14 = arith.constant dense<0.000000e+00> : vector<8x512xf32>
    %22 = tpu.matmul %18, %21, %cst_14 {dimension_numbers = #tpu.dot_dimension_numbers<[1], [0], [0], [1], [0, 0, 1, 1], [], []>} : vector<8x128xf32>, vector<128x512xf32>, vector<8x512xf32> -> vector<8x512xf32>
    %23 = arith.addf %20, %22 : vector<8x512xf32>
    %24 = vector.broadcast %2 : vector<1x512xf32> to vector<8x512xf32>
    %25 = arith.addf %23, %24 : vector<8x512xf32>
    %cst_15 = arith.constant 0.000000e+00 : f32
    %26 = vector.broadcast %cst_15 : f32 to vector<8x128xf32>
    %27 = vector.extract_strided_slice %25 {offsets = [0, 0], sizes = [8, 128], strides = [1, 1]} : vector<8x512xf32> to vector<8x128xf32>
    %28 = arith.negf %27 : vector<8x128xf32>
    %29 = math.exp %28 : vector<8x128xf32>
    %cst_16 = arith.constant 1.000000e+00 : f32
    %30 = vector.broadcast %cst_16 : f32 to vector<8x128xf32>
    %31 = arith.addf %30, %29 : vector<8x128xf32>
    %32 = arith.divf %30, %31 : vector<8x128xf32>
    %33 = vector.extract_strided_slice %25 {offsets = [0, 128], sizes = [8, 128], strides = [1, 1]} : vector<8x512xf32> to vector<8x128xf32>
    %34 = arith.negf %33 : vector<8x128xf32>
    %35 = math.exp %34 : vector<8x128xf32>
    %cst_17 = arith.constant 1.000000e+00 : f32
    %36 = vector.broadcast %cst_17 : f32 to vector<8x128xf32>
    %37 = arith.addf %36, %35 : vector<8x128xf32>
    %38 = arith.divf %36, %37 : vector<8x128xf32>
    %39 = vector.extract_strided_slice %25 {offsets = [0, 256], sizes = [8, 128], strides = [1, 1]} : vector<8x512xf32> to vector<8x128xf32>
    %40 = math.tanh %39 : vector<8x128xf32>
    %41 = vector.extract_strided_slice %25 {offsets = [0, 384], sizes = [8, 128], strides = [1, 1]} : vector<8x512xf32> to vector<8x128xf32>
    %42 = arith.negf %41 : vector<8x128xf32>
    %43 = math.exp %42 : vector<8x128xf32>
    %cst_18 = arith.constant 1.000000e+00 : f32
    %44 = vector.broadcast %cst_18 : f32 to vector<8x128xf32>
    %45 = arith.addf %44, %43 : vector<8x128xf32>
    %46 = arith.divf %44, %45 : vector<8x128xf32>
    %47 = arith.mulf %38, %26 : vector<8x128xf32>
    %48 = arith.mulf %32, %40 : vector<8x128xf32>
    %49 = arith.addf %47, %48 : vector<8x128xf32>
    %50 = math.tanh %49 : vector<8x128xf32>
    %51 = arith.mulf %46, %50 : vector<8x128xf32>
    %c0_i32 = arith.constant 0 : i32
    %c0_19 = arith.constant 0 : index
    %c0_20 = arith.constant 0 : index
    %52 = vector.load %arg5[%c0_19, %c0_20] : memref<128x512xf32, #tpu.memory_space<vmem>>, vector<128x512xf32>
    %cst_21 = arith.constant dense<0.000000e+00> : vector<8x512xf32>
    %53 = tpu.matmul %51, %52, %cst_21 {dimension_numbers = #tpu.dot_dimension_numbers<[1], [0], [0], [1], [0, 0, 1, 1], [], []>} : vector<8x128xf32>, vector<128x512xf32>, vector<8x512xf32> -> vector<8x512xf32>
    %54 = arith.addf %25, %53 : vector<8x512xf32>
    %55 = vector.extract_strided_slice %54 {offsets = [0, 0], sizes = [8, 128], strides = [1, 1]} : vector<8x512xf32> to vector<8x128xf32>
    %56 = arith.negf %55 : vector<8x128xf32>
    %57 = math.exp %56 : vector<8x128xf32>
    %cst_22 = arith.constant 1.000000e+00 : f32
    %58 = vector.broadcast %cst_22 : f32 to vector<8x128xf32>
    %59 = arith.addf %58, %57 : vector<8x128xf32>
    %60 = arith.divf %58, %59 : vector<8x128xf32>
    %61 = vector.extract_strided_slice %54 {offsets = [0, 128], sizes = [8, 128], strides = [1, 1]} : vector<8x512xf32> to vector<8x128xf32>
    %62 = arith.negf %61 : vector<8x128xf32>
    %63 = math.exp %62 : vector<8x128xf32>
    %cst_23 = arith.constant 1.000000e+00 : f32
    %64 = vector.broadcast %cst_23 : f32 to vector<8x128xf32>
    %65 = arith.addf %64, %63 : vector<8x128xf32>
    %66 = arith.divf %64, %65 : vector<8x128xf32>
    %67 = vector.extract_strided_slice %54 {offsets = [0, 256], sizes = [8, 128], strides = [1, 1]} : vector<8x512xf32> to vector<8x128xf32>
    %68 = math.tanh %67 : vector<8x128xf32>
    %69 = vector.extract_strided_slice %54 {offsets = [0, 384], sizes = [8, 128], strides = [1, 1]} : vector<8x512xf32> to vector<8x128xf32>
    %70 = arith.negf %69 : vector<8x128xf32>
    %71 = math.exp %70 : vector<8x128xf32>
    %cst_24 = arith.constant 1.000000e+00 : f32
    %72 = vector.broadcast %cst_24 : f32 to vector<8x128xf32>
    %73 = arith.addf %72, %71 : vector<8x128xf32>
    %74 = arith.divf %72, %73 : vector<8x128xf32>
    %75 = arith.mulf %66, %49 : vector<8x128xf32>
    %76 = arith.mulf %60, %68 : vector<8x128xf32>
    %77 = arith.addf %75, %76 : vector<8x128xf32>
    %78 = math.tanh %77 : vector<8x128xf32>
    %79 = arith.mulf %74, %78 : vector<8x128xf32>
    %c1_i32 = arith.constant 1 : i32
    %c0_25 = arith.constant 0 : index
    %c0_26 = arith.constant 0 : index
    %80 = vector.load %arg5[%c0_25, %c0_26] : memref<128x512xf32, #tpu.memory_space<vmem>>, vector<128x512xf32>
    %cst_27 = arith.constant dense<0.000000e+00> : vector<8x512xf32>
    %81 = tpu.matmul %79, %80, %cst_27 {dimension_numbers = #tpu.dot_dimension_numbers<[1], [0], [0], [1], [0, 0, 1, 1], [], []>} : vector<8x128xf32>, vector<128x512xf32>, vector<8x512xf32> -> vector<8x512xf32>
    %82 = arith.addf %25, %81 : vector<8x512xf32>
    %83 = vector.extract_strided_slice %82 {offsets = [0, 0], sizes = [8, 128], strides = [1, 1]} : vector<8x512xf32> to vector<8x128xf32>
    %84 = arith.negf %83 : vector<8x128xf32>
    %85 = math.exp %84 : vector<8x128xf32>
    %cst_28 = arith.constant 1.000000e+00 : f32
    %86 = vector.broadcast %cst_28 : f32 to vector<8x128xf32>
    %87 = arith.addf %86, %85 : vector<8x128xf32>
    %88 = arith.divf %86, %87 : vector<8x128xf32>
    %89 = vector.extract_strided_slice %82 {offsets = [0, 128], sizes = [8, 128], strides = [1, 1]} : vector<8x512xf32> to vector<8x128xf32>
    %90 = arith.negf %89 : vector<8x128xf32>
    %91 = math.exp %90 : vector<8x128xf32>
    %cst_29 = arith.constant 1.000000e+00 : f32
    %92 = vector.broadcast %cst_29 : f32 to vector<8x128xf32>
    %93 = arith.addf %92, %91 : vector<8x128xf32>
    %94 = arith.divf %92, %93 : vector<8x128xf32>
    %95 = vector.extract_strided_slice %82 {offsets = [0, 256], sizes = [8, 128], strides = [1, 1]} : vector<8x512xf32> to vector<8x128xf32>
    %96 = math.tanh %95 : vector<8x128xf32>
    %97 = vector.extract_strided_slice %82 {offsets = [0, 384], sizes = [8, 128], strides = [1, 1]} : vector<8x512xf32> to vector<8x128xf32>
    %98 = arith.negf %97 : vector<8x128xf32>
    %99 = math.exp %98 : vector<8x128xf32>
    %cst_30 = arith.constant 1.000000e+00 : f32
    %100 = vector.broadcast %cst_30 : f32 to vector<8x128xf32>
    %101 = arith.addf %100, %99 : vector<8x128xf32>
    %102 = arith.divf %100, %101 : vector<8x128xf32>
    %103 = arith.mulf %94, %77 : vector<8x128xf32>
    %104 = arith.mulf %88, %96 : vector<8x128xf32>
    %105 = arith.addf %103, %104 : vector<8x128xf32>
    %106 = math.tanh %105 : vector<8x128xf32>
    %107 = arith.mulf %102, %106 : vector<8x128xf32>
    %c2_i32 = arith.constant 2 : i32
    %c0_31 = arith.constant 0 : index
    %c0_32 = arith.constant 0 : index
    %108 = vector.load %arg5[%c0_31, %c0_32] : memref<128x512xf32, #tpu.memory_space<vmem>>, vector<128x512xf32>
    %cst_33 = arith.constant dense<0.000000e+00> : vector<8x512xf32>
    %109 = tpu.matmul %107, %108, %cst_33 {dimension_numbers = #tpu.dot_dimension_numbers<[1], [0], [0], [1], [0, 0, 1, 1], [], []>} : vector<8x128xf32>, vector<128x512xf32>, vector<8x512xf32> -> vector<8x512xf32>
    %110 = arith.addf %25, %109 : vector<8x512xf32>
    %111 = vector.extract_strided_slice %110 {offsets = [0, 0], sizes = [8, 128], strides = [1, 1]} : vector<8x512xf32> to vector<8x128xf32>
    %112 = arith.negf %111 : vector<8x128xf32>
    %113 = math.exp %112 : vector<8x128xf32>
    %cst_34 = arith.constant 1.000000e+00 : f32
    %114 = vector.broadcast %cst_34 : f32 to vector<8x128xf32>
    %115 = arith.addf %114, %113 : vector<8x128xf32>
    %116 = arith.divf %114, %115 : vector<8x128xf32>
    %117 = vector.extract_strided_slice %110 {offsets = [0, 128], sizes = [8, 128], strides = [1, 1]} : vector<8x512xf32> to vector<8x128xf32>
    %118 = arith.negf %117 : vector<8x128xf32>
    %119 = math.exp %118 : vector<8x128xf32>
    %cst_35 = arith.constant 1.000000e+00 : f32
    %120 = vector.broadcast %cst_35 : f32 to vector<8x128xf32>
    %121 = arith.addf %120, %119 : vector<8x128xf32>
    %122 = arith.divf %120, %121 : vector<8x128xf32>
    %123 = vector.extract_strided_slice %110 {offsets = [0, 256], sizes = [8, 128], strides = [1, 1]} : vector<8x512xf32> to vector<8x128xf32>
    %124 = math.tanh %123 : vector<8x128xf32>
    %125 = vector.extract_strided_slice %110 {offsets = [0, 384], sizes = [8, 128], strides = [1, 1]} : vector<8x512xf32> to vector<8x128xf32>
    %126 = arith.negf %125 : vector<8x128xf32>
    %127 = math.exp %126 : vector<8x128xf32>
    %cst_36 = arith.constant 1.000000e+00 : f32
    %128 = vector.broadcast %cst_36 : f32 to vector<8x128xf32>
    %129 = arith.addf %128, %127 : vector<8x128xf32>
    %130 = arith.divf %128, %129 : vector<8x128xf32>
    %131 = arith.mulf %122, %105 : vector<8x128xf32>
    %132 = arith.mulf %116, %124 : vector<8x128xf32>
    %133 = arith.addf %131, %132 : vector<8x128xf32>
    %134 = math.tanh %133 : vector<8x128xf32>
    %135 = arith.mulf %130, %134 : vector<8x128xf32>
    %c3_i32 = arith.constant 3 : i32
    %c0_37 = arith.constant 0 : index
    %c0_38 = arith.constant 0 : index
    %136 = vector.load %arg5[%c0_37, %c0_38] : memref<128x512xf32, #tpu.memory_space<vmem>>, vector<128x512xf32>
    %cst_39 = arith.constant dense<0.000000e+00> : vector<8x512xf32>
    %137 = tpu.matmul %135, %136, %cst_39 {dimension_numbers = #tpu.dot_dimension_numbers<[1], [0], [0], [1], [0, 0, 1, 1], [], []>} : vector<8x128xf32>, vector<128x512xf32>, vector<8x512xf32> -> vector<8x512xf32>
    %138 = arith.addf %25, %137 : vector<8x512xf32>
    %139 = vector.extract_strided_slice %138 {offsets = [0, 0], sizes = [8, 128], strides = [1, 1]} : vector<8x512xf32> to vector<8x128xf32>
    %140 = arith.negf %139 : vector<8x128xf32>
    %141 = math.exp %140 : vector<8x128xf32>
    %cst_40 = arith.constant 1.000000e+00 : f32
    %142 = vector.broadcast %cst_40 : f32 to vector<8x128xf32>
    %143 = arith.addf %142, %141 : vector<8x128xf32>
    %144 = arith.divf %142, %143 : vector<8x128xf32>
    %145 = vector.extract_strided_slice %138 {offsets = [0, 128], sizes = [8, 128], strides = [1, 1]} : vector<8x512xf32> to vector<8x128xf32>
    %146 = arith.negf %145 : vector<8x128xf32>
    %147 = math.exp %146 : vector<8x128xf32>
    %cst_41 = arith.constant 1.000000e+00 : f32
    %148 = vector.broadcast %cst_41 : f32 to vector<8x128xf32>
    %149 = arith.addf %148, %147 : vector<8x128xf32>
    %150 = arith.divf %148, %149 : vector<8x128xf32>
    %151 = vector.extract_strided_slice %138 {offsets = [0, 256], sizes = [8, 128], strides = [1, 1]} : vector<8x512xf32> to vector<8x128xf32>
    %152 = math.tanh %151 : vector<8x128xf32>
    %153 = vector.extract_strided_slice %138 {offsets = [0, 384], sizes = [8, 128], strides = [1, 1]} : vector<8x512xf32> to vector<8x128xf32>
    %154 = arith.negf %153 : vector<8x128xf32>
    %155 = math.exp %154 : vector<8x128xf32>
    %cst_42 = arith.constant 1.000000e+00 : f32
    %156 = vector.broadcast %cst_42 : f32 to vector<8x128xf32>
    %157 = arith.addf %156, %155 : vector<8x128xf32>
    %158 = arith.divf %156, %157 : vector<8x128xf32>
    %159 = arith.mulf %150, %133 : vector<8x128xf32>
    %160 = arith.mulf %144, %152 : vector<8x128xf32>
    %161 = arith.addf %159, %160 : vector<8x128xf32>
    %162 = math.tanh %161 : vector<8x128xf32>
    %163 = arith.mulf %158, %162 : vector<8x128xf32>
    %c4_i32 = arith.constant 4 : i32
    %c0_43 = arith.constant 0 : index
    %c0_44 = arith.constant 0 : index
    %164 = vector.load %arg5[%c0_43, %c0_44] : memref<128x512xf32, #tpu.memory_space<vmem>>, vector<128x512xf32>
    %cst_45 = arith.constant dense<0.000000e+00> : vector<8x512xf32>
    %165 = tpu.matmul %163, %164, %cst_45 {dimension_numbers = #tpu.dot_dimension_numbers<[1], [0], [0], [1], [0, 0, 1, 1], [], []>} : vector<8x128xf32>, vector<128x512xf32>, vector<8x512xf32> -> vector<8x512xf32>
    %166 = arith.addf %25, %165 : vector<8x512xf32>
    %167 = vector.extract_strided_slice %166 {offsets = [0, 0], sizes = [8, 128], strides = [1, 1]} : vector<8x512xf32> to vector<8x128xf32>
    %168 = arith.negf %167 : vector<8x128xf32>
    %169 = math.exp %168 : vector<8x128xf32>
    %cst_46 = arith.constant 1.000000e+00 : f32
    %170 = vector.broadcast %cst_46 : f32 to vector<8x128xf32>
    %171 = arith.addf %170, %169 : vector<8x128xf32>
    %172 = arith.divf %170, %171 : vector<8x128xf32>
    %173 = vector.extract_strided_slice %166 {offsets = [0, 128], sizes = [8, 128], strides = [1, 1]} : vector<8x512xf32> to vector<8x128xf32>
    %174 = arith.negf %173 : vector<8x128xf32>
    %175 = math.exp %174 : vector<8x128xf32>
    %cst_47 = arith.constant 1.000000e+00 : f32
    %176 = vector.broadcast %cst_47 : f32 to vector<8x128xf32>
    %177 = arith.addf %176, %175 : vector<8x128xf32>
    %178 = arith.divf %176, %177 : vector<8x128xf32>
    %179 = vector.extract_strided_slice %166 {offsets = [0, 256], sizes = [8, 128], strides = [1, 1]} : vector<8x512xf32> to vector<8x128xf32>
    %180 = math.tanh %179 : vector<8x128xf32>
    %181 = vector.extract_strided_slice %166 {offsets = [0, 384], sizes = [8, 128], strides = [1, 1]} : vector<8x512xf32> to vector<8x128xf32>
    %182 = arith.negf %181 : vector<8x128xf32>
    %183 = math.exp %182 : vector<8x128xf32>
    %cst_48 = arith.constant 1.000000e+00 : f32
    %184 = vector.broadcast %cst_48 : f32 to vector<8x128xf32>
    %185 = arith.addf %184, %183 : vector<8x128xf32>
    %186 = arith.divf %184, %185 : vector<8x128xf32>
    %187 = arith.mulf %178, %161 : vector<8x128xf32>
    %188 = arith.mulf %172, %180 : vector<8x128xf32>
    %189 = arith.addf %187, %188 : vector<8x128xf32>
    %190 = math.tanh %189 : vector<8x128xf32>
    %191 = arith.mulf %186, %190 : vector<8x128xf32>
    %c5_i32 = arith.constant 5 : i32
    %c0_49 = arith.constant 0 : index
    %c0_50 = arith.constant 0 : index
    %192 = vector.load %arg5[%c0_49, %c0_50] : memref<128x512xf32, #tpu.memory_space<vmem>>, vector<128x512xf32>
    %cst_51 = arith.constant dense<0.000000e+00> : vector<8x512xf32>
    %193 = tpu.matmul %191, %192, %cst_51 {dimension_numbers = #tpu.dot_dimension_numbers<[1], [0], [0], [1], [0, 0, 1, 1], [], []>} : vector<8x128xf32>, vector<128x512xf32>, vector<8x512xf32> -> vector<8x512xf32>
    %194 = arith.addf %25, %193 : vector<8x512xf32>
    %195 = vector.extract_strided_slice %194 {offsets = [0, 0], sizes = [8, 128], strides = [1, 1]} : vector<8x512xf32> to vector<8x128xf32>
    %196 = arith.negf %195 : vector<8x128xf32>
    %197 = math.exp %196 : vector<8x128xf32>
    %cst_52 = arith.constant 1.000000e+00 : f32
    %198 = vector.broadcast %cst_52 : f32 to vector<8x128xf32>
    %199 = arith.addf %198, %197 : vector<8x128xf32>
    %200 = arith.divf %198, %199 : vector<8x128xf32>
    %201 = vector.extract_strided_slice %194 {offsets = [0, 128], sizes = [8, 128], strides = [1, 1]} : vector<8x512xf32> to vector<8x128xf32>
    %202 = arith.negf %201 : vector<8x128xf32>
    %203 = math.exp %202 : vector<8x128xf32>
    %cst_53 = arith.constant 1.000000e+00 : f32
    %204 = vector.broadcast %cst_53 : f32 to vector<8x128xf32>
    %205 = arith.addf %204, %203 : vector<8x128xf32>
    %206 = arith.divf %204, %205 : vector<8x128xf32>
    %207 = vector.extract_strided_slice %194 {offsets = [0, 256], sizes = [8, 128], strides = [1, 1]} : vector<8x512xf32> to vector<8x128xf32>
    %208 = math.tanh %207 : vector<8x128xf32>
    %209 = vector.extract_strided_slice %194 {offsets = [0, 384], sizes = [8, 128], strides = [1, 1]} : vector<8x512xf32> to vector<8x128xf32>
    %210 = arith.negf %209 : vector<8x128xf32>
    %211 = math.exp %210 : vector<8x128xf32>
    %cst_54 = arith.constant 1.000000e+00 : f32
    %212 = vector.broadcast %cst_54 : f32 to vector<8x128xf32>
    %213 = arith.addf %212, %211 : vector<8x128xf32>
    %214 = arith.divf %212, %213 : vector<8x128xf32>
    %215 = arith.mulf %206, %189 : vector<8x128xf32>
    %216 = arith.mulf %200, %208 : vector<8x128xf32>
    %217 = arith.addf %215, %216 : vector<8x128xf32>
    %218 = math.tanh %217 : vector<8x128xf32>
    %219 = arith.mulf %214, %218 : vector<8x128xf32>
    %c6_i32 = arith.constant 6 : i32
    %c0_55 = arith.constant 0 : index
    %c0_56 = arith.constant 0 : index
    %220 = vector.load %arg5[%c0_55, %c0_56] : memref<128x512xf32, #tpu.memory_space<vmem>>, vector<128x512xf32>
    %cst_57 = arith.constant dense<0.000000e+00> : vector<8x512xf32>
    %221 = tpu.matmul %219, %220, %cst_57 {dimension_numbers = #tpu.dot_dimension_numbers<[1], [0], [0], [1], [0, 0, 1, 1], [], []>} : vector<8x128xf32>, vector<128x512xf32>, vector<8x512xf32> -> vector<8x512xf32>
    %222 = arith.addf %25, %221 : vector<8x512xf32>
    %223 = vector.extract_strided_slice %222 {offsets = [0, 0], sizes = [8, 128], strides = [1, 1]} : vector<8x512xf32> to vector<8x128xf32>
    %224 = arith.negf %223 : vector<8x128xf32>
    %225 = math.exp %224 : vector<8x128xf32>
    %cst_58 = arith.constant 1.000000e+00 : f32
    %226 = vector.broadcast %cst_58 : f32 to vector<8x128xf32>
    %227 = arith.addf %226, %225 : vector<8x128xf32>
    %228 = arith.divf %226, %227 : vector<8x128xf32>
    %229 = vector.extract_strided_slice %222 {offsets = [0, 128], sizes = [8, 128], strides = [1, 1]} : vector<8x512xf32> to vector<8x128xf32>
    %230 = arith.negf %229 : vector<8x128xf32>
    %231 = math.exp %230 : vector<8x128xf32>
    %cst_59 = arith.constant 1.000000e+00 : f32
    %232 = vector.broadcast %cst_59 : f32 to vector<8x128xf32>
    %233 = arith.addf %232, %231 : vector<8x128xf32>
    %234 = arith.divf %232, %233 : vector<8x128xf32>
    %235 = vector.extract_strided_slice %222 {offsets = [0, 256], sizes = [8, 128], strides = [1, 1]} : vector<8x512xf32> to vector<8x128xf32>
    %236 = math.tanh %235 : vector<8x128xf32>
    %237 = vector.extract_strided_slice %222 {offsets = [0, 384], sizes = [8, 128], strides = [1, 1]} : vector<8x512xf32> to vector<8x128xf32>
    %238 = arith.negf %237 : vector<8x128xf32>
    %239 = math.exp %238 : vector<8x128xf32>
    %cst_60 = arith.constant 1.000000e+00 : f32
    %240 = vector.broadcast %cst_60 : f32 to vector<8x128xf32>
    %241 = arith.addf %240, %239 : vector<8x128xf32>
    %242 = arith.divf %240, %241 : vector<8x128xf32>
    %243 = arith.mulf %234, %217 : vector<8x128xf32>
    %244 = arith.mulf %228, %236 : vector<8x128xf32>
    %245 = arith.addf %243, %244 : vector<8x128xf32>
    %246 = math.tanh %245 : vector<8x128xf32>
    %247 = arith.mulf %242, %246 : vector<8x128xf32>
    %248 = arith.addf %247, %0 : vector<8x128xf32>
    %c0_61 = arith.constant 0 : index
    %c0_62 = arith.constant 0 : index
    %249 = vector.load %arg7[%c0_61, %c0_62] : memref<8x128xf32, #tpu.memory_space<vmem>>, vector<8x128xf32>
    tpu.vector_store %arg7[%c0_61, %c0_62], %248 {strides = array<i32>} : memref<8x128xf32, #tpu.memory_space<vmem>>, vector<8x128xf32>,
    return
  }
  func.func @transform_0(%arg0: i32) -> (i32, i32) {
    %c0_i32 = arith.constant 0 : i32
    %c0_i32_0 = arith.constant 0 : i32
    return %arg0, %c0_i32 : i32, i32
  }
  func.func @transform_1(%arg0: i32) -> (i32, i32) {
    %c0_i32 = arith.constant 0 : i32
    %c0_i32_0 = arith.constant 0 : i32
    %c0_i32_1 = arith.constant 0 : i32
    return %c0_i32, %c0_i32_0 : i32, i32
  }
  func.func @transform_2(%arg0: i32) -> (i32, i32) {
    %c0_i32 = arith.constant 0 : i32
    %c0_i32_0 = arith.constant 0 : i32
    %c0_i32_1 = arith.constant 0 : i32
    return %c0_i32, %c0_i32_0 : i32, i32
  }
  func.func @transform_3(%arg0: i32) -> (i32, i32) {
    %c0_i32 = arith.constant 0 : i32
    %c0_i32_0 = arith.constant 0 : i32
    %c0_i32_1 = arith.constant 0 : i32
    return %c0_i32, %c0_i32_0 : i32, i32
  }
  func.func @transform_4(%arg0: i32) -> (i32, i32) {
    %c0_i32 = arith.constant 0 : i32
    %c0_i32_0 = arith.constant 0 : i32
    %c0_i32_1 = arith.constant 0 : i32
    return %c0_i32, %c0_i32_0 : i32, i32
  }
  func.func @transform_5(%arg0: i32) -> (i32, i32) {
    %c0_i32 = arith.constant 0 : i32
    %c0_i32_0 = arith.constant 0 : i32
    %c0_i32_1 = arith.constant 0 : i32
    return %c0_i32, %c0_i32_0 : i32, i32
  }
  func.func @transform_6(%arg0: i32) -> (i32, i32) {
    %c0_i32 = arith.constant 0 : i32
    %c0_i32_0 = arith.constant 0 : i32
    return %arg0, %c0_i32 : i32, i32
  }
}

</mosaic_0001>

<bundles_post_ra>
// kernel: tpu_custom_call.1
= control target key start
LH: loop header
LB: loop body
LE: loop exit
PB: predicated region body
PF: predicated region fallthrough
CT: control target
= control target key end

     0   :  { %11 = vsyncpa [#allocation3], 0  ;;  %s2905_s0 = inlined_call_operand.hbm [shape: f32[8,128], index: 0, kind: input, shape index: {}]   ;;  %s2906_s1 = inlined_call_operand.hbm [shape: f32[8,128], index: 1, kind: input, shape index: {}]   ;;  %s2907_s2 = inlined_call_operand.hbm [shape: f32[128,512], index: 2, kind: input, shape index: {}]   ;;  %s2908_s3 = inlined_call_operand.hbm [shape: f32[128,512], index: 3, kind: input, shape index: {}]   ;;  %s2909_s4 = inlined_call_operand.hbm [shape: f32[128,512], index: 4, kind: input, shape index: {}]   ;;  %s2910_s5 = inlined_call_operand.vmem [shape: f32[1,512], index: 5, kind: input, shape index: {}]   ;;  %s2911_s6 = inlined_call_operand.hbm [shape: f32[8,128], index: 6, kind: output, shape index: {}]  }
   0x1   :  { %12 = vsyncpa [#allocation6], 0 }
   0x2   :  { %13 = vsyncpa [#allocation9], 0  ;;  %s31_s23 = sshll.u32 %s2906_s1, 4  ;;  %s32_s23 = int_to_ptr.hbm [resolvable:$true] %s31_s23 }
   0x3   :  { %14 = vsyncpa [#allocation4], 0  ;;  %s2019_s24 = smov [#allocation5]   ;;  %s54_s28 = sshll.u32 %s2908_s3, 4  ;;  %s55_s28 = int_to_ptr.hbm [resolvable:$true] %s54_s28 }
   0x4   :  { %s33_s25 = sshll.u32 %s2019_s24, 4  ;;  %s2020_s29 = smov [#allocation8]   ;;  %s34_s25 = int_to_ptr.vmem [resolvable:$true] %s33_s25 }
   0x5   :  { %36 = dma.hbm_to_vmem [thread:$0]  %s32_s23, 128, %s34_s25, [#allocation6]  }
   0x6   :  { %s56_s30 = sshll.u32 %s2020_s29, 4  ;;  %s20_s9 = sshll.u32 %s2905_s0, 4  ;;  %s57_s30 = int_to_ptr.vmem [resolvable:$true] %s56_s30  ;;  %s21_s9 = int_to_ptr.hbm [resolvable:$true] %s20_s9 }
   0x7   :  { %s2021_s1 = smov 512   ;;  %s2022_s10 = smov 32  }
   0x8   :  { %62 = dma.hbm_to_vmem [thread:$0]  %s55_s28, 8192, %s57_s30, [#allocation9], %s2021_s1, %s2021_s1, %s2022_s10  }
   0x9   :  { %s41_s13 = sshll.u32 %s2907_s2, 4  ;;  %s2023_s14 = smov [#allocation2]   ;;  %s42_s13 = int_to_ptr.hbm [resolvable:$true] %s41_s13 }
   0xa   :  { %s22_s15 = sshll.u32 %s2023_s14, 4  ;;  %s2024_s3 = smov [#allocation7]   ;;  %s23_s15 = int_to_ptr.vmem [resolvable:$true] %s22_s15 }
   0xb   :  { %25 = dma.hbm_to_vmem [thread:$0]  %s21_s9, 128, %s23_s15, [#allocation3]  }
   0xc   :  { %s43_s16 = sshll.u32 %s2024_s3, 4  ;;  %s67_s0 = sshll.u32 %s2909_s4, 4  ;;  %s44_s16 = int_to_ptr.vmem [resolvable:$true] %s43_s16  ;;  %s68_s0 = int_to_ptr.hbm [resolvable:$true] %s67_s0 }
   0xd   :  { %49 = dma.hbm_to_vmem [thread:$0]  %s42_s13, 8192, %s44_s16, [#allocation6], %s2021_s1, %s2021_s1, %s2022_s10  }
   0xe   :  { %s2025_s19 = smov [#allocation10]  }
   0xf   :  { %s69_s20 = sshll.u32 %s2025_s19, 4  ;;  %s70_s20 = int_to_ptr.vmem [resolvable:$true] %s69_s20 }
  0x10   :  { %75 = dma.hbm_to_vmem [thread:$0]  %s68_s0, 8192, %s70_s20, [#allocation9], %s2021_s1, %s2021_s1, %s2022_s10  }
  0x11   :  { %2011 = dma.done.wait [#allocation3], 128  }
  0x12   :  { %2012 = vsyncadd [#allocation3], 4294967168 }
  0x13   :  { %2013 = dma.done.wait [#allocation6], 8320  }
  0x14   :  { %2014 = vsyncadd [#allocation6], 4294958976 }
  0x15   :  { %2015 = dma.done.wait [#allocation9], 16384  }
  0x16   :  { %2016 = vsyncadd [#allocation9], 4294950912  ;;  %v99_v0 = vld [vmem:[#allocation5] sm:$0xff]  ;;  %v2077_v1 = vld [vmem:[#allocation2] sm:$0xff]  ;;  %vm121_vm0 = vcmask 64512   ;;  %s1625_s24 = sshll.u32 %s2911_s6, 4  ;;  %s1626_s24 = int_to_ptr.hbm [resolvable:$true] %s1625_s24 }
  0x17   :  { %116 = vmatpush.xpose.msra.mxu0 %v99_v0  ;;  %154 = vmatpush.msra.mxu1 %v99_v0  ;;  %v283_v9 = vld [vmem:[#allocation8 + $0x1e0] sm:$0xff]  ;;  %v284_v10 = vld [vmem:[#allocation8 + $0x1e8] sm:$0xff]  ;;  %v285_v11 = vld [vmem:[#allocation8 + $0x1f0] sm:$0xff] }
  0x18   :  { %287 = vmatpush.msra.mxu2 %v283_v9  ;;  %307 = vmatpush.msra.mxu3 %v284_v10  ;;  %v286_v12 = vld [vmem:[#allocation8 + $0x1f8] sm:$0xff]  ;;  %v279_v13 = vld [vmem:[#allocation8 + $0x1c0] sm:$0xff]  ;;  %v280_v14 = vld [vmem:[#allocation8 + $0x1c8] sm:$0xff] }
  0x19   :  { %327 = vmatpush.msrb.mxu1 %v285_v11  ;;  %v281_v15 = vld [vmem:[#allocation8 + $0x1d0] sm:$0xff]  ;;  %v282_v16 = vld [vmem:[#allocation8 + $0x1d8] sm:$0xff]  ;;  %v275_v17 = vld [vmem:[#allocation8 + $0x1a0] sm:$0xff] }
  0x1a   :  { %117 = vmatmul.f32.vlgmr.msra.gmra.mxu0 %v2077_v1  ;;  %288 = vmatpush.msra.mxu2 %v279_v13  ;;  %v276_v18 = vld [vmem:[#allocation8 + $0x1a8] sm:$0xff]  ;;  %v277_v19 = vld [vmem:[#allocation8 + $0x1b0] sm:$0xff]  ;;  %v278_v20 = vld [vmem:[#allocation8 + $0x1b8] sm:$0xff] }
  0x1b   :  { %347 = vmatpush.msrb.mxu0 %v286_v12  ;;  %308 = vmatpush.msra.mxu3 %v280_v14  ;;  %v271_v21 = vld [vmem:[#allocation8 + $0x180] sm:$0xff]  ;;  %v272_v22 = vld [vmem:[#allocation8 + $0x188] sm:$0xff]  ;;  %v273_v23 = vld [vmem:[#allocation8 + $0x190] sm:$0xff] }
  0x1c   :  { %328 = vmatpush.msrb.mxu1 %v281_v15  ;;  %289 = vmatpush.msra.mxu2 %v275_v17  ;;  %v274_v24 = vld [vmem:[#allocation8 + $0x198] sm:$0xff]  ;;  %v267_v25 = vld [vmem:[#allocation8 + $0x160] sm:$0xff]  ;;  %v268_v26 = vld [vmem:[#allocation8 + $0x168] sm:$0xff] }
  0x1d   :  { %348 = vmatpush.msrb.mxu0 %v282_v16  ;;  %309 = vmatpush.msra.mxu3 %v276_v18  ;;  %v269_v27 = vld [vmem:[#allocation8 + $0x170] sm:$0xff]  ;;  %v270_v28 = vld [vmem:[#allocation8 + $0x178] sm:$0xff]  ;;  %v263_v29 = vld [vmem:[#allocation8 + $0x140] sm:$0xff] }
  0x1e   :  { %329 = vmatpush.msrb.mxu1 %v277_v19  ;;  %290 = vmatpush.msra.mxu2 %v271_v21  ;;  %v264_v30 = vld [vmem:[#allocation8 + $0x148] sm:$0xff]  ;;  %v265_v31 = vld [vmem:[#allocation8 + $0x150] sm:$0xff]  ;;  %v266_v32 = vld [vmem:[#allocation8 + $0x158] sm:$0xff] }
  0x1f   :  { %349 = vmatpush.msrb.mxu0 %v278_v20  ;;  %310 = vmatpush.msra.mxu3 %v272_v22  ;;  %v259_v33 = vld [vmem:[#allocation8 + $0x120] sm:$0xff]  ;;  %v260_v34 = vld [vmem:[#allocation8 + $0x128] sm:$0xff]  ;;  %v261_v35 = vld [vmem:[#allocation8 + $0x130] sm:$0xff] }
  0x20   :  { %330 = vmatpush.msrb.mxu1 %v273_v23  ;;  %291 = vmatpush.msra.mxu2 %v267_v25  ;;  %v262_v36 = vld [vmem:[#allocation8 + $0x138] sm:$0xff]  ;;  %v255_v37 = vld [vmem:[#allocation8 + $0x100] sm:$0xff]  ;;  %v256_v38 = vld [vmem:[#allocation8 + $0x108] sm:$0xff] }
  0x21   :  { %350 = vmatpush.msrb.mxu0 %v274_v24  ;;  %311 = vmatpush.msra.mxu3 %v268_v26  ;;  %v257_v39 = vld [vmem:[#allocation8 + $0x110] sm:$0xff]  ;;  %v258_v40 = vld [vmem:[#allocation8 + $0x118] sm:$0xff]  ;;  %v251_v41 = vld [vmem:[#allocation8 + $0xe0] sm:$0xff] }
  0x22   :  { %331 = vmatpush.msrb.mxu1 %v269_v27  ;;  %292 = vmatpush.msra.mxu2 %v263_v29  ;;  %v252_v42 = vld [vmem:[#allocation8 + $0xe8] sm:$0xff]  ;;  %v253_v43 = vld [vmem:[#allocation8 + $0xf0] sm:$0xff]  ;;  %v254_v44 = vld [vmem:[#allocation8 + $0xf8] sm:$0xff] }
  0x23   :  { %351 = vmatpush.msrb.mxu0 %v270_v28  ;;  %312 = vmatpush.msra.mxu3 %v264_v30  ;;  %v247_v46 = vld [vmem:[#allocation8 + $0xc0] sm:$0xff]  ;;  %v248_v47 = vld [vmem:[#allocation8 + $0xc8] sm:$0xff]  ;;  %v249_v48 = vld [vmem:[#allocation8 + $0xd0] sm:$0xff] }
  0x24   :  { %332 = vmatpush.msrb.mxu1 %v265_v31  ;;  %293 = vmatpush.msra.mxu2 %v259_v33  ;;  %v250_v49 = vld [vmem:[#allocation8 + $0xd8] sm:$0xff]  ;;  %v243_v50 = vld [vmem:[#allocation8 + $0xa0] sm:$0xff]  ;;  %v244_v51 = vld [vmem:[#allocation8 + $0xa8] sm:$0xff] }
  0x25   :  { %352 = vmatpush.msrb.mxu0 %v266_v32  ;;  %313 = vmatpush.msra.mxu3 %v260_v34  ;;  %v245_v52 = vld [vmem:[#allocation8 + $0xb0] sm:$0xff]  ;;  %v246_v53 = vld [vmem:[#allocation8 + $0xb8] sm:$0xff]  ;;  %v239_v54 = vld [vmem:[#allocation8 + $0x80] sm:$0xff] }
  0x26   :  { %333 = vmatpush.msrb.mxu1 %v261_v35  ;;  %294 = vmatpush.msra.mxu2 %v255_v37  ;;  %v240_v55 = vld [vmem:[#allocation8 + $0x88] sm:$0xff]  ;;  %v241_v56 = vld [vmem:[#allocation8 + $0x90] sm:$0xff]  ;;  %v242_v57 = vld [vmem:[#allocation8 + $0x98] sm:$0xff] }
  0x27   :  { %353 = vmatpush.msrb.mxu0 %v262_v36  ;;  %314 = vmatpush.msra.mxu3 %v256_v38  ;;  %v235_v58 = vld [vmem:[#allocation8 + $0x60] sm:$0xff]  ;;  %v236_v59 = vld [vmem:[#allocation8 + $0x68] sm:$0xff]  ;;  %v237_v61 = vld [vmem:[#allocation8 + $0x70] sm:$0xff] }
  0x28   :  { %334 = vmatpush.msrb.mxu1 %v257_v39  ;;  %295 = vmatpush.msra.mxu2 %v251_v41  ;;  %v238_v62 = vld [vmem:[#allocation8 + $0x78] sm:$0xff]  ;;  %v231_v0 = vld [vmem:[#allocation8 + $0x40] sm:$0xff]  ;;  %v229_v9 = vld [vmem:[#allocation8 + $0x30] sm:$0xff] }
  0x29   :  { %354 = vmatpush.msrb.mxu0 %v258_v40  ;;  %315 = vmatpush.msra.mxu3 %v252_v42  ;;  %v230_v10 = vld [vmem:[#allocation8 + $0x38] sm:$0xff]  ;;  %v223_v12 = vld [vmem:[#allocation8] sm:$0xff]  ;;  %v224_v13 = vld [vmem:[#allocation8 + $0x8] sm:$0xff] }
  0x2a   :  { %335 = vmatpush.msrb.mxu1 %v253_v43  ;;  %296 = vmatpush.msra.mxu2 %v247_v46  ;;  %v226_v14 = vld [vmem:[#allocation8 + $0x18] sm:$0xff]  ;;  %v225_v16 = vld [vmem:[#allocation8 + $0x10] sm:$0xff]  ;;  %v219_v17 = vld [vmem:[#allocation7 + $0x1e0] sm:$0xff] }
  0x2b   :  { %355 = vmatpush.msrb.mxu0 %v254_v44  ;;  %316 = vmatpush.msra.mxu3 %v248_v47  ;;  %v220_v18 = vld [vmem:[#allocation7 + $0x1e8] sm:$0xff]  ;;  %v221_v19 = vld [vmem:[#allocation7 + $0x1f0] sm:$0xff]  ;;  %v222_v20 = vld [vmem:[#allocation7 + $0x1f8] sm:$0xff] }
  0x2c   :  { %336 = vmatpush.msrb.mxu1 %v249_v48  ;;  %297 = vmatpush.msra.mxu2 %v243_v50  ;;  %v215_v21 = vld [vmem:[#allocation7 + $0x1c0] sm:$0xff]  ;;  %v216_v22 = vld [vmem:[#allocation7 + $0x1c8] sm:$0xff]  ;;  %v217_v23 = vld [vmem:[#allocation7 + $0x1d0] sm:$0xff] }
  0x2d   :  { %356 = vmatpush.msrb.mxu0 %v250_v49  ;;  %317 = vmatpush.msra.mxu3 %v244_v51  ;;  %v211_v24 = vld [vmem:[#allocation7 + $0x1a0] sm:$0xff]  ;;  %v212_v25 = vld [vmem:[#allocation7 + $0x1a8] sm:$0xff]  ;;  %v213_v26 = vld [vmem:[#allocation7 + $0x1b0] sm:$0xff] }
  0x2e   :  { %337 = vmatpush.msrb.mxu1 %v245_v52  ;;  %298 = vmatpush.msra.mxu2 %v239_v54  ;;  %v214_v27 = vld [vmem:[#allocation7 + $0x1b8] sm:$0xff]  ;;  %v207_v28 = vld [vmem:[#allocation7 + $0x180] sm:$0xff]  ;;  %v208_v29 = vld [vmem:[#allocation7 + $0x188] sm:$0xff] }
  0x2f   :  { %357 = vmatpush.msrb.mxu0 %v246_v53  ;;  %318 = vmatpush.msra.mxu3 %v240_v55  ;;  %v209_v30 = vld [vmem:[#allocation7 + $0x190] sm:$0xff]  ;;  %v210_v31 = vld [vmem:[#allocation7 + $0x198] sm:$0xff]  ;;  %v203_v32 = vld [vmem:[#allocation7 + $0x160] sm:$0xff] }
  0x30   :  { %338 = vmatpush.msrb.mxu1 %v241_v56  ;;  %299 = vmatpush.msra.mxu2 %v235_v58  ;;  %v204_v33 = vld [vmem:[#allocation7 + $0x168] sm:$0xff]  ;;  %v205_v34 = vld [vmem:[#allocation7 + $0x170] sm:$0xff]  ;;  %v206_v35 = vld [vmem:[#allocation7 + $0x178] sm:$0xff] }
  0x31   :  { %358 = vmatpush.msrb.mxu0 %v242_v57  ;;  %319 = vmatpush.msra.mxu3 %v236_v59  ;;  %v199_v36 = vld [vmem:[#allocation7 + $0x140] sm:$0xff]  ;;  %v200_v37 = vld [vmem:[#allocation7 + $0x148] sm:$0xff]  ;;  %v201_v38 = vld [vmem:[#allocation7 + $0x150] sm:$0xff] }
  0x32   :  { %339 = vmatpush.msrb.mxu1 %v237_v61  ;;  %300 = vmatpush.msra.mxu2 %v231_v0  ;;  %v202_v39 = vld [vmem:[#allocation7 + $0x158] sm:$0xff]  ;;  %v195_v40 = vld [vmem:[#allocation7 + $0x120] sm:$0xff]  ;;  %v196_v41 = vld [vmem:[#allocation7 + $0x128] sm:$0xff] }
  0x33   :  { %359 = vmatpush.msrb.mxu0 %v238_v62  ;;  %v197_v42 = vld [vmem:[#allocation7 + $0x130] sm:$0xff]  ;;  %v198_v43 = vld [vmem:[#allocation7 + $0x138] sm:$0xff]  ;;  %v191_v44 = vld [vmem:[#allocation7 + $0x100] sm:$0xff] }
  0x34   :  { %v193_v46 = vld [vmem:[#allocation7 + $0x110] sm:$0xff]  ;;  %v194_v47 = vld [vmem:[#allocation7 + $0x118] sm:$0xff]  ;;  %v187_v48 = vld [vmem:[#allocation7 + $0xe0] sm:$0xff] }
  0x35   :  { %v188_v49 = vld [vmem:[#allocation7 + $0xe8] sm:$0xff]  ;;  %v189_v50 = vld [vmem:[#allocation7 + $0xf0] sm:$0xff]  ;;  %v190_v51 = vld [vmem:[#allocation7 + $0xf8] sm:$0xff] }
  0x36   :  { %v183_v52 = vld [vmem:[#allocation7 + $0xc0] sm:$0xff]  ;;  %v184_v53 = vld [vmem:[#allocation7 + $0xc8] sm:$0xff]  ;;  %v185_v54 = vld [vmem:[#allocation7 + $0xd0] sm:$0xff] }
  0x37   :  { %v186_v55 = vld [vmem:[#allocation7 + $0xd8] sm:$0xff]  ;;  %v179_v56 = vld [vmem:[#allocation7 + $0xa0] sm:$0xff]  ;;  %v180_v57 = vld [vmem:[#allocation7 + $0xa8] sm:$0xff] }
  0x38   :  { %v181_v58 = vld [vmem:[#allocation7 + $0xb0] sm:$0xff]  ;;  %v182_v59 = vld [vmem:[#allocation7 + $0xb8] sm:$0xff]  ;;  %v176_v61 = vld [vmem:[#allocation7 + $0x88] sm:$0xff] }
  0x39   :  { %v177_v62 = vld [vmem:[#allocation7 + $0x90] sm:$0xff]  ;;  %v171_v0 = vld [vmem:[#allocation7 + $0x60] sm:$0xff] }
  0x97   :  { %v118_v2 = vpop.f32.mrf.mxu0 }
  0x98   :  { %v122_v3 = vsel %vm121_vm0, %v118_v2, -inf }
  0x99   :  { %123 = vmax.xlane.f32.xlu0 %v122_v3  ;;  %v233_v3 = vld [vmem:[#allocation8 + $0x50] sm:$0xff] }
  0x9a   :  { %340 = vmatpush.msrb.mxu1 %v233_v3  ;;  %v173_v3 = vld [vmem:[#allocation7 + $0x70] sm:$0xff] }
  0x9c   :  { %341 = vmatpush.msrb.mxu1 %v229_v9  ;;  %v170_v9 = vld [vmem:[#allocation7 + $0x58] sm:$0xff] }
  0x9e   :  { %342 = vmatpush.msrb.mxu1 %v225_v16  ;;  %v161_v16 = vld [vmem:[#allocation7 + $0x10] sm:$0xff] }
 0x10c   :  { %v124_v4 = vpop.xlane.xlu0 %123 }
 0x10d   :  { %v125_v5 = vsub.f32 %v118_v2, %v124_v4  ;;  %v232_v2 = vld [vmem:[#allocation8 + $0x48] sm:$0xff]  ;;  %v234_v4 = vld [vmem:[#allocation8 + $0x58] sm:$0xff] }
 0x10e   :  { %320 = vmatpush.msra.mxu3 %v232_v2  ;;  %360 = vmatpush.msrb.mxu0 %v234_v4  ;;  %v172_v2 = vld [vmem:[#allocation7 + $0x68] sm:$0xff]  ;;  %v174_v4 = vld [vmem:[#allocation7 + $0x78] sm:$0xff] }
 0x10f   :  { %v126_v6 = vmul.f32 1.442695, %v125_v5 }
 0x110   :  { %361 = vmatpush.msrb.mxu0 %v230_v10  ;;  %v163_v10 = vld [vmem:[#allocation7 + $0x20] sm:$0xff] }
 0x111   :  { %1670 = vpow2.f32 %v126_v6  ;;  %v227_v6 = vld [vmem:[#allocation8 + $0x20] sm:$0xff] }
 0x112   :  { %301 = vmatpush.msra.mxu2 %v227_v6  ;;  %362 = vmatpush.msrb.mxu0 %v226_v14  ;;  %v168_v6 = vld [vmem:[#allocation7 + $0x48] sm:$0xff]  ;;  %v159_v14 = vld [vmem:[#allocation7] sm:$0xff] }
 0x114   :  { %302 = vmatpush.msra.mxu2 %v223_v12  ;;  %427 = vmatpush.msra.mxu0 %v222_v20  ;;  %v165_v12 = vld [vmem:[#allocation7 + $0x30] sm:$0xff]  ;;  %v2093_v20 = vld [vmem:[#allocation10 + $0x1e8] sm:$0xff] }
 0x115   :  { %3043 = vst [vmem:[#allocation16_spill] sm:$0xff] %v2093_v20 }
 0x116   :  { %367 = vmatpush.msrb.mxu2 %v219_v17  ;;  %v162_v17 = vld [vmem:[#allocation7 + $0x18] sm:$0xff] }
 0x117   :  { %v2081_v7 = vpop.eup %1670 }
 0x118   :  { %v128_v8 = vsel %vm121_vm0, %v2081_v7, 0.0  ;;  %368 = vmatpush.msrb.mxu2 %v215_v21  ;;  %v2095_v21 = vld [vmem:[#allocation10 + $0x1f0] sm:$0xff] }
 0x119   :  { %129 = vadd.xlane.f32.xlu0 %v128_v8  ;;  %v228_v8 = vld [vmem:[#allocation8 + $0x28] sm:$0xff] }
 0x11a   :  { %321 = vmatpush.msra.mxu3 %v228_v8  ;;  %369 = vmatpush.msrb.mxu2 %v211_v24  ;;  %v169_v8 = vld [vmem:[#allocation7 + $0x50] sm:$0xff]  ;;  %v2109_v24 = vld [vmem:[#allocation10 + $0x1d8] sm:$0xff] }
 0x11c   :  { %322 = vmatpush.msra.mxu3 %v224_v13  ;;  %370 = vmatpush.msrb.mxu2 %v207_v28  ;;  %v166_v13 = vld [vmem:[#allocation7 + $0x38] sm:$0xff] }
 0x11d   :  { %v2119_v28 = vld [vmem:[#allocation10 + $0x1b8] sm:$0xff] }
 0x11e   :  { %387 = vmatpush.msrb.mxu3 %v220_v18  ;;  %371 = vmatpush.msrb.mxu2 %v203_v32  ;;  %v2131_v32 = vld [vmem:[#allocation10 + $0x198] sm:$0xff] }
 0x11f   :  { %3045 = vst [vmem:[#allocation18_spill] sm:$0xff] %v2131_v32 }
 0x120   :  { %388 = vmatpush.msrb.mxu3 %v216_v22  ;;  %372 = vmatpush.msrb.mxu2 %v199_v36  ;;  %v2099_v22 = vld [vmem:[#allocation10 + $0x1f8] sm:$0xff] }
 0x121   :  { %v2143_v36 = vld [vmem:[#allocation10 + $0x178] sm:$0xff] }
 0x122   :  { %389 = vmatpush.msrb.mxu3 %v212_v25  ;;  %373 = vmatpush.msrb.mxu2 %v195_v40  ;;  %v2111_v25 = vld [vmem:[#allocation10 + $0x1a0] sm:$0xff]  ;;  %v2155_v40 = vld [vmem:[#allocation10 + $0x158] sm:$0xff] }
 0x123   :  { %3047 = vst [vmem:[#allocation20_spill] sm:$0xff] %v2155_v40 }
 0x124   :  { %390 = vmatpush.msrb.mxu3 %v208_v29  ;;  %374 = vmatpush.msrb.mxu2 %v191_v44  ;;  %v2123_v29 = vld [vmem:[#allocation10 + $0x180] sm:$0xff]  ;;  %v2165_v44 = vld [vmem:[#allocation10 + $0x130] sm:$0xff] }
 0x126   :  { %391 = vmatpush.msrb.mxu3 %v204_v33  ;;  %375 = vmatpush.msrb.mxu2 %v187_v48  ;;  %v2135_v33 = vld [vmem:[#allocation10 + $0x160] sm:$0xff]  ;;  %v2177_v48 = vld [vmem:[#allocation10 + $0x110] sm:$0xff] }
 0x127   :  { %3050 = vst [vmem:[#allocation23_spill] sm:$0xff] %v2177_v48 }
 0x128   :  { %392 = vmatpush.msrb.mxu3 %v200_v37  ;;  %376 = vmatpush.msrb.mxu2 %v183_v52  ;;  %v2147_v37 = vld [vmem:[#allocation10 + $0x140] sm:$0xff]  ;;  %v2190_v52 = vld [vmem:[%s2910_s5] sm:$0xf]  ;;  %s2026_s5 = smov [#allocation11]  }
 0x129   :  { %s1623_s21 = sshll.u32 %s2026_s5, 4  ;;  %s1624_s21 = int_to_ptr.vmem [resolvable:$true] %s1623_s21 }
 0x12a   :  { %393 = vmatpush.msrb.mxu3 %v196_v41  ;;  %377 = vmatpush.msrb.mxu2 %v179_v56  ;;  %v2159_v41 = vld [vmem:[#allocation10 + $0x120] sm:$0xff] }
 0x18c   :  { %v130_v45 = vpop.xlane.xlu0 %129 }
 0x18d   :  { %1672 = vrcp.f32 %v130_v45 }
 0x193   :  { %v1673_v60 = vpop.eup %1672 }
 0x194   :  { %v132_v63 = vmul.f32 %v1673_v60, %v130_v45  ;;  %v192_v45 = vld [vmem:[#allocation7 + $0x108] sm:$0xff] }
 0x195   :  { %394 = vmatpush.msrb.mxu3 %v192_v45  ;;  %v2167_v45 = vld [vmem:[#allocation10 + $0x138] sm:$0xff] }
 0x196   :  { %v133_v5 = vsub.f32 2.0, %v132_v63  ;;  %v178_v63 = vld [vmem:[#allocation7 + $0x98] sm:$0xff]  ;;  %3049 = vst [vmem:[#allocation22_spill] sm:$0xff] %v2167_v45 }
 0x197   :  { %395 = vmatpush.msrb.mxu3 %v188_v49  ;;  %v2179_v49 = vld [vmem:[#allocation10 + $0x118] sm:$0xff] }
 0x198   :  { %v134_v11 = vmul.f32 %v1673_v60, %v133_v5  ;;  %v175_v60 = vld [vmem:[#allocation7 + $0x80] sm:$0xff]  ;;  %3051 = vst [vmem:[#allocation24_spill] sm:$0xff] %v2179_v49 }
 0x199   :  { %396 = vmatpush.msrb.mxu3 %v184_v53  ;;  %378 = vmatpush.msrb.mxu2 %v175_v60  ;;  %v167_v5 = vld [vmem:[#allocation7 + $0x40] sm:$0xff]  ;;  %v2194_v53 = vld [vmem:[#allocation10 + $0xf0] sm:$0xff]  ;;  %v2208_v60 = vld [vmem:[#allocation10 + $0xd8] sm:$0xff] }
 0x19a   :  { %v135_v15 = vmul.f32 %v2081_v7, %v134_v11  ;;  %v218_v7 = vld [vmem:[#allocation7 + $0x1d8] sm:$0xff]  ;;  %v164_v11 = vld [vmem:[#allocation7 + $0x28] sm:$0xff]  ;;  %3057 = vst [vmem:[#allocation30_spill] sm:$0xff] %v2208_v60 }
 0x19b   :  { %428 = vmatpush.msra.mxu0 %v218_v7  ;;  %397 = vmatpush.msrb.mxu3 %v180_v57  ;;  %v2103_v7 = vld [vmem:[#allocation10 + $0x1c8] sm:$0xff]  ;;  %v2200_v57 = vld [vmem:[#allocation10 + $0xc0] sm:$0xff] }
 0x19c   :  { %1637 = vmatmul.msk.f32.vlgmr.msra.gmra.mxu1 %vm121_vm0, %v135_v15  ;;  %379 = vmatpush.msrb.mxu2 %v171_v0  ;;  %v160_v15 = vld [vmem:[#allocation7 + $0x8] sm:$0xff]  ;;  %3054 = vst [vmem:[#allocation27_spill] sm:$0xff] %v2200_v57 }
 0x19d   :  { %407 = vmatpush.msra.mxu1 %v221_v19  ;;  %429 = vmatpush.msra.mxu0 %v214_v27  ;;  %v2091_v19 = vld [vmem:[#allocation10 + $0x1e0] sm:$0xff]  ;;  %v2117_v27 = vld [vmem:[#allocation10 + $0x1b0] sm:$0xff] }
 0x19e   :  { %398 = vmatpush.msrb.mxu3 %v176_v61  ;;  %380 = vmatpush.msrb.mxu2 %v167_v5  ;;  %v451_v61 = vperm.slane %v2190_v52, 3  ;;  %v2225_v5 = vld [vmem:[#allocation10 + $0x80] sm:$0xff] }
 0x19f   :  { %408 = vmatpush.msra.mxu1 %v217_v23  ;;  %430 = vmatpush.msra.mxu0 %v210_v31  ;;  %v2101_v23 = vld [vmem:[#allocation10 + $0x1c0] sm:$0xff]  ;;  %v2129_v31 = vld [vmem:[#allocation10 + $0x190] sm:$0xff]  ;;  %3062 = vst [vmem:[#allocation35_spill] sm:$0xff] %v2225_v5 }
 0x1a0   :  { %399 = vmatpush.msrb.mxu3 %v172_v2  ;;  %381 = vmatpush.msrb.mxu2 %v163_v10  ;;  %3044 = vst [vmem:[#allocation17_spill] sm:$0xff] %v2101_v23  ;;  %v2219_v2 = vld [vmem:[#allocation10 + $0xb0] sm:$0xff] }
 0x1a1   :  { %409 = vmatpush.msra.mxu1 %v213_v26  ;;  %431 = vmatpush.msra.mxu0 %v206_v35  ;;  %v2115_v26 = vld [vmem:[#allocation10 + $0x1a8] sm:$0xff]  ;;  %v2141_v35 = vld [vmem:[#allocation10 + $0x170] sm:$0xff]  ;;  %3060 = vst [vmem:[#allocation33_spill] sm:$0xff] %v2219_v2 }
 0x1a2   :  { %400 = vmatpush.msrb.mxu3 %v168_v6  ;;  %382 = vmatpush.msrb.mxu2 %v159_v14  ;;  %v2227_v6 = vld [vmem:[#allocation10 + $0x88] sm:$0xff]  ;;  %v449_v14 = vperm.slane %v2190_v52, 1 }
 0x1a3   :  { %410 = vmatpush.msra.mxu1 %v209_v30  ;;  %432 = vmatpush.msra.mxu0 %v202_v39  ;;  %v2125_v30 = vld [vmem:[#allocation10 + $0x188] sm:$0xff]  ;;  %v2153_v39 = vld [vmem:[#allocation10 + $0x150] sm:$0xff]  ;;  %3063 = vst [vmem:[#allocation36_spill] sm:$0xff] %v2227_v6 }
 0x1a4   :  { %401 = vmatpush.msrb.mxu3 %v164_v11  ;;  %v2239_v11 = vld [vmem:[#allocation10 + $0x60] sm:$0xff] }
 0x1a5   :  { %411 = vmatpush.msra.mxu1 %v205_v34  ;;  %433 = vmatpush.msra.mxu0 %v198_v43  ;;  %v2137_v34 = vld [vmem:[#allocation10 + $0x168] sm:$0xff]  ;;  %3067 = vst [vmem:[#allocation40_spill] sm:$0xff] %v2239_v11 }
 0x1a6   :  { %402 = vmatpush.msrb.mxu3 %v160_v15  ;;  %v2247_v15 = vld [vmem:[#allocation10 + $0x70] sm:$0xff] }
 0x1a7   :  { %412 = vmatpush.msra.mxu1 %v201_v38  ;;  %434 = vmatpush.msra.mxu0 %v194_v47  ;;  %v2149_v38 = vld [vmem:[#allocation10 + $0x148] sm:$0xff]  ;;  %3069 = vst [vmem:[#allocation42_spill] sm:$0xff] %v2247_v15 }
 0x1a8   :  { %3046 = vst [vmem:[#allocation19_spill] sm:$0xff] %v2149_v38  ;;  %v2173_v47 = vld [vmem:[#allocation10 + $0x108] sm:$0xff] }
 0x1a9   :  { %413 = vmatpush.msra.mxu1 %v197_v42  ;;  %435 = vmatpush.msra.mxu0 %v190_v51  ;;  %v2161_v42 = vld [vmem:[#allocation10 + $0x128] sm:$0xff] }
 0x1aa   :  { %3048 = vst [vmem:[#allocation21_spill] sm:$0xff] %v2161_v42  ;;  %v2185_v51 = vld [vmem:[#allocation10 + $0xe8] sm:$0xff] }
 0x1ab   :  { %414 = vmatpush.msra.mxu1 %v193_v46  ;;  %436 = vmatpush.msra.mxu0 %v186_v55  ;;  %v2171_v46 = vld [vmem:[#allocation10 + $0x100] sm:$0xff]  ;;  %3053 = vst [vmem:[#allocation26_spill] sm:$0xff] %v2185_v51 }
 0x1ad   :  { %415 = vmatpush.msra.mxu1 %v189_v50  ;;  %437 = vmatpush.msra.mxu0 %v182_v59  ;;  %v2183_v50 = vld [vmem:[#allocation10 + $0xe0] sm:$0xff]  ;;  %v2206_v59 = vld [vmem:[#allocation10 + $0xd0] sm:$0xff] }
 0x1ae   :  { %3052 = vst [vmem:[#allocation25_spill] sm:$0xff] %v2183_v50 }
 0x1af   :  { %416 = vmatpush.msra.mxu1 %v185_v54  ;;  %438 = vmatpush.msra.mxu0 %v178_v63  ;;  %v2196_v54 = vld [vmem:[#allocation10 + $0xf8] sm:$0xff]  ;;  %3056 = vst [vmem:[#allocation29_spill] sm:$0xff] %v2206_v59  ;;  %v2215_v63 = vld [vmem:[#allocation10 + $0xa8] sm:$0xff] }
 0x1b0   :  { %3059 = vst [vmem:[#allocation32_spill] sm:$0xff] %v2215_v63 }
 0x1b1   :  { %417 = vmatpush.msra.mxu1 %v181_v58  ;;  %439 = vmatpush.msra.mxu0 %v174_v4  ;;  %v2202_v58 = vld [vmem:[#allocation10 + $0xc8] sm:$0xff] }
 0x1b2   :  { %3055 = vst [vmem:[#allocation28_spill] sm:$0xff] %v2202_v58 }
 0x1b3   :  { %418 = vmatpush.msra.mxu1 %v177_v62  ;;  %440 = vmatpush.msra.mxu0 %v170_v9  ;;  %v2213_v62 = vld [vmem:[#allocation10 + $0xa0] sm:$0xff]  ;;  %v2233_v9 = vld [vmem:[#allocation10 + $0x98] sm:$0xff] }
 0x1b4   :  { %3058 = vst [vmem:[#allocation31_spill] sm:$0xff] %v2213_v62 }
 0x1b5   :  { %419 = vmatpush.msra.mxu1 %v173_v3  ;;  %441 = vmatpush.msra.mxu0 %v166_v13  ;;  %v2221_v3 = vld [vmem:[#allocation10 + $0xb8] sm:$0xff]  ;;  %3065 = vst [vmem:[#allocation38_spill] sm:$0xff] %v2233_v9  ;;  %v448_v13 = vperm.slane %v2190_v52, 0 }
 0x1b6   :  { %3061 = vst [vmem:[#allocation34_spill] sm:$0xff] %v2221_v3 }
 0x1b7   :  { %420 = vmatpush.msra.mxu1 %v169_v8  ;;  %442 = vmatpush.msra.mxu0 %v162_v17  ;;  %v2231_v8 = vld [vmem:[#allocation10 + $0x90] sm:$0xff] }
 0x1b8   :  { %3064 = vst [vmem:[#allocation37_spill] sm:$0xff] %v2231_v8 }
 0x1b9   :  { %421 = vmatpush.msra.mxu1 %v165_v12  ;;  %v2241_v12 = vld [vmem:[#allocation10 + $0x68] sm:$0xff] }
 0x1ba   :  { %3068 = vst [vmem:[#allocation41_spill] sm:$0xff] %v2241_v12 }
 0x1bb   :  { %422 = vmatpush.msra.mxu1 %v161_v16  ;;  %v2249_v16 = vld [vmem:[#allocation10 + $0x78] sm:$0xff] }
 0x1bc   :  { %3070 = vst [vmem:[#allocation43_spill] sm:$0xff] %v2249_v16 }
 0x219   :  { %v156_v18 = vpop.f32.mrf.mxu1 }
 0x21a   :  { %303 = vmatmul.f32.vlgmr.msra.gmra.mxu2 %v156_v18  ;;  %323 = vmatmul.f32.vlgmr.msra.gmra.mxu3 %v156_v18 }
 0x21b   :  { %343 = vmatmul.f32.vlgmr.msrb.gmra.mxu1 %v156_v18  ;;  %363 = vmatmul.f32.vlgmr.msrb.gmra.mxu0 %v156_v18 }
 0x21c   :  { %587 = vmatpush.msra.mxu2 %v2091_v19  ;;  %607 = vmatpush.msra.mxu3 %v2093_v20 }
 0x21d   :  { %627 = vmatpush.msrb.mxu1 %v2095_v21  ;;  %647 = vmatpush.msrb.mxu0 %v2099_v22 }
 0x21e   :  { %588 = vmatpush.msra.mxu2 %v2101_v23  ;;  %608 = vmatpush.msra.mxu3 %v2103_v7 }
 0x21f   :  { %648 = vmatpush.msrb.mxu0 %v2109_v24 }
 0x220   :  { %589 = vmatpush.msra.mxu2 %v2111_v25  ;;  %609 = vmatpush.msra.mxu3 %v2115_v26 }
 0x221   :  { %649 = vmatpush.msrb.mxu0 %v2119_v28 }
 0x222   :  { %383 = vmatmul.f32.vlgmr.msrb.gmra.mxu2 %v2077_v1  ;;  %403 = vmatmul.f32.vlgmr.msrb.gmra.mxu3 %v2077_v1 }
 0x223   :  { %423 = vmatmul.f32.vlgmr.msra.gmra.mxu1 %v2077_v1  ;;  %443 = vmatmul.f32.vlgmr.msra.gmra.mxu0 %v2077_v1  ;;  %v2107_v1 = vld [vmem:[#allocation10 + $0x1d0] sm:$0xff] }
 0x224   :  { %628 = vmatpush.msrb.mxu1 %v2107_v1  ;;  %590 = vmatpush.msra.mxu2 %v2123_v29 }
 0x225   :  { %610 = vmatpush.msra.mxu3 %v2125_v30  ;;  %650 = vmatpush.msrb.mxu0 %v2131_v32 }
 0x226   :  { %629 = vmatpush.msrb.mxu1 %v2117_v27  ;;  %591 = vmatpush.msra.mxu2 %v2135_v33 }
 0x227   :  { %611 = vmatpush.msra.mxu3 %v2137_v34  ;;  %651 = vmatpush.msrb.mxu0 %v2143_v36 }
 0x228   :  { %630 = vmatpush.msrb.mxu1 %v2129_v31  ;;  %592 = vmatpush.msra.mxu2 %v2147_v37 }
 0x229   :  { %612 = vmatpush.msra.mxu3 %v2149_v38  ;;  %652 = vmatpush.msrb.mxu0 %v2155_v40 }
 0x22a   :  { %631 = vmatpush.msrb.mxu1 %v2141_v35  ;;  %593 = vmatpush.msra.mxu2 %v2159_v41 }
 0x22b   :  { %613 = vmatpush.msra.mxu3 %v2161_v42  ;;  %653 = vmatpush.msrb.mxu0 %v2167_v45 }
 0x22c   :  { %632 = vmatpush.msrb.mxu1 %v2153_v39  ;;  %594 = vmatpush.msra.mxu2 %v2171_v46 }
 0x22d   :  { %614 = vmatpush.msra.mxu3 %v2173_v47  ;;  %654 = vmatpush.msrb.mxu0 %v2179_v49 }
 0x22e   :  { %633 = vmatpush.msrb.mxu1 %v2165_v44  ;;  %595 = vmatpush.msra.mxu2 %v2183_v50 }
 0x22f   :  { %615 = vmatpush.msra.mxu3 %v2185_v51  ;;  %655 = vmatpush.msrb.mxu0 %v2196_v54 }
 0x230   :  { %634 = vmatpush.msrb.mxu1 %v2177_v48  ;;  %596 = vmatpush.msra.mxu2 %v2200_v57 }
 0x231   :  { %616 = vmatpush.msra.mxu3 %v2202_v58  ;;  %656 = vmatpush.msrb.mxu0 %v2208_v60 }
 0x232   :  { %635 = vmatpush.msrb.mxu1 %v2194_v53  ;;  %597 = vmatpush.msra.mxu2 %v2213_v62 }
 0x233   :  { %617 = vmatpush.msra.mxu3 %v2215_v63  ;;  %657 = vmatpush.msrb.mxu0 %v2221_v3  ;;  %v2262_v3 = vld [vmem:[#allocation10 + $0x58] sm:$0xff] }
 0x234   :  { %636 = vmatpush.msrb.mxu1 %v2206_v59  ;;  %598 = vmatpush.msra.mxu2 %v2225_v5  ;;  %3074 = vst [vmem:[#allocation47_spill] sm:$0xff] %v2262_v3 }
 0x235   :  { %618 = vmatpush.msra.mxu3 %v2227_v6  ;;  %658 = vmatpush.msrb.mxu0 %v2233_v9  ;;  %v2260_v6 = vld [vmem:[#allocation10 + $0x50] sm:$0xff]  ;;  %v2266_v9 = vld [vmem:[#allocation10 + $0x20] sm:$0xff] }
 0x236   :  { %637 = vmatpush.msrb.mxu1 %v2219_v2  ;;  %599 = vmatpush.msra.mxu2 %v2239_v11  ;;  %3073 = vst [vmem:[#allocation46_spill] sm:$0xff] %v2260_v6 }
 0x237   :  { %619 = vmatpush.msra.mxu3 %v2241_v12  ;;  %659 = vmatpush.msrb.mxu0 %v2249_v16  ;;  %3075 = vst [vmem:[#allocation48_spill] sm:$0xff] %v2266_v9  ;;  %v2284_v16 = vld [vmem:[#allocation10 + $0x8] sm:$0xff] }
 0x238   :  { %638 = vmatpush.msrb.mxu1 %v2231_v8  ;;  %v2268_v8 = vld [vmem:[#allocation10 + $0x28] sm:$0xff]  ;;  %3082 = vst [vmem:[#allocation55_spill] sm:$0xff] %v2284_v16 }
 0x239   :  { %3076 = vst [vmem:[#allocation49_spill] sm:$0xff] %v2268_v8  ;;  %660 = vmatpush.msrb.mxu0 %v2262_v3 }
 0x23a   :  { %639 = vmatpush.msrb.mxu1 %v2247_v15 }
 0x23c   :  { %640 = vmatpush.msrb.mxu1 %v2260_v6 }
 0x298   :  { %v364_v43 = vpop.f32.mrf.mxu0 }
 0x29d   :  { %v304_v55 = vpop.f32.mrf.mxu2  ;;  %v324_v56 = vpop.f32.mrf.mxu3 }
 0x2a0   :  { %v444_v0 = vpop.f32.mrf.mxu0 }
 0x2a1   :  { %v445_v4 = vadd.f32 %v444_v0, %v364_v43  ;;  %v2253_v43 = vld [vmem:[#allocation10 + $0x40] sm:$0xff] }
 0x2a2   :  { %3071 = vst [vmem:[#allocation44_spill] sm:$0xff] %v2253_v43  ;;  %600 = vmatpush.msra.mxu2 %v2253_v43 }
 0x2a3   :  { %v2235_v10 = vadd.f32 %v451_v61, %v445_v4  ;;  %v2255_v61 = vld [vmem:[#allocation10 + $0x48] sm:$0xff] }
 0x2a4   :  { %3072 = vst [vmem:[#allocation45_spill] sm:$0xff] %v2255_v61  ;;  %620 = vmatpush.msra.mxu3 %v2255_v61  ;;  %601 = vmatpush.msra.mxu2 %v2266_v9 }
 0x2a5   :  { %3066 = vst [vmem:[#allocation39_spill] sm:$0xff] %v2235_v10  ;;  %v384_v17 = vpop.f32.mrf.mxu2  ;;  %v404_v18 = vpop.f32.mrf.mxu3  ;;  %v1640_v0 = vmul.f32 -1.442695, %v2235_v10 }
 0x2a6   :  { %v385_v4 = vadd.f32 %v384_v17, %v304_v55  ;;  %v405_v5 = vadd.f32 %v404_v18, %v324_v56  ;;  %v2276_v56 = vld [vmem:[#allocation10 + $0x30] sm:$0xff]  ;;  %v2278_v17 = vld [vmem:[#allocation10 + $0x38] sm:$0xff]  ;;  %v2282_v18 = vld [vmem:[#allocation10] sm:$0xff]  ;;  %621 = vmatpush.msra.mxu3 %v2268_v8 }
 0x2a7   :  { %1674 = vpow2.f32 %v1640_v0  ;;  %3079 = vst [vmem:[#allocation52_spill] sm:$0xff] %v2276_v56  ;;  %v2290_v0 = vld [vmem:[#allocation10 + $0x10] sm:$0xff]  ;;  %641 = vmatpush.msrb.mxu1 %v2276_v56  ;;  %661 = vmatpush.msrb.mxu0 %v2278_v17 }
 0x2a8   :  { %v2270_v10 = vadd.f32 %v448_v13, %v385_v4  ;;  %v2272_v55 = vadd.f32 %v449_v14, %v405_v5  ;;  %3080 = vst [vmem:[#allocation53_spill] sm:$0xff] %v2278_v17  ;;  %v344_v13 = vpop.f32.mrf.mxu1  ;;  %v2292_v4 = vld [vmem:[#allocation10 + $0x18] sm:$0xff]  ;;  %602 = vmatpush.msra.mxu2 %v2282_v18  ;;  %622 = vmatpush.msra.mxu3 %v2284_v16 }
 0x2a9   :  { %3081 = vst [vmem:[#allocation54_spill] sm:$0xff] %v2282_v18  ;;  %642 = vmatpush.msrb.mxu1 %v2290_v0  ;;  %662 = vmatpush.msrb.mxu0 %v2292_v4 }
 0x2aa   :  { %3077 = vst [vmem:[#allocation50_spill] sm:$0xff] %v2270_v10  ;;  %v1638_v5 = vmul.f32 -1.442695, %v2270_v10  ;;  %v1639_v14 = vmul.f32 -1.442695, %v2272_v55  ;;  %734 = vmatpush.msrb.mxu2 %v2091_v19  ;;  %754 = vmatpush.msrb.mxu3 %v2093_v20 }
 0x2ab   :  { %3078 = vst [vmem:[#allocation51_spill] sm:$0xff] %v2272_v55  ;;  %774 = vmatpush.msra.mxu1 %v2095_v21  ;;  %794 = vmatpush.msra.mxu0 %v2099_v22 }
 0x2ac   :  { %3083 = vst [vmem:[#allocation56_spill] sm:$0xff] %v2290_v0  ;;  %1676 = vpow2.f32 %v1638_v5  ;;  %735 = vmatpush.msrb.mxu2 %v2101_v23  ;;  %755 = vmatpush.msrb.mxu3 %v2103_v7 }
 0x2ad   :  { %3084 = vst [vmem:[#allocation57_spill] sm:$0xff] %v2292_v4  ;;  %v1675_v10 = vpop.eup %1674  ;;  %1678 = vpow2.f32 %v1639_v14  ;;  %775 = vmatpush.msra.mxu1 %v2107_v1  ;;  %795 = vmatpush.msra.mxu0 %v2109_v24 }
 0x2ae   :  { %v2304_v55 = vadd.f32 1.0, %v1675_v10  ;;  %736 = vmatpush.msrb.mxu2 %v2111_v25  ;;  %756 = vmatpush.msrb.mxu3 %v2115_v26 }
 0x2af   :  { %776 = vmatpush.msra.mxu1 %v2117_v27  ;;  %796 = vmatpush.msra.mxu0 %v2119_v28 }
 0x2b0   :  { %v424_v10 = vpop.f32.mrf.mxu1  ;;  %1680 = vrcp.f32 %v2304_v55  ;;  %737 = vmatpush.msrb.mxu2 %v2123_v29  ;;  %757 = vmatpush.msrb.mxu3 %v2125_v30  ;;  %vm508_vm10 = vweird.f32 %v2304_v55 }
 0x2b1   :  { %777 = vmatpush.msra.mxu1 %v2129_v31  ;;  %797 = vmatpush.msra.mxu0 %v2131_v32 }
 0x2b2   :  { %v1677_v5 = vpop.eup %1676  ;;  %738 = vmatpush.msrb.mxu2 %v2135_v33  ;;  %758 = vmatpush.msrb.mxu3 %v2137_v34 }
 0x2b3   :  { %v1679_v14 = vpop.eup %1678  ;;  %v2312_v20 = vadd.f32 1.0, %v1677_v5  ;;  %v425_v5 = vadd.f32 %v424_v10, %v344_v13  ;;  %778 = vmatpush.msra.mxu1 %v2141_v35  ;;  %798 = vmatpush.msra.mxu0 %v2143_v36 }
 0x2b4   :  { %v2316_v23 = vadd.f32 1.0, %v1679_v14  ;;  %v450_v14 = vperm.slane %v2190_v52, 2  ;;  %739 = vmatpush.msrb.mxu2 %v2147_v37  ;;  %759 = vmatpush.msrb.mxu3 %v2149_v38 }
 0x2b5   :  { %1682 = vrcp.f32 %v2312_v20  ;;  %779 = vmatpush.msra.mxu1 %v2153_v39  ;;  %799 = vmatpush.msra.mxu0 %v2155_v40  ;;  %vm469_vm3 = vweird.f32 %v2312_v20 }
 0x2b6   :  { %1684 = vrcp.f32 %v2316_v23  ;;  %v2334_v32 = vpop.eup %1680  ;;  %740 = vmatpush.msrb.mxu2 %v2159_v41  ;;  %760 = vmatpush.msrb.mxu3 %v2161_v42  ;;  %v2338_v52 = vadd.f32 %v450_v14, %v425_v5  ;;  %v475_v14 = vand.u32 2147483648, %v2312_v20  ;;  %vm488_vm5 = vweird.f32 %v2316_v23 }
 0x2b7   :  { %780 = vmatpush.msra.mxu1 %v2165_v44  ;;  %800 = vmatpush.msra.mxu0 %v2167_v45  ;;  %v504_v5 = vmul.f32 %v2334_v32, %v2304_v55  ;;  %vm509_vm9 = vweird.f32 %v2334_v32 }
 0x2b8   :  { %3085 = vst [vmem:[#allocation58_spill] sm:$0xff] %v2338_v52  ;;  %741 = vmatpush.msrb.mxu2 %v2171_v46  ;;  %761 = vmatpush.msrb.mxu3 %v2173_v47  ;;  %1686 = vtanh.f32 %v2338_v52  ;;  %vm510_vm11 = vmor %vm508_vm10, %vm509_vm9 }
 0x2b9   :  { %781 = vmatpush.msra.mxu1 %v2177_v48  ;;  %801 = vmatpush.msra.mxu0 %v2179_v49  ;;  %v494_v49 = vand.u32 2147483648, %v2316_v23 }
 0x2ba   :  { %742 = vmatpush.msrb.mxu2 %v2183_v50  ;;  %762 = vmatpush.msrb.mxu3 %v2185_v51 }
 0x2bb   :  { %v1683_v13 = vpop.eup %1682  ;;  %782 = vmatpush.msra.mxu1 %v2194_v53  ;;  %802 = vmatpush.msra.mxu0 %v2196_v54 }
 0x2bc   :  { %v1685_v10 = vpop.eup %1684  ;;  %v465_v38 = vmul.f32 %v1683_v13, %v2312_v20  ;;  %vm470_vm1 = vweird.f32 %v1683_v13  ;;  %743 = vmatpush.msrb.mxu2 %v2200_v57  ;;  %763 = vmatpush.msrb.mxu3 %v2202_v58  ;;  %v476_v57 = vor.u32 1.1754944e-38, %v475_v14 }
 0x2bd   :  { %v484_v40 = vmul.f32 %v1685_v10, %v2316_v23  ;;  %vm489_vm2 = vweird.f32 %v1685_v10  ;;  %783 = vmatpush.msra.mxu1 %v2206_v59  ;;  %803 = vmatpush.msra.mxu0 %v2208_v60  ;;  %vm471_vm4 = vmor %vm469_vm3, %vm470_vm1 }
 0x2be   :  { %v466_v42 = vsub.f32 1.0, %v465_v38  ;;  %v473_v38 = vand.u32 2147483647, %v2312_v20  ;;  %744 = vmatpush.msrb.mxu2 %v2213_v62  ;;  %764 = vmatpush.msrb.mxu3 %v2215_v63  ;;  %vm490_vm7 = vmor %vm488_vm5, %vm489_vm2  ;;  %v495_v20 = vor.u32 1.1754944e-38, %v494_v49  ;;  %v1687_v63 = vpop.eup %1686 }
 0x2bf   :  { %v485_v45 = vsub.f32 1.0, %v484_v40  ;;  %v492_v40 = vand.u32 2147483647, %v2316_v23  ;;  %784 = vmatpush.msra.mxu1 %v2219_v2  ;;  %v3090_v23 = vld [vmem:[#allocation38_spill] sm:$0xff] }
 0x2c0   :  { %v467_v48 = vmul.f32 %v1683_v13, %v466_v42  ;;  %v505_v42 = vsub.f32 1.0, %v504_v5  ;;  %vm474_vm6 = vcmp.eq.f32.partialorder %v473_v38, 8.507059e+37  ;;  %v3088_v5 = vld [vmem:[#allocation36_spill] sm:$0xff] }
 0x2c1   :  { %v486_v51 = vmul.f32 %v1685_v10, %v485_v45  ;;  %v3086_v45 = vld [vmem:[#allocation34_spill] sm:$0xff]  ;;  %765 = vmatpush.msrb.mxu3 %v3088_v5  ;;  %vm493_vm8 = vcmp.eq.f32.partialorder %v492_v40, 8.507059e+37 }
 0x2c2   :  { %v468_v52 = vadd.f32 %v1683_v13, %v467_v48  ;;  %804 = vmatpush.msra.mxu0 %v3086_v45  ;;  %v3087_v48 = vld [vmem:[#allocation35_spill] sm:$0xff]  ;;  %v506_v45 = vmul.f32 %v2334_v32, %v505_v42  ;;  %v3093_v42 = vld [vmem:[#allocation17_spill] sm:$0xff] }
 0x2c3   :  { %v487_v58 = vadd.f32 %v1685_v10, %v486_v51  ;;  %745 = vmatpush.msrb.mxu2 %v3087_v48  ;;  %v3089_v51 = vld [vmem:[#allocation37_spill] sm:$0xff]  ;;  %766 = vmatpush.msrb.mxu3 %v2241_v12 }
 0x2c4   :  { %v472_v59 = vsel %vm471_vm4, %v1683_v13, %v468_v52  ;;  %785 = vmatpush.msra.mxu1 %v3089_v51  ;;  %805 = vmatpush.msra.mxu0 %v3090_v23  ;;  %v3091_v52 = vld [vmem:[#allocation43_spill] sm:$0xff] }
 0x2c5   :  { %v477_v62 = vsel %vm474_vm6, %v476_v57, %v472_v59  ;;  %v491_v60 = vsel %vm490_vm7, %v1685_v10, %v487_v58  ;;  %746 = vmatpush.msrb.mxu2 %v2239_v11  ;;  %767 = vmatpush.msrb.mxu3 %v2255_v61  ;;  %v507_v58 = vadd.f32 %v2334_v32, %v506_v45  ;;  %v514_v59 = vand.u32 2147483648, %v2304_v55  ;;  %v3095_v45 = vld [vmem:[#allocation19_spill] sm:$0xff] }
 0x2c6   :  { %v496_v14 = vsel %vm493_vm8, %v495_v20, %v491_v60  ;;  %v519_v13 = vmul.f32 %v1687_v63, %v477_v62  ;;  %786 = vmatpush.msra.mxu1 %v2247_v15  ;;  %806 = vmatpush.msra.mxu0 %v3091_v52  ;;  %v512_v60 = vand.u32 2147483647, %v2304_v55  ;;  %v3092_v55 = vld [vmem:[#allocation16_spill] sm:$0xff] }
 0x2c7   :  { %v518_v49 = vmul.f32 0.0, %v496_v14  ;;  %747 = vmatpush.msrb.mxu2 %v2253_v43  ;;  %768 = vmatpush.msrb.mxu3 %v2268_v8  ;;  %v511_v62 = vsel %vm510_vm11, %v2334_v32, %v507_v58  ;;  %v515_v63 = vor.u32 1.1754944e-38, %v514_v59  ;;  %v3094_v32 = vld [vmem:[#allocation18_spill] sm:$0xff]  ;;  %v3096_v20 = vld [vmem:[#allocation20_spill] sm:$0xff]  ;;  %v3097_v14 = vld [vmem:[#allocation21_spill] sm:$0xff] }
 0x2c8   :  { %787 = vmatpush.msra.mxu1 %v2260_v6  ;;  %807 = vmatpush.msra.mxu0 %v2262_v3  ;;  %vm513_vm12 = vcmp.eq.f32.partialorder %v512_v60, 8.507059e+37  ;;  %v3100_v58 = vld [vmem:[#allocation24_spill] sm:$0xff]  ;;  %v3101_v59 = vld [vmem:[#allocation26_spill] sm:$0xff]  ;;  %v3102_v60 = vld [vmem:[#allocation27_spill] sm:$0xff] }
 0x2c9   :  { %v2382_v57 = vadd.f32 %v519_v13, %v518_v49  ;;  %748 = vmatpush.msrb.mxu2 %v2266_v9  ;;  %769 = vmatpush.msrb.mxu3 %v2284_v16  ;;  %v516_v38 = vsel %vm513_vm12, %v515_v63, %v511_v62  ;;  %v3098_v13 = vld [vmem:[#allocation22_spill] sm:$0xff]  ;;  %v3099_v49 = vld [vmem:[#allocation23_spill] sm:$0xff]  ;;  %v3103_v62 = vld [vmem:[#allocation28_spill] sm:$0xff] }
 0x2ca   :  { %788 = vmatpush.msra.mxu1 %v2276_v56  ;;  %808 = vmatpush.msra.mxu0 %v2278_v17  ;;  %v3104_v63 = vld [vmem:[#allocation29_spill] sm:$0xff] }
 0x2cb   :  { %1688 = vtanh.f32 %v2382_v57  ;;  %749 = vmatpush.msrb.mxu2 %v2282_v18 }
 0x2cc   :  { %789 = vmatpush.msra.mxu1 %v2290_v0  ;;  %809 = vmatpush.msra.mxu0 %v2292_v4 }
 0x2d1   :  { %v1689_v10 = vpop.eup %1688 }
 0x2d2   :  { %v522_v40 = vmul.f32 %v1689_v10, %v516_v38  ;;  %v3105_v10 = vld [vmem:[#allocation30_spill] sm:$0xff]  ;;  %v3106_v38 = vld [vmem:[#allocation31_spill] sm:$0xff] }
 0x2d4   :  { %603 = vmatmul.f32.vlgmr.msra.gmra.mxu2 %v522_v40  ;;  %623 = vmatmul.f32.vlgmr.msra.gmra.mxu3 %v522_v40 }
 0x2d5   :  { %643 = vmatmul.f32.vlgmr.msrb.gmra.mxu1 %v522_v40  ;;  %663 = vmatmul.f32.vlgmr.msrb.gmra.mxu0 %v522_v40  ;;  %v3107_v40 = vld [vmem:[#allocation32_spill] sm:$0xff] }
 0x2d6   :  { %881 = vmatpush.msra.mxu2 %v2091_v19  ;;  %901 = vmatpush.msra.mxu3 %v3092_v55 }
 0x2d7   :  { %921 = vmatpush.msrb.mxu1 %v2095_v21  ;;  %941 = vmatpush.msrb.mxu0 %v2099_v22 }
 0x2d8   :  { %882 = vmatpush.msra.mxu2 %v3093_v42  ;;  %902 = vmatpush.msra.mxu3 %v2103_v7 }
 0x2d9   :  { %922 = vmatpush.msrb.mxu1 %v2107_v1  ;;  %942 = vmatpush.msrb.mxu0 %v2109_v24 }
 0x2da   :  { %883 = vmatpush.msra.mxu2 %v2111_v25  ;;  %903 = vmatpush.msra.mxu3 %v2115_v26 }
 0x2db   :  { %923 = vmatpush.msrb.mxu1 %v2117_v27  ;;  %943 = vmatpush.msrb.mxu0 %v2119_v28 }
 0x2dc   :  { %884 = vmatpush.msra.mxu2 %v2123_v29  ;;  %904 = vmatpush.msra.mxu3 %v2125_v30 }
 0x2dd   :  { %924 = vmatpush.msrb.mxu1 %v2129_v31  ;;  %944 = vmatpush.msrb.mxu0 %v3094_v32 }
 0x2de   :  { %885 = vmatpush.msra.mxu2 %v2135_v33  ;;  %905 = vmatpush.msra.mxu3 %v2137_v34 }
 0x2df   :  { %925 = vmatpush.msrb.mxu1 %v2141_v35  ;;  %945 = vmatpush.msrb.mxu0 %v2143_v36 }
 0x2e0   :  { %886 = vmatpush.msra.mxu2 %v2147_v37  ;;  %906 = vmatpush.msra.mxu3 %v3095_v45 }
 0x2e1   :  { %926 = vmatpush.msrb.mxu1 %v2153_v39  ;;  %946 = vmatpush.msrb.mxu0 %v3096_v20 }
 0x2e2   :  { %887 = vmatpush.msra.mxu2 %v2159_v41  ;;  %907 = vmatpush.msra.mxu3 %v3097_v14 }
 0x2e3   :  { %927 = vmatpush.msrb.mxu1 %v2165_v44  ;;  %947 = vmatpush.msrb.mxu0 %v3098_v13 }
 0x2e4   :  { %888 = vmatpush.msra.mxu2 %v2171_v46  ;;  %908 = vmatpush.msra.mxu3 %v2173_v47 }
 0x2e5   :  { %928 = vmatpush.msrb.mxu1 %v3099_v49  ;;  %948 = vmatpush.msrb.mxu0 %v3100_v58 }
 0x2e6   :  { %889 = vmatpush.msra.mxu2 %v2183_v50  ;;  %909 = vmatpush.msra.mxu3 %v3101_v59  ;;  %v3108_v50 = vld [vmem:[#allocation34_spill] sm:$0xff] }
 0x2e7   :  { %929 = vmatpush.msrb.mxu1 %v2194_v53  ;;  %949 = vmatpush.msrb.mxu0 %v2196_v54 }
 0x2e8   :  { %890 = vmatpush.msra.mxu2 %v3102_v60  ;;  %910 = vmatpush.msra.mxu3 %v3103_v62 }
 0x2e9   :  { %930 = vmatpush.msrb.mxu1 %v3104_v63  ;;  %950 = vmatpush.msrb.mxu0 %v3105_v10 }
 0x2ea   :  { %891 = vmatpush.msra.mxu2 %v3106_v38  ;;  %911 = vmatpush.msra.mxu3 %v3107_v40 }
 0x2eb   :  { %931 = vmatpush.msrb.mxu1 %v2219_v2  ;;  %951 = vmatpush.msrb.mxu0 %v3108_v50 }
 0x2ec   :  { %892 = vmatpush.msra.mxu2 %v3087_v48  ;;  %912 = vmatpush.msra.mxu3 %v3088_v5 }
 0x2ed   :  { %932 = vmatpush.msrb.mxu1 %v3089_v51  ;;  %952 = vmatpush.msrb.mxu0 %v3090_v23 }
 0x2ee   :  { %893 = vmatpush.msra.mxu2 %v2239_v11  ;;  %913 = vmatpush.msra.mxu3 %v2241_v12 }
 0x2ef   :  { %933 = vmatpush.msrb.mxu1 %v2247_v15  ;;  %953 = vmatpush.msrb.mxu0 %v3091_v52 }
 0x2f0   :  { %894 = vmatpush.msra.mxu2 %v2253_v43  ;;  %914 = vmatpush.msra.mxu3 %v2255_v61 }
 0x2f1   :  { %934 = vmatpush.msrb.mxu1 %v2260_v6  ;;  %954 = vmatpush.msrb.mxu0 %v2262_v3  ;;  %v3109_v6 = vld [vmem:[#allocation39_spill] sm:$0xff] }
 0x2f2   :  { %895 = vmatpush.msra.mxu2 %v2266_v9  ;;  %915 = vmatpush.msra.mxu3 %v2268_v8  ;;  %v3110_v8 = vld [vmem:[#allocation50_spill] sm:$0xff] }
 0x2f3   :  { %935 = vmatpush.msrb.mxu1 %v2276_v56  ;;  %955 = vmatpush.msrb.mxu0 %v2278_v17  ;;  %v3111_v56 = vld [vmem:[#allocation51_spill] sm:$0xff] }
 0x2f4   :  { %896 = vmatpush.msra.mxu2 %v2282_v18  ;;  %916 = vmatpush.msra.mxu3 %v2284_v16 }
 0x2f5   :  { %936 = vmatpush.msrb.mxu1 %v2290_v0  ;;  %956 = vmatpush.msrb.mxu0 %v2292_v4 }
 0x352   :  { %v664_v61 = vpop.f32.mrf.mxu0 }
 0x353   :  { %v670_v43 = vadd.f32 %v664_v61, %v3109_v6  ;;  %v3112_v6 = vld [vmem:[#allocation58_spill] sm:$0xff] }
 0x355   :  { %v1643_v3 = vmul.f32 -1.442695, %v670_v43 }
 0x357   :  { %1690 = vpow2.f32 %v1643_v3  ;;  %v604_v9 = vpop.f32.mrf.mxu2  ;;  %v624_v52 = vpop.f32.mrf.mxu3 }
 0x358   :  { %v667_v15 = vadd.f32 %v604_v9, %v3110_v8  ;;  %v668_v12 = vadd.f32 %v624_v52, %v3111_v56  ;;  %v644_v3 = vpop.f32.mrf.mxu1 }
 0x359   :  { %v669_v9 = vadd.f32 %v644_v3, %v3112_v6 }
 0x35a   :  { %v1641_v17 = vmul.f32 -1.442695, %v667_v15  ;;  %v1642_v11 = vmul.f32 -1.442695, %v668_v12 }
 0x35c   :  { %1692 = vpow2.f32 %v1641_v17 }
 0x35d   :  { %v1691_v18 = vpop.eup %1690  ;;  %1694 = vpow2.f32 %v1642_v11 }
 0x35e   :  { %v713_v16 = vadd.f32 1.0, %v1691_v18 }
 0x360   :  { %1696 = vrcp.f32 %v713_v16  ;;  %vm719_vm6 = vweird.f32 %v713_v16 }
 0x362   :  { %v1693_v0 = vpop.eup %1692 }
 0x363   :  { %v1695_v23 = vpop.eup %1694  ;;  %v674_v4 = vadd.f32 1.0, %v1693_v0 }
 0x364   :  { %v693_v51 = vadd.f32 1.0, %v1695_v23 }
 0x365   :  { %1698 = vrcp.f32 %v674_v4  ;;  %v686_v11 = vand.u32 2147483648, %v674_v4  ;;  %v684_v0 = vand.u32 2147483647, %v674_v4  ;;  %vm680_vm15 = vweird.f32 %v674_v4 }
 0x366   :  { %1700 = vrcp.f32 %v693_v51  ;;  %v1697_v43 = vpop.eup %1696  ;;  %v705_v5 = vand.u32 2147483648, %v693_v51  ;;  %v703_v48 = vand.u32 2147483647, %v693_v51  ;;  %vm699_vm1 = vweird.f32 %v693_v51 }
 0x367   :  { %v715_v12 = vmul.f32 %v1697_v43, %v713_v16  ;;  %1702 = vtanh.f32 %v669_v9  ;;  %v687_v3 = vor.u32 1.1754944e-38, %v686_v11  ;;  %vm685_vm2 = vcmp.eq.f32.partialorder %v684_v0, 8.507059e+37 }
 0x368   :  { %v706_v9 = vor.u32 1.1754944e-38, %v705_v5  ;;  %vm704_vm4 = vcmp.eq.f32.partialorder %v703_v48, 8.507059e+37  ;;  %vm720_vm5 = vweird.f32 %v1697_v43 }
 0x369   :  { %v716_v50 = vsub.f32 1.0, %v715_v12  ;;  %vm721_vm7 = vmor %vm719_vm6, %vm720_vm5 }
 0x36b   :  { %v1699_v61 = vpop.eup %1698  ;;  %v717_v10 = vmul.f32 %v1697_v43, %v716_v50  ;;  %v3136_v50 = vld [vmem:[#allocation54_spill] sm:$0xff] }
 0x36c   :  { %v1701_v8 = vpop.eup %1700  ;;  %v676_v52 = vmul.f32 %v1699_v61, %v674_v4  ;;  %vm681_vm13 = vweird.f32 %v1699_v61  ;;  %v725_v4 = vand.u32 2147483648, %v713_v16 }
 0x36d   :  { %v695_v15 = vmul.f32 %v1701_v8, %v693_v51  ;;  %vm700_vm14 = vweird.f32 %v1701_v8  ;;  %vm682_vm0 = vmor %vm680_vm15, %vm681_vm13 }
 0x36e   :  { %v677_v17 = vsub.f32 1.0, %v676_v52  ;;  %vm701_vm3 = vmor %vm699_vm1, %vm700_vm14  ;;  %v1703_v52 = vpop.eup %1702  ;;  %v726_v51 = vor.u32 1.1754944e-38, %v725_v4 }
 0x36f   :  { %v696_v18 = vsub.f32 1.0, %v695_v15 }
 0x370   :  { %v678_v56 = vmul.f32 %v1699_v61, %v677_v17 }
 0x371   :  { %v697_v23 = vmul.f32 %v1701_v8, %v696_v18 }
 0x372   :  { %v679_v2 = vadd.f32 %v1699_v61, %v678_v56  ;;  %v718_v56 = vadd.f32 %v1697_v43, %v717_v10 }
 0x373   :  { %v698_v6 = vadd.f32 %v1701_v8, %v697_v23  ;;  %v3143_v23 = vld [vmem:[#allocation58_spill] sm:$0xff] }
 0x374   :  { %v683_v40 = vsel %vm682_vm0, %v1699_v61, %v679_v2  ;;  %v723_v2 = vand.u32 2147483647, %v713_v16  ;;  %v722_v5 = vsel %vm721_vm7, %v1697_v43, %v718_v56  ;;  %v3139_v16 = vld [vmem:[#allocation57_spill] sm:$0xff] }
 0x375   :  { %v688_v15 = vsel %vm685_vm2, %v687_v3, %v683_v40  ;;  %v702_v17 = vsel %vm701_vm3, %v1701_v8, %v698_v6 }
 0x376   :  { %v707_v38 = vsel %vm704_vm4, %v706_v9, %v702_v17  ;;  %v730_v18 = vmul.f32 %v1703_v52, %v688_v15  ;;  %vm724_vm8 = vcmp.eq.f32.partialorder %v723_v2, 8.507059e+37 }
 0x377   :  { %v729_v63 = vmul.f32 %v707_v38, %v2382_v57  ;;  %v727_v8 = vsel %vm724_vm8, %v726_v51, %v722_v5 }
 0x379   :  { %v2470_v12 = vadd.f32 %v730_v18, %v729_v63 }
 0x37b   :  { %1704 = vtanh.f32 %v2470_v12 }
 0x381   :  { %v1705_v6 = vpop.eup %1704 }
 0x382   :  { %v733_v48 = vmul.f32 %v1705_v6, %v727_v8 }
 0x384   :  { %750 = vmatmul.f32.vlgmr.msrb.gmra.mxu2 %v733_v48  ;;  %770 = vmatmul.f32.vlgmr.msrb.gmra.mxu3 %v733_v48 }
 0x385   :  { %790 = vmatmul.f32.vlgmr.msra.gmra.mxu1 %v733_v48  ;;  %810 = vmatmul.f32.vlgmr.msra.gmra.mxu0 %v733_v48 }
 0x386   :  { %1028 = vmatpush.msrb.mxu2 %v2091_v19  ;;  %1048 = vmatpush.msrb.mxu3 %v3092_v55  ;;  %v3113_v19 = vld [vmem:[#allocation25_spill] sm:$0xff]  ;;  %v3140_v55 = vld [vmem:[#allocation39_spill] sm:$0xff] }
 0x387   :  { %1068 = vmatpush.msra.mxu1 %v2095_v21  ;;  %1088 = vmatpush.msra.mxu0 %v2099_v22  ;;  %v3114_v21 = vld [vmem:[#allocation29_spill] sm:$0xff]  ;;  %v3115_v22 = vld [vmem:[#allocation30_spill] sm:$0xff] }
 0x388   :  { %1029 = vmatpush.msrb.mxu2 %v3093_v42  ;;  %1049 = vmatpush.msrb.mxu3 %v2103_v7  ;;  %v3116_v7 = vld [vmem:[#allocation31_spill] sm:$0xff] }
 0x389   :  { %1069 = vmatpush.msra.mxu1 %v2107_v1  ;;  %1089 = vmatpush.msra.mxu0 %v2109_v24  ;;  %v3117_v1 = vld [vmem:[#allocation32_spill] sm:$0xff]  ;;  %v3118_v24 = vld [vmem:[#allocation33_spill] sm:$0xff] }
 0x38a   :  { %1030 = vmatpush.msrb.mxu2 %v2111_v25  ;;  %1050 = vmatpush.msrb.mxu3 %v2115_v26  ;;  %v3119_v25 = vld [vmem:[#allocation34_spill] sm:$0xff]  ;;  %v3120_v26 = vld [vmem:[#allocation35_spill] sm:$0xff] }
 0x38b   :  { %1070 = vmatpush.msra.mxu1 %v2117_v27  ;;  %1090 = vmatpush.msra.mxu0 %v2119_v28  ;;  %v3121_v27 = vld [vmem:[#allocation36_spill] sm:$0xff]  ;;  %v3122_v28 = vld [vmem:[#allocation37_spill] sm:$0xff] }
 0x38c   :  { %1031 = vmatpush.msrb.mxu2 %v2123_v29  ;;  %1051 = vmatpush.msrb.mxu3 %v2125_v30  ;;  %v3123_v29 = vld [vmem:[#allocation38_spill] sm:$0xff]  ;;  %v3124_v30 = vld [vmem:[#allocation40_spill] sm:$0xff] }
 0x38d   :  { %1071 = vmatpush.msra.mxu1 %v2129_v31  ;;  %1091 = vmatpush.msra.mxu0 %v3094_v32  ;;  %v3125_v31 = vld [vmem:[#allocation41_spill] sm:$0xff] }
 0x38e   :  { %1032 = vmatpush.msrb.mxu2 %v2135_v33  ;;  %1052 = vmatpush.msrb.mxu3 %v2137_v34  ;;  %v3126_v33 = vld [vmem:[#allocation42_spill] sm:$0xff]  ;;  %v3127_v34 = vld [vmem:[#allocation43_spill] sm:$0xff] }
 0x38f   :  { %1072 = vmatpush.msra.mxu1 %v2141_v35  ;;  %1092 = vmatpush.msra.mxu0 %v2143_v36  ;;  %v3128_v35 = vld [vmem:[#allocation44_spill] sm:$0xff]  ;;  %v3129_v36 = vld [vmem:[#allocation45_spill] sm:$0xff] }
 0x390   :  { %1033 = vmatpush.msrb.mxu2 %v2147_v37  ;;  %1053 = vmatpush.msrb.mxu3 %v3095_v45  ;;  %v3130_v37 = vld [vmem:[#allocation46_spill] sm:$0xff] }
 0x391   :  { %1073 = vmatpush.msra.mxu1 %v2153_v39  ;;  %1093 = vmatpush.msra.mxu0 %v3096_v20  ;;  %v3131_v39 = vld [vmem:[#allocation47_spill] sm:$0xff] }
 0x392   :  { %1034 = vmatpush.msrb.mxu2 %v2159_v41  ;;  %1054 = vmatpush.msrb.mxu3 %v3097_v14  ;;  %v3132_v41 = vld [vmem:[#allocation48_spill] sm:$0xff]  ;;  %v3141_v14 = vld [vmem:[#allocation50_spill] sm:$0xff] }
 0x393   :  { %1074 = vmatpush.msra.mxu1 %v2165_v44  ;;  %1094 = vmatpush.msra.mxu0 %v3098_v13  ;;  %v3133_v44 = vld [vmem:[#allocation49_spill] sm:$0xff] }
 0x394   :  { %1035 = vmatpush.msrb.mxu2 %v2171_v46  ;;  %1055 = vmatpush.msrb.mxu3 %v2173_v47  ;;  %v3134_v46 = vld [vmem:[#allocation52_spill] sm:$0xff]  ;;  %v3135_v47 = vld [vmem:[#allocation53_spill] sm:$0xff] }
 0x395   :  { %1075 = vmatpush.msra.mxu1 %v3099_v49  ;;  %1095 = vmatpush.msra.mxu0 %v3100_v58  ;;  %v3142_v49 = vld [vmem:[#allocation51_spill] sm:$0xff] }
 0x396   :  { %1036 = vmatpush.msrb.mxu2 %v3113_v19  ;;  %1056 = vmatpush.msrb.mxu3 %v3101_v59 }
 0x397   :  { %1076 = vmatpush.msra.mxu1 %v2194_v53  ;;  %1096 = vmatpush.msra.mxu0 %v2196_v54  ;;  %v3137_v53 = vld [vmem:[#allocation55_spill] sm:$0xff]  ;;  %v3138_v54 = vld [vmem:[#allocation56_spill] sm:$0xff] }
 0x398   :  { %1037 = vmatpush.msrb.mxu2 %v3102_v60  ;;  %1057 = vmatpush.msrb.mxu3 %v3103_v62 }
 0x399   :  { %1077 = vmatpush.msra.mxu1 %v3114_v21  ;;  %1097 = vmatpush.msra.mxu0 %v3115_v22 }
 0x39a   :  { %1038 = vmatpush.msrb.mxu2 %v3116_v7  ;;  %1058 = vmatpush.msrb.mxu3 %v3117_v1 }
 0x39b   :  { %1078 = vmatpush.msra.mxu1 %v3118_v24  ;;  %1098 = vmatpush.msra.mxu0 %v3119_v25 }
 0x39c   :  { %1039 = vmatpush.msrb.mxu2 %v3120_v26  ;;  %1059 = vmatpush.msrb.mxu3 %v3121_v27 }
 0x39d   :  { %1079 = vmatpush.msra.mxu1 %v3122_v28  ;;  %1099 = vmatpush.msra.mxu0 %v3123_v29 }
 0x39e   :  { %1040 = vmatpush.msrb.mxu2 %v3124_v30  ;;  %1060 = vmatpush.msrb.mxu3 %v3125_v31 }
 0x39f   :  { %1080 = vmatpush.msra.mxu1 %v3126_v33  ;;  %1100 = vmatpush.msra.mxu0 %v3127_v34 }
 0x3a0   :  { %1041 = vmatpush.msrb.mxu2 %v3128_v35  ;;  %1061 = vmatpush.msrb.mxu3 %v3129_v36 }
 0x3a1   :  { %1081 = vmatpush.msra.mxu1 %v3130_v37  ;;  %1101 = vmatpush.msra.mxu0 %v3131_v39 }
 0x3a2   :  { %1042 = vmatpush.msrb.mxu2 %v3132_v41  ;;  %1062 = vmatpush.msrb.mxu3 %v3133_v44 }
 0x3a3   :  { %1082 = vmatpush.msra.mxu1 %v3134_v46  ;;  %1102 = vmatpush.msra.mxu0 %v3135_v47 }
 0x3a4   :  { %1043 = vmatpush.msrb.mxu2 %v3136_v50  ;;  %1063 = vmatpush.msrb.mxu3 %v3137_v53 }
 0x3a5   :  { %1083 = vmatpush.msra.mxu1 %v3138_v54  ;;  %1103 = vmatpush.msra.mxu0 %v3139_v16 }
 0x402   :  { %v811_v57 = vpop.f32.mrf.mxu0  ;;  %v791_v61 = vpop.f32.mrf.mxu1 }
 0x403   :  { %v817_v42 = vadd.f32 %v811_v57, %v3140_v55  ;;  %v816_v3 = vadd.f32 %v791_v61, %v3143_v23  ;;  %v2569_v61 = vld [vmem:[#allocation10 + $0x1a0] sm:$0xff] }
 0x405   :  { %v1646_v32 = vmul.f32 -1.442695, %v817_v42 }
 0x407   :  { %1706 = vpow2.f32 %v1646_v32  ;;  %v751_v45 = vpop.f32.mrf.mxu2  ;;  %v771_v20 = vpop.f32.mrf.mxu3 }
 0x408   :  { %v814_v13 = vadd.f32 %v751_v45, %v3141_v14  ;;  %v815_v58 = vadd.f32 %v771_v20, %v3142_v49 }
 0x40a   :  { %v1644_v59 = vmul.f32 -1.442695, %v814_v13  ;;  %v1645_v60 = vmul.f32 -1.442695, %v815_v58 }
 0x40c   :  { %1708 = vpow2.f32 %v1644_v59 }
 0x40d   :  { %v1707_v62 = vpop.eup %1706  ;;  %1710 = vpow2.f32 %v1645_v60  ;;  %v2548_v60 = vld [vmem:[#allocation10 + $0x1e8] sm:$0xff] }
 0x40e   :  { %v860_v63 = vadd.f32 1.0, %v1707_v62  ;;  %v2551_v62 = vld [vmem:[#allocation10 + $0x1f0] sm:$0xff] }
 0x410   :  { %1712 = vrcp.f32 %v860_v63  ;;  %v872_v42 = vand.u32 2147483648, %v860_v63  ;;  %vm866_vm2 = vweird.f32 %v860_v63  ;;  %v870_v32 = vand.u32 2147483647, %v860_v63 }
 0x412   :  { %v1709_v10 = vpop.eup %1708  ;;  %v873_v20 = vor.u32 1.1754944e-38, %v872_v42  ;;  %vm871_vm4 = vcmp.eq.f32.partialorder %v870_v32, 8.507059e+37  ;;  %v2659_v42 = vld [vmem:[#allocation10 + $0xd0] sm:$0xff]  ;;  %v2662_v32 = vld [vmem:[#allocation10 + $0xd8] sm:$0xff] }
 0x413   :  { %v1711_v38 = vpop.eup %1710  ;;  %v821_v40 = vadd.f32 1.0, %v1709_v10  ;;  %v2557_v10 = vld [vmem:[#allocation10 + $0x1c0] sm:$0xff]  ;;  %3145 = vst [vmem:[#allocation17_spill] sm:$0xff] %v2659_v42 }
 0x414   :  { %v840_v43 = vadd.f32 1.0, %v1711_v38  ;;  %v2560_v38 = vld [vmem:[#allocation10 + $0x1c8] sm:$0xff]  ;;  %3146 = vst [vmem:[#allocation18_spill] sm:$0xff] %v2662_v32 }
 0x415   :  { %1714 = vrcp.f32 %v821_v40  ;;  %v833_v56 = vand.u32 2147483648, %v821_v40  ;;  %v831_v5 = vand.u32 2147483647, %v821_v40  ;;  %vm827_vm11 = vweird.f32 %v821_v40 }
 0x416   :  { %1716 = vrcp.f32 %v840_v43  ;;  %v1713_v11 = vpop.eup %1712  ;;  %v852_v51 = vand.u32 2147483648, %v840_v43  ;;  %v850_v8 = vand.u32 2147483647, %v840_v43  ;;  %vm846_vm13 = vweird.f32 %v840_v43 }
 0x417   :  { %v862_v17 = vmul.f32 %v1713_v11, %v860_v63  ;;  %1718 = vtanh.f32 %v816_v3  ;;  %v834_v21 = vor.u32 1.1754944e-38, %v833_v56  ;;  %vm832_vm14 = vcmp.eq.f32.partialorder %v831_v5, 8.507059e+37  ;;  %v2554_v63 = vld [vmem:[#allocation10 + $0x1f8] sm:$0xff]  ;;  %v2596_v56 = vld [vmem:[#allocation10 + $0x168] sm:$0xff]  ;;  %v2605_v5 = vld [vmem:[#allocation10 + $0x140] sm:$0xff] }
 0x418   :  { %v853_v1 = vor.u32 1.1754944e-38, %v852_v51  ;;  %vm851_vm0 = vcmp.eq.f32.partialorder %v850_v8, 8.507059e+37  ;;  %vm867_vm1 = vweird.f32 %v1713_v11  ;;  %v2578_v3 = vld [vmem:[#allocation10 + $0x1b8] sm:$0xff]  ;;  %v2608_v51 = vld [vmem:[#allocation10 + $0x148] sm:$0xff] }
 0x419   :  { %v863_v48 = vsub.f32 1.0, %v862_v17  ;;  %vm868_vm3 = vmor %vm866_vm2, %vm867_vm1  ;;  %v2590_v17 = vld [vmem:[#allocation10 + $0x198] sm:$0xff] }
 0x41a   :  { %v2614_v8 = vld [vmem:[#allocation10 + $0x158] sm:$0xff] }
 0x41b   :  { %v1715_v0 = vpop.eup %1714  ;;  %v864_v28 = vmul.f32 %v1713_v11, %v863_v48  ;;  %v2617_v48 = vld [vmem:[#allocation10 + $0x120] sm:$0xff] }
 0x41c   :  { %v1717_v9 = vpop.eup %1716  ;;  %v823_v52 = vmul.f32 %v1715_v0, %v821_v40  ;;  %vm828_vm9 = vweird.f32 %v1715_v0  ;;  %v2563_v40 = vld [vmem:[#allocation10 + $0x1d0] sm:$0xff] }
 0x41d   :  { %v842_v15 = vmul.f32 %v1717_v9, %v840_v43  ;;  %vm847_vm10 = vweird.f32 %v1717_v9  ;;  %vm829_vm12 = vmor %vm827_vm11, %vm828_vm9  ;;  %v1719_v24 = vpop.eup %1718  ;;  %v865_v57 = vadd.f32 %v1713_v11, %v864_v28  ;;  %v2566_v43 = vld [vmem:[#allocation10 + $0x1d8] sm:$0xff]  ;;  %v2647_v28 = vld [vmem:[#allocation10 + $0xf0] sm:$0xff] }
 0x41e   :  { %v824_v18 = vsub.f32 1.0, %v823_v52  ;;  %vm848_vm15 = vmor %vm846_vm13, %vm847_vm10  ;;  %v2584_v52 = vld [vmem:[#allocation10 + $0x188] sm:$0xff] }
 0x41f   :  { %v843_v4 = vsub.f32 1.0, %v842_v15  ;;  %v869_v45 = vsel %vm868_vm3, %v1713_v11, %v865_v57  ;;  %v2572_v11 = vld [vmem:[#allocation10 + $0x1a8] sm:$0xff]  ;;  %v2587_v15 = vld [vmem:[#allocation10 + $0x190] sm:$0xff] }
 0x420   :  { %v825_v2 = vmul.f32 %v1715_v0, %v824_v18  ;;  %v874_v58 = vsel %vm871_vm4, %v873_v20, %v869_v45  ;;  %v2593_v18 = vld [vmem:[#allocation10 + $0x160] sm:$0xff]  ;;  %v2656_v57 = vld [vmem:[#allocation10 + $0xc8] sm:$0xff] }
 0x421   :  { %v844_v6 = vmul.f32 %v1717_v9, %v843_v4  ;;  %v2599_v4 = vld [vmem:[#allocation10 + $0x170] sm:$0xff]  ;;  %3144 = vst [vmem:[#allocation16_spill] sm:$0xff] %v2656_v57  ;;  %v2665_v45 = vld [vmem:[#allocation10 + $0xa0] sm:$0xff]  ;;  %v2668_v20 = vld [vmem:[#allocation10 + $0xa8] sm:$0xff] }
 0x422   :  { %v826_v19 = vadd.f32 %v1715_v0, %v825_v2  ;;  %v2602_v2 = vld [vmem:[#allocation10 + $0x178] sm:$0xff]  ;;  %3147 = vst [vmem:[#allocation19_spill] sm:$0xff] %v2665_v45 }
 0x423   :  { %v845_v22 = vadd.f32 %v1717_v9, %v844_v6  ;;  %v2611_v6 = vld [vmem:[#allocation10 + $0x150] sm:$0xff]  ;;  %3148 = vst [vmem:[#allocation20_spill] sm:$0xff] %v2668_v20 }
 0x424   :  { %v830_v7 = vsel %vm829_vm12, %v1715_v0, %v826_v19  ;;  %v2575_v0 = vld [vmem:[#allocation10 + $0x1b0] sm:$0xff]  ;;  %v2620_v19 = vld [vmem:[#allocation10 + $0x128] sm:$0xff] }
 0x425   :  { %v835_v25 = vsel %vm832_vm14, %v834_v21, %v830_v7  ;;  %v849_v26 = vsel %vm848_vm15, %v1717_v9, %v845_v22  ;;  %v2581_v9 = vld [vmem:[#allocation10 + $0x180] sm:$0xff]  ;;  %v2623_v21 = vld [vmem:[#allocation10 + $0x130] sm:$0xff]  ;;  %v2626_v22 = vld [vmem:[#allocation10 + $0x138] sm:$0xff] }
 0x426   :  { %v854_v27 = vsel %vm851_vm0, %v853_v1, %v849_v26  ;;  %v877_v29 = vmul.f32 %v1719_v24, %v835_v25  ;;  %v2629_v7 = vld [vmem:[#allocation10 + $0x100] sm:$0xff]  ;;  %v2632_v1 = vld [vmem:[#allocation10 + $0x108] sm:$0xff]  ;;  %v2635_v24 = vld [vmem:[#allocation10 + $0x110] sm:$0xff] }
 0x427   :  { %v876_v30 = vmul.f32 %v854_v27, %v2470_v12  ;;  %v2545_v12 = vld [vmem:[#allocation10 + $0x1e0] sm:$0xff]  ;;  %v2638_v25 = vld [vmem:[#allocation10 + $0x118] sm:$0xff]  ;;  %v2644_v27 = vld [vmem:[#allocation10 + $0xe8] sm:$0xff] }
 0x428   :  { %v2641_v26 = vld [vmem:[#allocation10 + $0xe0] sm:$0xff] }
 0x429   :  { %v2542_v31 = vadd.f32 %v877_v29, %v876_v30  ;;  %v2650_v29 = vld [vmem:[#allocation10 + $0xf8] sm:$0xff]  ;;  %v2653_v30 = vld [vmem:[#allocation10 + $0xc0] sm:$0xff] }
 0x42b   :  { %1720 = vtanh.f32 %v2542_v31 }
 0x431   :  { %v1721_v13 = vpop.eup %1720 }
 0x432   :  { %v880_v59 = vmul.f32 %v1721_v13, %v874_v58  ;;  %v2671_v13 = vld [vmem:[#allocation10 + $0xb0] sm:$0xff]  ;;  %v2674_v58 = vld [vmem:[#allocation10 + $0xb8] sm:$0xff] }
 0x433   :  { %3149 = vst [vmem:[#allocation21_spill] sm:$0xff] %v2671_v13 }
 0x434   :  { %897 = vmatmul.f32.vlgmr.msra.gmra.mxu2 %v880_v59  ;;  %917 = vmatmul.f32.vlgmr.msra.gmra.mxu3 %v880_v59  ;;  %3150 = vst [vmem:[#allocation22_spill] sm:$0xff] %v2674_v58 }
 0x435   :  { %937 = vmatmul.f32.vlgmr.msrb.gmra.mxu1 %v880_v59  ;;  %957 = vmatmul.f32.vlgmr.msrb.gmra.mxu0 %v880_v59  ;;  %v2677_v59 = vld [vmem:[#allocation10 + $0x80] sm:$0xff] }
 0x436   :  { %1175 = vmatpush.msra.mxu2 %v2545_v12  ;;  %1195 = vmatpush.msra.mxu3 %v2548_v60  ;;  %3151 = vst [vmem:[#allocation23_spill] sm:$0xff] %v2677_v59 }
 0x437   :  { %1215 = vmatpush.msrb.mxu1 %v2551_v62  ;;  %1235 = vmatpush.msrb.mxu0 %v2554_v63 }
 0x438   :  { %1176 = vmatpush.msra.mxu2 %v2557_v10  ;;  %1196 = vmatpush.msra.mxu3 %v2560_v38 }
 0x439   :  { %1216 = vmatpush.msrb.mxu1 %v2563_v40  ;;  %1236 = vmatpush.msrb.mxu0 %v2566_v43 }
 0x43a   :  { %1177 = vmatpush.msra.mxu2 %v2569_v61  ;;  %1197 = vmatpush.msra.mxu3 %v2572_v11 }
 0x43b   :  { %1217 = vmatpush.msrb.mxu1 %v2575_v0  ;;  %1237 = vmatpush.msrb.mxu0 %v2578_v3 }
 0x43c   :  { %1178 = vmatpush.msra.mxu2 %v2581_v9  ;;  %1198 = vmatpush.msra.mxu3 %v2584_v52 }
 0x43d   :  { %1218 = vmatpush.msrb.mxu1 %v2587_v15  ;;  %1238 = vmatpush.msrb.mxu0 %v2590_v17 }
 0x43e   :  { %1179 = vmatpush.msra.mxu2 %v2593_v18  ;;  %1199 = vmatpush.msra.mxu3 %v2596_v56 }
 0x43f   :  { %1219 = vmatpush.msrb.mxu1 %v2599_v4  ;;  %1239 = vmatpush.msrb.mxu0 %v2602_v2 }
 0x440   :  { %1180 = vmatpush.msra.mxu2 %v2605_v5  ;;  %1200 = vmatpush.msra.mxu3 %v2608_v51 }
 0x441   :  { %1220 = vmatpush.msrb.mxu1 %v2611_v6  ;;  %1240 = vmatpush.msrb.mxu0 %v2614_v8 }
 0x442   :  { %1181 = vmatpush.msra.mxu2 %v2617_v48  ;;  %1201 = vmatpush.msra.mxu3 %v2620_v19 }
 0x443   :  { %1221 = vmatpush.msrb.mxu1 %v2623_v21  ;;  %1241 = vmatpush.msrb.mxu0 %v2626_v22 }
 0x444   :  { %1182 = vmatpush.msra.mxu2 %v2629_v7  ;;  %1202 = vmatpush.msra.mxu3 %v2632_v1 }
 0x445   :  { %1222 = vmatpush.msrb.mxu1 %v2635_v24  ;;  %1242 = vmatpush.msrb.mxu0 %v2638_v25 }
 0x446   :  { %1183 = vmatpush.msra.mxu2 %v2641_v26  ;;  %1203 = vmatpush.msra.mxu3 %v2644_v27 }
 0x447   :  { %1223 = vmatpush.msrb.mxu1 %v2647_v28  ;;  %1243 = vmatpush.msrb.mxu0 %v2650_v29 }
 0x448   :  { %1184 = vmatpush.msra.mxu2 %v2653_v30  ;;  %1204 = vmatpush.msra.mxu3 %v2656_v57 }
 0x449   :  { %1224 = vmatpush.msrb.mxu1 %v2659_v42  ;;  %1244 = vmatpush.msrb.mxu0 %v2662_v32  ;;  %v2680_v32 = vld [vmem:[#allocation10 + $0x88] sm:$0xff] }
 0x44a   :  { %1185 = vmatpush.msra.mxu2 %v2665_v45  ;;  %1205 = vmatpush.msra.mxu3 %v2668_v20  ;;  %3152 = vst [vmem:[#allocation24_spill] sm:$0xff] %v2680_v32  ;;  %v2683_v45 = vld [vmem:[#allocation10 + $0x90] sm:$0xff]  ;;  %v2686_v20 = vld [vmem:[#allocation10 + $0x98] sm:$0xff] }
 0x44b   :  { %1225 = vmatpush.msrb.mxu1 %v2671_v13  ;;  %1245 = vmatpush.msrb.mxu0 %v2674_v58  ;;  %3153 = vst [vmem:[#allocation26_spill] sm:$0xff] %v2683_v45  ;;  %v2689_v13 = vld [vmem:[#allocation10 + $0x60] sm:$0xff]  ;;  %v2692_v58 = vld [vmem:[#allocation10 + $0x68] sm:$0xff] }
 0x44c   :  { %1186 = vmatpush.msra.mxu2 %v2677_v59  ;;  %1206 = vmatpush.msra.mxu3 %v2680_v32  ;;  %3154 = vst [vmem:[#allocation27_spill] sm:$0xff] %v2686_v20 }
 0x44d   :  { %1226 = vmatpush.msrb.mxu1 %v2683_v45  ;;  %1246 = vmatpush.msrb.mxu0 %v2686_v20  ;;  %3155 = vst [vmem:[#allocation28_spill] sm:$0xff] %v2689_v13 }
 0x44e   :  { %1187 = vmatpush.msra.mxu2 %v2689_v13  ;;  %3156 = vst [vmem:[#allocation25_spill] sm:$0xff] %v2692_v58  ;;  %1207 = vmatpush.msra.mxu3 %v2692_v58 }
 0x44f   :  { %1227 = vmatpush.msrb.mxu1 %v3126_v33  ;;  %1247 = vmatpush.msrb.mxu0 %v3127_v34 }
 0x450   :  { %1188 = vmatpush.msra.mxu2 %v3128_v35  ;;  %1208 = vmatpush.msra.mxu3 %v3129_v36 }
 0x451   :  { %1228 = vmatpush.msrb.mxu1 %v3130_v37  ;;  %1248 = vmatpush.msrb.mxu0 %v3131_v39 }
 0x452   :  { %1189 = vmatpush.msra.mxu2 %v3132_v41  ;;  %1209 = vmatpush.msra.mxu3 %v3133_v44 }
 0x453   :  { %1229 = vmatpush.msrb.mxu1 %v3134_v46  ;;  %1249 = vmatpush.msrb.mxu0 %v3135_v47 }
 0x454   :  { %1190 = vmatpush.msra.mxu2 %v3136_v50  ;;  %1210 = vmatpush.msra.mxu3 %v3137_v53 }
 0x455   :  { %1230 = vmatpush.msrb.mxu1 %v3138_v54  ;;  %1250 = vmatpush.msrb.mxu0 %v3139_v16 }
 0x4b2   :  { %v958_v33 = vpop.f32.mrf.mxu0 }
 0x4b3   :  { %v964_v34 = vadd.f32 %v958_v33, %v3140_v55  ;;  %v938_v33 = vpop.f32.mrf.mxu1 }
 0x4b5   :  { %v1649_v35 = vmul.f32 -1.442695, %v964_v34 }
 0x4b7   :  { %1722 = vpow2.f32 %v1649_v35  ;;  %v898_v36 = vpop.f32.mrf.mxu2  ;;  %v918_v37 = vpop.f32.mrf.mxu3 }
 0x4b8   :  { %v961_v39 = vadd.f32 %v898_v36, %v3141_v14  ;;  %v962_v41 = vadd.f32 %v918_v37, %v3142_v49  ;;  %v963_v36 = vadd.f32 %v938_v33, %v3143_v23 }
 0x4ba   :  { %v1647_v44 = vmul.f32 -1.442695, %v961_v39  ;;  %v1648_v46 = vmul.f32 -1.442695, %v962_v41 }
 0x4bc   :  { %1724 = vpow2.f32 %v1647_v44 }
 0x4bd   :  { %v1723_v47 = vpop.eup %1722  ;;  %1726 = vpow2.f32 %v1648_v46 }
 0x4be   :  { %v1007_v50 = vadd.f32 1.0, %v1723_v47 }
 0x4c0   :  { %1728 = vrcp.f32 %v1007_v50  ;;  %vm1013_vm14 = vweird.f32 %v1007_v50 }
 0x4c2   :  { %v1725_v53 = vpop.eup %1724 }
 0x4c3   :  { %v1727_v54 = vpop.eup %1726  ;;  %v968_v16 = vadd.f32 1.0, %v1725_v53 }
 0x4c4   :  { %v987_v58 = vadd.f32 1.0, %v1727_v54 }
 0x4c5   :  { %1730 = vrcp.f32 %v968_v16  ;;  %v980_v46 = vand.u32 2147483648, %v968_v16  ;;  %v978_v53 = vand.u32 2147483647, %v968_v16  ;;  %vm974_vm7 = vweird.f32 %v968_v16 }
 0x4c6   :  { %1732 = vrcp.f32 %v987_v58  ;;  %v1729_v34 = vpop.eup %1728  ;;  %v999_v55 = vand.u32 2147483648, %v987_v58  ;;  %v997_v13 = vand.u32 2147483647, %v987_v58  ;;  %vm993_vm9 = vweird.f32 %v987_v58 }
 0x4c7   :  { %v1009_v41 = vmul.f32 %v1729_v34, %v1007_v50  ;;  %1734 = vtanh.f32 %v963_v36  ;;  %v981_v33 = vor.u32 1.1754944e-38, %v980_v46  ;;  %vm979_vm10 = vcmp.eq.f32.partialorder %v978_v53, 8.507059e+37  ;;  %v3166_v46 = vld [vmem:[#allocation26_spill] sm:$0xff]  ;;  %v3167_v53 = vld [vmem:[#allocation27_spill] sm:$0xff] }
 0x4c8   :  { %v1000_v36 = vor.u32 1.1754944e-38, %v999_v55  ;;  %vm998_vm12 = vcmp.eq.f32.partialorder %v997_v13, 8.507059e+37  ;;  %vm1014_vm13 = vweird.f32 %v1729_v34  ;;  %v3161_v13 = vld [vmem:[#allocation20_spill] sm:$0xff] }
 0x4c9   :  { %v1010_v20 = vsub.f32 1.0, %v1009_v41  ;;  %vm1015_vm15 = vmor %vm1013_vm14, %vm1014_vm13 }
 0x4cb   :  { %v1731_v35 = vpop.eup %1730  ;;  %v1011_v42 = vmul.f32 %v1729_v34, %v1010_v20  ;;  %v3160_v20 = vld [vmem:[#allocation19_spill] sm:$0xff] }
 0x4cc   :  { %v1733_v14 = vpop.eup %1732  ;;  %v970_v37 = vmul.f32 %v1731_v35, %v968_v16  ;;  %vm975_vm5 = vweird.f32 %v1731_v35  ;;  %v1019_v16 = vand.u32 2147483648, %v1007_v50 }
 0x4cd   :  { %v989_v39 = vmul.f32 %v1733_v14, %v987_v58  ;;  %vm994_vm6 = vweird.f32 %v1733_v14  ;;  %vm976_vm8 = vmor %vm974_vm7, %vm975_vm5 }
 0x4ce   :  { %v971_v44 = vsub.f32 1.0, %v970_v37  ;;  %vm995_vm11 = vmor %vm993_vm9, %vm994_vm6  ;;  %v1735_v37 = vpop.eup %1734  ;;  %v1020_v58 = vor.u32 1.1754944e-38, %v1019_v16  ;;  %v2785_v16 = vld [vmem:[#allocation10 + $0x20] sm:$0xff] }
 0x4cf   :  { %v990_v47 = vsub.f32 1.0, %v989_v39  ;;  %3176 = vst [vmem:[#allocation35_spill] sm:$0xff] %v2785_v16 }
 0x4d0   :  { %v972_v49 = vmul.f32 %v1731_v35, %v971_v44 }
 0x4d1   :  { %v991_v54 = vmul.f32 %v1733_v14, %v990_v47 }
 0x4d2   :  { %v973_v45 = vadd.f32 %v1731_v35, %v972_v49  ;;  %v1012_v49 = vadd.f32 %v1729_v34, %v1011_v42  ;;  %v3159_v42 = vld [vmem:[#allocation18_spill] sm:$0xff] }
 0x4d3   :  { %v992_v23 = vadd.f32 %v1733_v14, %v991_v54  ;;  %v3168_v54 = vld [vmem:[#allocation28_spill] sm:$0xff] }
 0x4d4   :  { %v977_v32 = vsel %vm976_vm8, %v1731_v35, %v973_v45  ;;  %v1017_v45 = vand.u32 2147483647, %v1007_v50  ;;  %v1016_v55 = vsel %vm1015_vm15, %v1729_v34, %v1012_v49  ;;  %v3163_v50 = vld [vmem:[#allocation22_spill] sm:$0xff]  ;;  %v3164_v34 = vld [vmem:[#allocation23_spill] sm:$0xff]  ;;  %v3165_v35 = vld [vmem:[#allocation24_spill] sm:$0xff] }
 0x4d5   :  { %v982_v39 = vsel %vm979_vm10, %v981_v33, %v977_v32  ;;  %v996_v44 = vsel %vm995_vm11, %v1733_v14, %v992_v23  ;;  %v3169_v33 = vld [vmem:[#allocation25_spill] sm:$0xff]  ;;  %v2782_v49 = vld [vmem:[#allocation10 + $0x58] sm:$0xff] }
 0x4d6   :  { %v1001_v59 = vsel %vm998_vm12, %v1000_v36, %v996_v44  ;;  %v1024_v47 = vmul.f32 %v1735_v37, %v982_v39  ;;  %vm1018_vm0 = vcmp.eq.f32.partialorder %v1017_v45, 8.507059e+37  ;;  %v2767_v36 = vld [vmem:[#allocation10 + $0x70] sm:$0xff]  ;;  %v2770_v37 = vld [vmem:[#allocation10 + $0x78] sm:$0xff]  ;;  %v2773_v39 = vld [vmem:[#allocation10 + $0x40] sm:$0xff]  ;;  %3175 = vst [vmem:[#allocation34_spill] sm:$0xff] %v2782_v49 }
 0x4d7   :  { %v1023_v57 = vmul.f32 %v1001_v59, %v2542_v31  ;;  %v1021_v23 = vsel %vm1018_vm0, %v1020_v58, %v1016_v55  ;;  %v3157_v31 = vld [vmem:[#allocation16_spill] sm:$0xff]  ;;  %v3162_v59 = vld [vmem:[#allocation21_spill] sm:$0xff]  ;;  %3170 = vst [vmem:[#allocation29_spill] sm:$0xff] %v2767_v36  ;;  %v2794_v58 = vld [vmem:[#allocation10 + $0x38] sm:$0xff] }
 0x4d8   :  { %3171 = vst [vmem:[#allocation30_spill] sm:$0xff] %v2770_v37  ;;  %v2776_v44 = vld [vmem:[#allocation10 + $0x48] sm:$0xff]  ;;  %v2791_v55 = vld [vmem:[#allocation10 + $0x30] sm:$0xff] }
 0x4d9   :  { %v2714_v41 = vadd.f32 %v1024_v47, %v1023_v57  ;;  %v3158_v57 = vld [vmem:[#allocation17_spill] sm:$0xff]  ;;  %3172 = vst [vmem:[#allocation31_spill] sm:$0xff] %v2773_v39  ;;  %v2788_v45 = vld [vmem:[#allocation10 + $0x28] sm:$0xff] }
 0x4da   :  { %3173 = vst [vmem:[#allocation32_spill] sm:$0xff] %v2776_v44  ;;  %v2779_v47 = vld [vmem:[#allocation10 + $0x50] sm:$0xff] }
 0x4db   :  { %1736 = vtanh.f32 %v2714_v41  ;;  %3174 = vst [vmem:[#allocation33_spill] sm:$0xff] %v2779_v47 }
 0x4dc   :  { %3177 = vst [vmem:[#allocation36_spill] sm:$0xff] %v2788_v45 }
 0x4dd   :  { %3178 = vst [vmem:[#allocation37_spill] sm:$0xff] %v2791_v55 }
 0x4de   :  { %3179 = vst [vmem:[#allocation38_spill] sm:$0xff] %v2794_v58 }
 0x4e1   :  { %v1737_v14 = vpop.eup %1736 }
 0x4e2   :  { %v1027_v32 = vmul.f32 %v1737_v14, %v1021_v23  ;;  %v2797_v14 = vld [vmem:[#allocation10] sm:$0xff]  ;;  %v2800_v23 = vld [vmem:[#allocation10 + $0x8] sm:$0xff] }
 0x4e3   :  { %3180 = vst [vmem:[#allocation40_spill] sm:$0xff] %v2797_v14 }
 0x4e4   :  { %1044 = vmatmul.f32.vlgmr.msrb.gmra.mxu2 %v1027_v32  ;;  %1064 = vmatmul.f32.vlgmr.msrb.gmra.mxu3 %v1027_v32  ;;  %3181 = vst [vmem:[#allocation41_spill] sm:$0xff] %v2800_v23 }
 0x4e5   :  { %1084 = vmatmul.f32.vlgmr.msra.gmra.mxu1 %v1027_v32  ;;  %1104 = vmatmul.f32.vlgmr.msra.gmra.mxu0 %v1027_v32  ;;  %v2803_v32 = vld [vmem:[#allocation10 + $0x10] sm:$0xff] }
 0x4e6   :  { %1322 = vmatpush.msrb.mxu2 %v2545_v12  ;;  %1342 = vmatpush.msrb.mxu3 %v2548_v60  ;;  %3182 = vst [vmem:[#allocation42_spill] sm:$0xff] %v2803_v32 }
 0x4e7   :  { %1362 = vmatpush.msra.mxu1 %v2551_v62  ;;  %1382 = vmatpush.msra.mxu0 %v2554_v63 }
 0x4e8   :  { %1323 = vmatpush.msrb.mxu2 %v2557_v10  ;;  %1343 = vmatpush.msrb.mxu3 %v2560_v38 }
 0x4e9   :  { %1363 = vmatpush.msra.mxu1 %v2563_v40  ;;  %1383 = vmatpush.msra.mxu0 %v2566_v43 }
 0x4ea   :  { %1324 = vmatpush.msrb.mxu2 %v2569_v61  ;;  %1344 = vmatpush.msrb.mxu3 %v2572_v11 }
 0x4eb   :  { %1364 = vmatpush.msra.mxu1 %v2575_v0  ;;  %1384 = vmatpush.msra.mxu0 %v2578_v3 }
 0x4ec   :  { %1325 = vmatpush.msrb.mxu2 %v2581_v9  ;;  %1345 = vmatpush.msrb.mxu3 %v2584_v52 }
 0x4ed   :  { %1365 = vmatpush.msra.mxu1 %v2587_v15  ;;  %1385 = vmatpush.msra.mxu0 %v2590_v17 }
 0x4ee   :  { %1326 = vmatpush.msrb.mxu2 %v2593_v18  ;;  %1346 = vmatpush.msrb.mxu3 %v2596_v56 }
 0x4ef   :  { %1366 = vmatpush.msra.mxu1 %v2599_v4  ;;  %1386 = vmatpush.msra.mxu0 %v2602_v2 }
 0x4f0   :  { %1327 = vmatpush.msrb.mxu2 %v2605_v5  ;;  %1347 = vmatpush.msrb.mxu3 %v2608_v51 }
 0x4f1   :  { %1367 = vmatpush.msra.mxu1 %v2611_v6  ;;  %1387 = vmatpush.msra.mxu0 %v2614_v8 }
 0x4f2   :  { %1328 = vmatpush.msrb.mxu2 %v2617_v48  ;;  %1348 = vmatpush.msrb.mxu3 %v2620_v19 }
 0x4f3   :  { %1368 = vmatpush.msra.mxu1 %v2623_v21  ;;  %1388 = vmatpush.msra.mxu0 %v2626_v22 }
 0x4f4   :  { %1329 = vmatpush.msrb.mxu2 %v2629_v7  ;;  %1349 = vmatpush.msrb.mxu3 %v2632_v1 }
 0x4f5   :  { %1369 = vmatpush.msra.mxu1 %v2635_v24  ;;  %1389 = vmatpush.msra.mxu0 %v2638_v25 }
 0x4f6   :  { %1330 = vmatpush.msrb.mxu2 %v2641_v26  ;;  %1350 = vmatpush.msrb.mxu3 %v2644_v27 }
 0x4f7   :  { %1370 = vmatpush.msra.mxu1 %v2647_v28  ;;  %1390 = vmatpush.msra.mxu0 %v2650_v29 }
 0x4f8   :  { %1331 = vmatpush.msrb.mxu2 %v2653_v30  ;;  %1351 = vmatpush.msrb.mxu3 %v3157_v31 }
 0x4f9   :  { %1371 = vmatpush.msra.mxu1 %v3158_v57  ;;  %1391 = vmatpush.msra.mxu0 %v3159_v42 }
 0x4fa   :  { %1332 = vmatpush.msrb.mxu2 %v3160_v20  ;;  %1352 = vmatpush.msrb.mxu3 %v3161_v13 }
 0x4fb   :  { %1372 = vmatpush.msra.mxu1 %v3162_v59  ;;  %1392 = vmatpush.msra.mxu0 %v3163_v50 }
 0x4fc   :  { %1333 = vmatpush.msrb.mxu2 %v3164_v34  ;;  %1353 = vmatpush.msrb.mxu3 %v3165_v35 }
 0x4fd   :  { %1373 = vmatpush.msra.mxu1 %v3166_v46  ;;  %1393 = vmatpush.msra.mxu0 %v3167_v53 }
 0x4fe   :  { %1334 = vmatpush.msrb.mxu2 %v3168_v54  ;;  %1354 = vmatpush.msrb.mxu3 %v3169_v33 }
 0x4ff   :  { %1374 = vmatpush.msra.mxu1 %v2767_v36  ;;  %1394 = vmatpush.msra.mxu0 %v2770_v37  ;;  %v3186_v37 = vld [vmem:[#allocation51_spill] sm:$0xff] }
 0x500   :  { %1335 = vmatpush.msrb.mxu2 %v2773_v39  ;;  %1355 = vmatpush.msrb.mxu3 %v2776_v44 }
 0x501   :  { %1375 = vmatpush.msra.mxu1 %v2779_v47  ;;  %1395 = vmatpush.msra.mxu0 %v2782_v49 }
 0x502   :  { %1336 = vmatpush.msrb.mxu2 %v2785_v16  ;;  %1356 = vmatpush.msrb.mxu3 %v2788_v45  ;;  %v2806_v45 = vld [vmem:[#allocation10 + $0x18] sm:$0xff]  ;;  %v3184_v16 = vld [vmem:[#allocation39_spill] sm:$0xff] }
 0x503   :  { %1376 = vmatpush.msra.mxu1 %v2791_v55  ;;  %1396 = vmatpush.msra.mxu0 %v2794_v58  ;;  %3183 = vst [vmem:[#allocation43_spill] sm:$0xff] %v2806_v45 }
 0x504   :  { %1337 = vmatpush.msrb.mxu2 %v2797_v14  ;;  %1357 = vmatpush.msrb.mxu3 %v2800_v23  ;;  %v3185_v14 = vld [vmem:[#allocation50_spill] sm:$0xff] }
 0x505   :  { %1377 = vmatpush.msra.mxu1 %v2803_v32  ;;  %1397 = vmatpush.msra.mxu0 %v2806_v45 }
 0x562   :  { %v1105_v55 = vpop.f32.mrf.mxu0 }
 0x563   :  { %v1111_v49 = vadd.f32 %v1105_v55, %v3184_v16  ;;  %v3187_v16 = vld [vmem:[#allocation58_spill] sm:$0xff] }
 0x565   :  { %v1652_v58 = vmul.f32 -1.442695, %v1111_v49  ;;  %v1085_v49 = vpop.f32.mrf.mxu1 }
 0x567   :  { %1738 = vpow2.f32 %v1652_v58  ;;  %v1045_v47 = vpop.f32.mrf.mxu2  ;;  %v1065_v44 = vpop.f32.mrf.mxu3 }
 0x568   :  { %v1108_v39 = vadd.f32 %v1045_v47, %v3185_v14  ;;  %v1109_v36 = vadd.f32 %v1065_v44, %v3186_v37  ;;  %v1110_v47 = vadd.f32 %v1085_v49, %v3187_v16 }
 0x56a   :  { %v1650_v23 = vmul.f32 -1.442695, %v1108_v39  ;;  %v1651_v33 = vmul.f32 -1.442695, %v1109_v36 }
 0x56c   :  { %1740 = vpow2.f32 %v1650_v23 }
 0x56d   :  { %v1739_v54 = vpop.eup %1738  ;;  %1742 = vpow2.f32 %v1651_v33 }
 0x56e   :  { %v1154_v32 = vadd.f32 1.0, %v1739_v54 }
 0x570   :  { %1744 = vrcp.f32 %v1154_v32  ;;  %vm1160_vm10 = vweird.f32 %v1154_v32 }
 0x572   :  { %v1741_v53 = vpop.eup %1740 }
 0x573   :  { %v1743_v46 = vpop.eup %1742  ;;  %v1115_v45 = vadd.f32 1.0, %v1741_v53 }
 0x574   :  { %v1134_v35 = vadd.f32 1.0, %v1743_v46 }
 0x575   :  { %1746 = vrcp.f32 %v1115_v45  ;;  %v1127_v33 = vand.u32 2147483648, %v1115_v45  ;;  %v1125_v53 = vand.u32 2147483647, %v1115_v45  ;;  %vm1121_vm3 = vweird.f32 %v1115_v45 }
 0x576   :  { %1748 = vrcp.f32 %v1134_v35  ;;  %v1745_v55 = vpop.eup %1744  ;;  %v1146_v34 = vand.u32 2147483648, %v1134_v35  ;;  %v1144_v50 = vand.u32 2147483647, %v1134_v35  ;;  %vm1140_vm5 = vweird.f32 %v1134_v35 }
 0x577   :  { %v1156_v36 = vmul.f32 %v1745_v55, %v1154_v32  ;;  %1750 = vtanh.f32 %v1110_v47  ;;  %v1128_v49 = vor.u32 1.1754944e-38, %v1127_v33  ;;  %vm1126_vm6 = vcmp.eq.f32.partialorder %v1125_v53, 8.507059e+37 }
 0x578   :  { %v1147_v47 = vor.u32 1.1754944e-38, %v1146_v34  ;;  %vm1145_vm8 = vcmp.eq.f32.partialorder %v1144_v50, 8.507059e+37  ;;  %vm1161_vm9 = vweird.f32 %v1745_v55 }
 0x579   :  { %v1157_v59 = vsub.f32 1.0, %v1156_v36  ;;  %vm1162_vm11 = vmor %vm1160_vm10, %vm1161_vm9 }
 0x57b   :  { %v1747_v58 = vpop.eup %1746  ;;  %v1158_v57 = vmul.f32 %v1745_v55, %v1157_v59 }
 0x57c   :  { %v1749_v14 = vpop.eup %1748  ;;  %v1117_v44 = vmul.f32 %v1747_v58, %v1115_v45  ;;  %vm1122_vm1 = vweird.f32 %v1747_v58  ;;  %v1166_v45 = vand.u32 2147483648, %v1154_v32 }
 0x57d   :  { %v1136_v39 = vmul.f32 %v1749_v14, %v1134_v35  ;;  %vm1141_vm2 = vweird.f32 %v1749_v14  ;;  %vm1123_vm4 = vmor %vm1121_vm3, %vm1122_vm1 }
 0x57e   :  { %v1118_v23 = vsub.f32 1.0, %v1117_v44  ;;  %vm1142_vm7 = vmor %vm1140_vm5, %vm1141_vm2  ;;  %v1751_v44 = vpop.eup %1750  ;;  %v1167_v35 = vor.u32 1.1754944e-38, %v1166_v45 }
 0x57f   :  { %v1137_v54 = vsub.f32 1.0, %v1136_v39 }
 0x580   :  { %v1119_v37 = vmul.f32 %v1747_v58, %v1118_v23 }
 0x581   :  { %v1138_v46 = vmul.f32 %v1749_v14, %v1137_v54 }
 0x582   :  { %v1120_v13 = vadd.f32 %v1747_v58, %v1119_v37  ;;  %v1159_v37 = vadd.f32 %v1745_v55, %v1158_v57 }
 0x583   :  { %v1139_v16 = vadd.f32 %v1749_v14, %v1138_v46  ;;  %v3218_v46 = vld [vmem:[#allocation58_spill] sm:$0xff] }
 0x584   :  { %v1124_v20 = vsel %vm1123_vm4, %v1747_v58, %v1120_v13  ;;  %v1164_v13 = vand.u32 2147483647, %v1154_v32  ;;  %v1163_v34 = vsel %vm1162_vm11, %v1745_v55, %v1159_v37 }
 0x585   :  { %v1129_v39 = vsel %vm1126_vm6, %v1128_v49, %v1124_v20  ;;  %v1143_v23 = vsel %vm1142_vm7, %v1749_v14, %v1139_v16 }
 0x586   :  { %v1148_v42 = vsel %vm1145_vm8, %v1147_v47, %v1143_v23  ;;  %v1171_v54 = vmul.f32 %v1751_v44, %v1129_v39  ;;  %vm1165_vm12 = vcmp.eq.f32.partialorder %v1164_v13, 8.507059e+37 }
 0x587   :  { %v1170_v31 = vmul.f32 %v1148_v42, %v2714_v41  ;;  %v1168_v50 = vsel %vm1165_vm12, %v1167_v35, %v1163_v34 }
 0x589   :  { %v2814_v36 = vadd.f32 %v1171_v54, %v1170_v31 }
 0x58b   :  { %1752 = vtanh.f32 %v2814_v36 }
 0x591   :  { %v1753_v20 = vpop.eup %1752 }
 0x592   :  { %v1174_v16 = vmul.f32 %v1753_v20, %v1168_v50 }
 0x594   :  { %1191 = vmatmul.f32.vlgmr.msra.gmra.mxu2 %v1174_v16  ;;  %1211 = vmatmul.f32.vlgmr.msra.gmra.mxu3 %v1174_v16 }
 0x595   :  { %1231 = vmatmul.f32.vlgmr.msrb.gmra.mxu1 %v1174_v16  ;;  %1251 = vmatmul.f32.vlgmr.msrb.gmra.mxu0 %v1174_v16 }
 0x596   :  { %1469 = vmatpush.msra.mxu2 %v2545_v12  ;;  %1489 = vmatpush.msra.mxu3 %v2548_v60  ;;  %v3188_v12 = vld [vmem:[#allocation16_spill] sm:$0xff]  ;;  %v3189_v60 = vld [vmem:[#allocation17_spill] sm:$0xff] }
 0x597   :  { %1509 = vmatpush.msrb.mxu1 %v2551_v62  ;;  %1529 = vmatpush.msrb.mxu0 %v2554_v63  ;;  %v3190_v62 = vld [vmem:[#allocation18_spill] sm:$0xff]  ;;  %v3191_v63 = vld [vmem:[#allocation19_spill] sm:$0xff] }
 0x598   :  { %1470 = vmatpush.msra.mxu2 %v2557_v10  ;;  %1490 = vmatpush.msra.mxu3 %v2560_v38  ;;  %v3192_v10 = vld [vmem:[#allocation20_spill] sm:$0xff]  ;;  %v3193_v38 = vld [vmem:[#allocation21_spill] sm:$0xff] }
 0x599   :  { %1510 = vmatpush.msrb.mxu1 %v2563_v40  ;;  %1530 = vmatpush.msrb.mxu0 %v2566_v43  ;;  %v3194_v40 = vld [vmem:[#allocation22_spill] sm:$0xff]  ;;  %v3195_v43 = vld [vmem:[#allocation23_spill] sm:$0xff] }
 0x59a   :  { %1471 = vmatpush.msra.mxu2 %v2569_v61  ;;  %1491 = vmatpush.msra.mxu3 %v2572_v11  ;;  %v3196_v61 = vld [vmem:[#allocation24_spill] sm:$0xff]  ;;  %v3197_v11 = vld [vmem:[#allocation26_spill] sm:$0xff] }
 0x59b   :  { %1511 = vmatpush.msrb.mxu1 %v2575_v0  ;;  %1531 = vmatpush.msrb.mxu0 %v2578_v3  ;;  %v3198_v0 = vld [vmem:[#allocation27_spill] sm:$0xff]  ;;  %v3199_v3 = vld [vmem:[#allocation28_spill] sm:$0xff] }
 0x59c   :  { %1472 = vmatpush.msra.mxu2 %v2581_v9  ;;  %1492 = vmatpush.msra.mxu3 %v2584_v52  ;;  %v3200_v9 = vld [vmem:[#allocation25_spill] sm:$0xff] }
 0x59d   :  { %1512 = vmatpush.msrb.mxu1 %v2587_v15  ;;  %1532 = vmatpush.msrb.mxu0 %v2590_v17  ;;  %v3201_v52 = vld [vmem:[#allocation29_spill] sm:$0xff]  ;;  %v3202_v15 = vld [vmem:[#allocation30_spill] sm:$0xff]  ;;  %v3203_v17 = vld [vmem:[#allocation31_spill] sm:$0xff] }
 0x59e   :  { %1473 = vmatpush.msra.mxu2 %v2593_v18  ;;  %1493 = vmatpush.msra.mxu3 %v2596_v56  ;;  %v3204_v18 = vld [vmem:[#allocation32_spill] sm:$0xff]  ;;  %v3205_v56 = vld [vmem:[#allocation33_spill] sm:$0xff] }
 0x59f   :  { %1513 = vmatpush.msrb.mxu1 %v2599_v4  ;;  %1533 = vmatpush.msrb.mxu0 %v2602_v2  ;;  %v3206_v4 = vld [vmem:[#allocation34_spill] sm:$0xff]  ;;  %v3207_v2 = vld [vmem:[#allocation35_spill] sm:$0xff] }
 0x5a0   :  { %1474 = vmatpush.msra.mxu2 %v2605_v5  ;;  %1494 = vmatpush.msra.mxu3 %v2608_v51  ;;  %v3208_v5 = vld [vmem:[#allocation36_spill] sm:$0xff]  ;;  %v3209_v51 = vld [vmem:[#allocation37_spill] sm:$0xff] }
 0x5a1   :  { %1514 = vmatpush.msrb.mxu1 %v2611_v6  ;;  %1534 = vmatpush.msrb.mxu0 %v2614_v8  ;;  %v3210_v6 = vld [vmem:[#allocation38_spill] sm:$0xff]  ;;  %v3211_v8 = vld [vmem:[#allocation40_spill] sm:$0xff] }
 0x5a2   :  { %1475 = vmatpush.msra.mxu2 %v2617_v48  ;;  %1495 = vmatpush.msra.mxu3 %v2620_v19  ;;  %v3212_v48 = vld [vmem:[#allocation41_spill] sm:$0xff]  ;;  %v3213_v19 = vld [vmem:[#allocation42_spill] sm:$0xff] }
 0x5a3   :  { %1515 = vmatpush.msrb.mxu1 %v2623_v21  ;;  %1535 = vmatpush.msrb.mxu0 %v2626_v22  ;;  %v3214_v21 = vld [vmem:[#allocation43_spill] sm:$0xff] }
 0x5a4   :  { %1476 = vmatpush.msra.mxu2 %v2629_v7  ;;  %1496 = vmatpush.msra.mxu3 %v2632_v1  ;;  %v3215_v7 = vld [vmem:[#allocation39_spill] sm:$0xff] }
 0x5a5   :  { %1516 = vmatpush.msrb.mxu1 %v2635_v24  ;;  %1536 = vmatpush.msrb.mxu0 %v2638_v25 }
 0x5a6   :  { %1477 = vmatpush.msra.mxu2 %v2641_v26  ;;  %1497 = vmatpush.msra.mxu3 %v2644_v27  ;;  %v3216_v27 = vld [vmem:[#allocation50_spill] sm:$0xff] }
 0x5a7   :  { %1517 = vmatpush.msrb.mxu1 %v2647_v28  ;;  %1537 = vmatpush.msrb.mxu0 %v2650_v29  ;;  %v3217_v29 = vld [vmem:[#allocation51_spill] sm:$0xff] }
 0x5a8   :  { %1478 = vmatpush.msra.mxu2 %v2653_v30  ;;  %1498 = vmatpush.msra.mxu3 %v3188_v12 }
 0x5a9   :  { %1518 = vmatpush.msrb.mxu1 %v3189_v60  ;;  %1538 = vmatpush.msrb.mxu0 %v3190_v62 }
 0x5aa   :  { %1479 = vmatpush.msra.mxu2 %v3191_v63  ;;  %1499 = vmatpush.msra.mxu3 %v3192_v10 }
 0x5ab   :  { %1519 = vmatpush.msrb.mxu1 %v3193_v38  ;;  %1539 = vmatpush.msrb.mxu0 %v3194_v40 }
 0x5ac   :  { %1480 = vmatpush.msra.mxu2 %v3195_v43  ;;  %1500 = vmatpush.msra.mxu3 %v3196_v61 }
 0x5ad   :  { %1520 = vmatpush.msrb.mxu1 %v3197_v11  ;;  %1540 = vmatpush.msrb.mxu0 %v3198_v0 }
 0x5ae   :  { %1481 = vmatpush.msra.mxu2 %v3199_v3  ;;  %1501 = vmatpush.msra.mxu3 %v3200_v9 }
 0x5af   :  { %1521 = vmatpush.msrb.mxu1 %v3201_v52  ;;  %1541 = vmatpush.msrb.mxu0 %v3202_v15 }
 0x5b0   :  { %1482 = vmatpush.msra.mxu2 %v3203_v17  ;;  %1502 = vmatpush.msra.mxu3 %v3204_v18 }
 0x5b1   :  { %1522 = vmatpush.msrb.mxu1 %v3205_v56  ;;  %1542 = vmatpush.msrb.mxu0 %v3206_v4 }
 0x5b2   :  { %1483 = vmatpush.msra.mxu2 %v3207_v2  ;;  %1503 = vmatpush.msra.mxu3 %v3208_v5 }
 0x5b3   :  { %1523 = vmatpush.msrb.mxu1 %v3209_v51  ;;  %1543 = vmatpush.msrb.mxu0 %v3210_v6 }
 0x5b4   :  { %1484 = vmatpush.msra.mxu2 %v3211_v8  ;;  %1504 = vmatpush.msra.mxu3 %v3212_v48 }
 0x5b5   :  { %1524 = vmatpush.msrb.mxu1 %v3213_v19  ;;  %1544 = vmatpush.msrb.mxu0 %v3214_v21 }
 0x612   :  { %v1252_v22 = vpop.f32.mrf.mxu0  ;;  %v1232_v58 = vpop.f32.mrf.mxu1 }
 0x613   :  { %v1258_v1 = vadd.f32 %v1252_v22, %v3215_v7  ;;  %v1257_v49 = vadd.f32 %v1232_v58, %v3218_v46 }
 0x615   :  { %v1655_v24 = vmul.f32 -1.442695, %v1258_v1 }
 0x617   :  { %1754 = vpow2.f32 %v1655_v24  ;;  %v1192_v25 = vpop.f32.mrf.mxu2  ;;  %v1212_v26 = vpop.f32.mrf.mxu3 }
 0x618   :  { %v1255_v28 = vadd.f32 %v1192_v25, %v3216_v27  ;;  %v1256_v30 = vadd.f32 %v1212_v26, %v3217_v29 }
 0x61a   :  { %v1653_v41 = vmul.f32 -1.442695, %v1255_v28  ;;  %v1654_v31 = vmul.f32 -1.442695, %v1256_v30 }
 0x61c   :  { %1756 = vpow2.f32 %v1653_v41 }
 0x61d   :  { %v1755_v57 = vpop.eup %1754  ;;  %1758 = vpow2.f32 %v1654_v31 }
 0x61e   :  { %v1301_v42 = vadd.f32 1.0, %v1755_v57 }
 0x620   :  { %1760 = vrcp.f32 %v1301_v42  ;;  %v1313_v15 = vand.u32 2147483648, %v1301_v42  ;;  %vm1307_vm6 = vweird.f32 %v1301_v42  ;;  %v1311_v17 = vand.u32 2147483647, %v1301_v42 }
 0x622   :  { %v1757_v59 = vpop.eup %1756  ;;  %v1314_v56 = vor.u32 1.1754944e-38, %v1313_v15  ;;  %vm1312_vm8 = vcmp.eq.f32.partialorder %v1311_v17, 8.507059e+37 }
 0x623   :  { %v1759_v14 = vpop.eup %1758  ;;  %v1262_v32 = vadd.f32 1.0, %v1757_v59 }
 0x624   :  { %v1281_v55 = vadd.f32 1.0, %v1759_v14 }
 0x625   :  { %1762 = vrcp.f32 %v1262_v32  ;;  %v1274_v37 = vand.u32 2147483648, %v1262_v32  ;;  %v1272_v34 = vand.u32 2147483647, %v1262_v32  ;;  %vm1268_vm15 = vweird.f32 %v1262_v32 }
 0x626   :  { %1764 = vrcp.f32 %v1281_v55  ;;  %v1761_v33 = vpop.eup %1760  ;;  %v1293_v35 = vand.u32 2147483648, %v1281_v55  ;;  %v1291_v50 = vand.u32 2147483647, %v1281_v55  ;;  %vm1287_vm1 = vweird.f32 %v1281_v55 }
 0x627   :  { %v1303_v23 = vmul.f32 %v1761_v33, %v1301_v42  ;;  %1766 = vtanh.f32 %v1257_v49  ;;  %v1275_v60 = vor.u32 1.1754944e-38, %v1274_v37  ;;  %vm1273_vm2 = vcmp.eq.f32.partialorder %v1272_v34, 8.507059e+37 }
 0x628   :  { %v1294_v10 = vor.u32 1.1754944e-38, %v1293_v35  ;;  %vm1292_vm4 = vcmp.eq.f32.partialorder %v1291_v50, 8.507059e+37  ;;  %vm1308_vm5 = vweird.f32 %v1761_v33 }
 0x629   :  { %v1304_v16 = vsub.f32 1.0, %v1303_v23  ;;  %vm1309_vm7 = vmor %vm1307_vm6, %vm1308_vm5 }
 0x62b   :  { %v1763_v53 = vpop.eup %1762  ;;  %v1305_v11 = vmul.f32 %v1761_v33, %v1304_v16 }
 0x62c   :  { %v1765_v47 = vpop.eup %1764  ;;  %v1264_v44 = vmul.f32 %v1763_v53, %v1262_v32  ;;  %vm1269_vm13 = vweird.f32 %v1763_v53 }
 0x62d   :  { %v1283_v39 = vmul.f32 %v1765_v47, %v1281_v55  ;;  %vm1288_vm14 = vweird.f32 %v1765_v47  ;;  %vm1270_vm0 = vmor %vm1268_vm15, %vm1269_vm13  ;;  %v1767_v38 = vpop.eup %1766  ;;  %v1306_v52 = vadd.f32 %v1761_v33, %v1305_v11 }
 0x62e   :  { %v1265_v54 = vsub.f32 1.0, %v1264_v44  ;;  %vm1289_vm3 = vmor %vm1287_vm1, %vm1288_vm14 }
 0x62f   :  { %v1284_v45 = vsub.f32 1.0, %v1283_v39  ;;  %v1310_v18 = vsel %vm1309_vm7, %v1761_v33, %v1306_v52 }
 0x630   :  { %v1266_v13 = vmul.f32 %v1763_v53, %v1265_v54  ;;  %v1315_v2 = vsel %vm1312_vm8, %v1314_v56, %v1310_v18 }
 0x631   :  { %v1285_v20 = vmul.f32 %v1765_v47, %v1284_v45 }
 0x632   :  { %v1267_v12 = vadd.f32 %v1763_v53, %v1266_v13 }
 0x633   :  { %v1286_v62 = vadd.f32 %v1765_v47, %v1285_v20 }
 0x634   :  { %v1271_v63 = vsel %vm1270_vm0, %v1763_v53, %v1267_v12 }
 0x635   :  { %v1276_v40 = vsel %vm1273_vm2, %v1275_v60, %v1271_v63  ;;  %v1290_v43 = vsel %vm1289_vm3, %v1765_v47, %v1286_v62 }
 0x636   :  { %v1295_v61 = vsel %vm1292_vm4, %v1294_v10, %v1290_v43  ;;  %v1318_v0 = vmul.f32 %v1767_v38, %v1276_v40 }
 0x637   :  { %v1317_v3 = vmul.f32 %v1295_v61, %v2814_v36 }
 0x639   :  { %v2886_v9 = vadd.f32 %v1318_v0, %v1317_v3 }
 0x63b   :  { %1768 = vtanh.f32 %v2886_v9 }
 0x641   :  { %v1769_v4 = vpop.eup %1768 }
 0x642   :  { %v1321_v5 = vmul.f32 %v1769_v4, %v1315_v2 }
 0x644   :  { %1338 = vmatmul.f32.vlgmr.msrb.gmra.mxu2 %v1321_v5  ;;  %1358 = vmatmul.f32.vlgmr.msrb.gmra.mxu3 %v1321_v5 }
 0x645   :  { %1378 = vmatmul.f32.vlgmr.msra.gmra.mxu1 %v1321_v5  ;;  %1398 = vmatmul.f32.vlgmr.msra.gmra.mxu0 %v1321_v5 }
 0x6c2   :  { %v1399_v36 = vpop.f32.mrf.mxu0  ;;  %v1379_v31 = vpop.f32.mrf.mxu1 }
 0x6c3   :  { %v1405_v51 = vadd.f32 %v1399_v36, %v3215_v7  ;;  %v1404_v59 = vadd.f32 %v1379_v31, %v3218_v46 }
 0x6c5   :  { %v1658_v6 = vmul.f32 -1.442695, %v1405_v51 }
 0x6c7   :  { %1770 = vpow2.f32 %v1658_v6  ;;  %v1339_v8 = vpop.f32.mrf.mxu2  ;;  %v1359_v48 = vpop.f32.mrf.mxu3 }
 0x6c8   :  { %v1402_v19 = vadd.f32 %v1339_v8, %v3216_v27  ;;  %v1403_v21 = vadd.f32 %v1359_v48, %v3217_v29 }
 0x6ca   :  { %v1656_v22 = vmul.f32 -1.442695, %v1402_v19  ;;  %v1657_v1 = vmul.f32 -1.442695, %v1403_v21 }
 0x6cc   :  { %1772 = vpow2.f32 %v1656_v22 }
 0x6cd   :  { %v1771_v24 = vpop.eup %1770  ;;  %1774 = vpow2.f32 %v1657_v1 }
 0x6ce   :  { %v1448_v25 = vadd.f32 1.0, %v1771_v24 }
 0x6d0   :  { %1776 = vrcp.f32 %v1448_v25  ;;  %v1460_v43 = vand.u32 2147483648, %v1448_v25  ;;  %vm1454_vm2 = vweird.f32 %v1448_v25  ;;  %v1458_v61 = vand.u32 2147483647, %v1448_v25 }
 0x6d2   :  { %v1773_v26 = vpop.eup %1772  ;;  %v1461_v0 = vor.u32 1.1754944e-38, %v1460_v43  ;;  %vm1459_vm4 = vcmp.eq.f32.partialorder %v1458_v61, 8.507059e+37 }
 0x6d3   :  { %v1775_v28 = vpop.eup %1774  ;;  %v1409_v30 = vadd.f32 1.0, %v1773_v26 }
 0x6d4   :  { %v1428_v41 = vadd.f32 1.0, %v1775_v28 }
 0x6d5   :  { %1778 = vrcp.f32 %v1409_v30  ;;  %v1421_v53 = vand.u32 2147483648, %v1409_v30  ;;  %v1419_v44 = vand.u32 2147483647, %v1409_v30  ;;  %vm1415_vm11 = vweird.f32 %v1409_v30 }
 0x6d6   :  { %1780 = vrcp.f32 %v1428_v41  ;;  %v1777_v57 = vpop.eup %1776  ;;  %v1440_v39 = vand.u32 2147483648, %v1428_v41  ;;  %v1438_v54 = vand.u32 2147483647, %v1428_v41  ;;  %vm1434_vm13 = vweird.f32 %v1428_v41 }
 0x6d7   :  { %v1450_v58 = vmul.f32 %v1777_v57, %v1448_v25  ;;  %1782 = vtanh.f32 %v1404_v59  ;;  %v1422_v13 = vor.u32 1.1754944e-38, %v1421_v53  ;;  %vm1420_vm14 = vcmp.eq.f32.partialorder %v1419_v44, 8.507059e+37 }
 0x6d8   :  { %v1441_v20 = vor.u32 1.1754944e-38, %v1440_v39  ;;  %vm1439_vm0 = vcmp.eq.f32.partialorder %v1438_v54, 8.507059e+37  ;;  %vm1455_vm1 = vweird.f32 %v1777_v57 }
 0x6d9   :  { %v1451_v37 = vsub.f32 1.0, %v1450_v58  ;;  %vm1456_vm3 = vmor %vm1454_vm2, %vm1455_vm1 }
 0x6db   :  { %v1779_v42 = vpop.eup %1778  ;;  %v1452_v62 = vmul.f32 %v1777_v57, %v1451_v37 }
 0x6dc   :  { %v1781_v14 = vpop.eup %1780  ;;  %v1411_v32 = vmul.f32 %v1779_v42, %v1409_v30  ;;  %vm1416_vm9 = vweird.f32 %v1779_v42 }
 0x6dd   :  { %v1430_v55 = vmul.f32 %v1781_v14, %v1428_v41  ;;  %vm1435_vm10 = vweird.f32 %v1781_v14  ;;  %vm1417_vm12 = vmor %vm1415_vm11, %vm1416_vm9  ;;  %v1783_v50 = vpop.eup %1782  ;;  %v1453_v40 = vadd.f32 %v1777_v57, %v1452_v62 }
 0x6de   :  { %v1412_v33 = vsub.f32 1.0, %v1411_v32  ;;  %vm1436_vm15 = vmor %vm1434_vm13, %vm1435_vm10 }
 0x6df   :  { %v1431_v49 = vsub.f32 1.0, %v1430_v55  ;;  %v1457_v11 = vsel %vm1456_vm3, %v1777_v57, %v1453_v40 }
 0x6e0   :  { %v1413_v47 = vmul.f32 %v1779_v42, %v1412_v33  ;;  %v1462_v52 = vsel %vm1459_vm4, %v1461_v0, %v1457_v11 }
 0x6e1   :  { %v1432_v23 = vmul.f32 %v1781_v14, %v1431_v49 }
 0x6e2   :  { %v1414_v45 = vadd.f32 %v1779_v42, %v1413_v47 }
 0x6e3   :  { %v1433_v34 = vadd.f32 %v1781_v14, %v1432_v23 }
 0x6e4   :  { %v1418_v35 = vsel %vm1417_vm12, %v1779_v42, %v1414_v45 }
 0x6e5   :  { %v1423_v16 = vsel %vm1420_vm14, %v1422_v13, %v1418_v35  ;;  %v1437_v12 = vsel %vm1436_vm15, %v1781_v14, %v1433_v34 }
 0x6e6   :  { %v1442_v60 = vsel %vm1439_vm0, %v1441_v20, %v1437_v12  ;;  %v1465_v63 = vmul.f32 %v1783_v50, %v1423_v16 }
 0x6e7   :  { %v1464_v10 = vmul.f32 %v1442_v60, %v2886_v9 }
 0x6e9   :  { %v2894_v38 = vadd.f32 %v1465_v63, %v1464_v10  ;;  %v1866_v63 = vld [vmem:[#allocation2] sm:$0xff] }
 0x6eb   :  { %1784 = vtanh.f32 %v2894_v38 }
 0x6f1   :  { %v1785_v3 = vpop.eup %1784 }
 0x6f2   :  { %v1468_v15 = vmul.f32 %v1785_v3, %v1462_v52 }
 0x6f4   :  { %1485 = vmatmul.f32.vlgmr.msra.gmra.mxu2 %v1468_v15  ;;  %1505 = vmatmul.f32.vlgmr.msra.gmra.mxu3 %v1468_v15 }
 0x6f5   :  { %1525 = vmatmul.f32.vlgmr.msrb.gmra.mxu1 %v1468_v15  ;;  %1545 = vmatmul.f32.vlgmr.msrb.gmra.mxu0 %v1468_v15 }
 0x772   :  { %v1546_v9 = vpop.f32.mrf.mxu0 }
 0x773   :  { %v1552_v17 = vadd.f32 %v1546_v9, %v3215_v7  ;;  %v1526_v7 = vpop.f32.mrf.mxu1 }
 0x775   :  { %v1661_v18 = vmul.f32 -1.442695, %v1552_v17 }
 0x777   :  { %1786 = vpow2.f32 %v1661_v18  ;;  %v1486_v56 = vpop.f32.mrf.mxu2  ;;  %v1506_v4 = vpop.f32.mrf.mxu3 }
 0x778   :  { %v1549_v2 = vadd.f32 %v1486_v56, %v3216_v27  ;;  %v1550_v5 = vadd.f32 %v1506_v4, %v3217_v29  ;;  %v1551_v27 = vadd.f32 %v1526_v7, %v3218_v46 }
 0x77a   :  { %v1659_v36 = vmul.f32 -1.442695, %v1549_v2  ;;  %v1660_v51 = vmul.f32 -1.442695, %v1550_v5 }
 0x77c   :  { %1788 = vpow2.f32 %v1659_v36 }
 0x77d   :  { %v1787_v6 = vpop.eup %1786  ;;  %1790 = vpow2.f32 %v1660_v51 }
 0x77e   :  { %v1595_v8 = vadd.f32 1.0, %v1787_v6 }
 0x780   :  { %1792 = vrcp.f32 %v1595_v8  ;;  %v1607_v35 = vand.u32 2147483648, %v1595_v8  ;;  %vm1601_vm14 = vweird.f32 %v1595_v8  ;;  %v1605_v20 = vand.u32 2147483647, %v1595_v8 }
 0x782   :  { %v1789_v48 = vpop.eup %1788  ;;  %v1608_v16 = vor.u32 1.1754944e-38, %v1607_v35  ;;  %vm1606_vm0 = vcmp.eq.f32.partialorder %v1605_v20, 8.507059e+37 }
 0x783   :  { %v1791_v19 = vpop.eup %1790  ;;  %v1556_v21 = vadd.f32 1.0, %v1789_v48 }
 0x784   :  { %v1575_v22 = vadd.f32 1.0, %v1791_v19 }
 0x785   :  { %1794 = vrcp.f32 %v1556_v21  ;;  %v1568_v41 = vand.u32 2147483648, %v1556_v21  ;;  %v1566_v42 = vand.u32 2147483647, %v1556_v21  ;;  %vm1562_vm7 = vweird.f32 %v1556_v21 }
 0x786   :  { %1796 = vrcp.f32 %v1575_v22  ;;  %v1793_v1 = vpop.eup %1792  ;;  %v1587_v59 = vand.u32 2147483648, %v1575_v22  ;;  %v1585_v32 = vand.u32 2147483647, %v1575_v22  ;;  %vm1581_vm9 = vweird.f32 %v1575_v22 }
 0x787   :  { %v1597_v28 = vmul.f32 %v1793_v1, %v1595_v8  ;;  %1798 = vtanh.f32 %v1551_v27  ;;  %v1569_v46 = vor.u32 1.1754944e-38, %v1568_v41  ;;  %vm1567_vm10 = vcmp.eq.f32.partialorder %v1566_v42, 8.507059e+37 }
 0x788   :  { %v1588_v49 = vor.u32 1.1754944e-38, %v1587_v59  ;;  %vm1586_vm12 = vcmp.eq.f32.partialorder %v1585_v32, 8.507059e+37  ;;  %vm1602_vm13 = vweird.f32 %v1793_v1 }
 0x789   :  { %v1598_v55 = vsub.f32 1.0, %v1597_v28  ;;  %vm1603_vm15 = vmor %vm1601_vm14, %vm1602_vm13 }
 0x78b   :  { %v1795_v24 = vpop.eup %1794  ;;  %v1599_v54 = vmul.f32 %v1793_v1, %v1598_v55 }
 0x78c   :  { %v1797_v25 = vpop.eup %1796  ;;  %v1558_v29 = vmul.f32 %v1795_v24, %v1556_v21  ;;  %vm1563_vm5 = vweird.f32 %v1795_v24 }
 0x78d   :  { %v1577_v26 = vmul.f32 %v1797_v25, %v1575_v22  ;;  %vm1582_vm6 = vweird.f32 %v1797_v25  ;;  %vm1564_vm8 = vmor %vm1562_vm7, %vm1563_vm5  ;;  %v1799_v47 = vpop.eup %1798  ;;  %v1600_v34 = vadd.f32 %v1793_v1, %v1599_v54 }
 0x78e   :  { %v1559_v30 = vsub.f32 1.0, %v1558_v29  ;;  %vm1583_vm11 = vmor %vm1581_vm9, %vm1582_vm6 }
 0x78f   :  { %v1578_v31 = vsub.f32 1.0, %v1577_v26  ;;  %v1604_v50 = vsel %vm1603_vm15, %v1793_v1, %v1600_v34 }
 0x790   :  { %v1560_v57 = vmul.f32 %v1795_v24, %v1559_v30  ;;  %v1609_v60 = vsel %vm1606_vm0, %v1608_v16, %v1604_v50 }
 0x791   :  { %v1579_v14 = vmul.f32 %v1797_v25, %v1578_v31 }
 0x792   :  { %v1561_v58 = vadd.f32 %v1795_v24, %v1560_v57 }
 0x793   :  { %v1580_v33 = vadd.f32 %v1797_v25, %v1579_v14 }
 0x794   :  { %v1565_v53 = vsel %vm1564_vm8, %v1795_v24, %v1561_v58 }
 0x795   :  { %v1584_v44 = vsel %vm1583_vm11, %v1797_v25, %v1580_v33  ;;  %v1570_v39 = vsel %vm1567_vm10, %v1569_v46, %v1565_v53 }
 0x796   :  { %v1589_v23 = vsel %vm1586_vm12, %v1588_v49, %v1584_v44  ;;  %v1612_v37 = vmul.f32 %v1799_v47, %v1570_v39 }
 0x797   :  { %v1611_v45 = vmul.f32 %v1589_v23, %v2894_v38 }
 0x799   :  { %v1613_v13 = vadd.f32 %v1612_v37, %v1611_v45 }
 0x79b   :  { %1800 = vtanh.f32 %v1613_v13 }
 0x7a1   :  { %v1801_v12 = vpop.eup %1800 }
 0x7a2   :  { %v1615_v62 = vmul.f32 %v1801_v12, %v1609_v60 }
 0x7a4   :  { %v1616_v10 = vadd.f32 %v1866_v63, %v1615_v62 }
 0x7a6   :  { %1617 = vst [vmem:[#allocation11] sm:$0xff] %v1616_v10 }
 0x7a7   :  { %1628 = dma.vmem_to_hbm [thread:$0]  %s1624_s21, 128, %s1626_s24, [#allocation4]  }
 0x7a8   :  { %2017 = dma.done.wait [#allocation4], 128  }
 0x7a9   :  { %2018 = vsyncadd [#allocation4], 4294967168 }
 0x7aa   :  { %1633 = vsyncpa [#allocation3], 1 }
 0x7ab   :  { %1634 = vsyncpa [#allocation6], 1 }
 0x7ac   :  { %1635 = vsyncpa [#allocation9], 1 }
 0x7ad   :  { %1636 = vsyncpa [#allocation4], 1 }

// kernel: tpu_custom_call.1
= control target key start
LH: loop header
LB: loop body
LE: loop exit
PB: predicated region body
PF: predicated region fallthrough
CT: control target
= control target key end

     0   :  { %11 = vsyncpa [#allocation3], 0  ;;  %s2905_s0 = inlined_call_operand.hbm [shape: f32[8,128], index: 0, kind: input, shape index: {}]   ;;  %s2906_s1 = inlined_call_operand.hbm [shape: f32[8,128], index: 1, kind: input, shape index: {}]   ;;  %s2907_s2 = inlined_call_operand.hbm [shape: f32[128,512], index: 2, kind: input, shape index: {}]   ;;  %s2908_s3 = inlined_call_operand.hbm [shape: f32[128,512], index: 3, kind: input, shape index: {}]   ;;  %s2909_s4 = inlined_call_operand.hbm [shape: f32[128,512], index: 4, kind: input, shape index: {}]   ;;  %s2910_s5 = inlined_call_operand.vmem [shape: f32[1,512], index: 5, kind: input, shape index: {}]   ;;  %s2911_s6 = inlined_call_operand.hbm [shape: f32[8,128], index: 6, kind: output, shape index: {}]  }
   0x1   :  { %12 = vsyncpa [#allocation6], 0 }
   0x2   :  { %13 = vsyncpa [#allocation9], 0  ;;  %s31_s23 = sshll.u32 %s2906_s1, 4  ;;  %s32_s23 = int_to_ptr.hbm [resolvable:$true] %s31_s23 }
   0x3   :  { %14 = vsyncpa [#allocation4], 0  ;;  %s2019_s24 = smov [#allocation5]   ;;  %s54_s28 = sshll.u32 %s2908_s3, 4  ;;  %s55_s28 = int_to_ptr.hbm [resolvable:$true] %s54_s28 }
   0x4   :  { %s33_s25 = sshll.u32 %s2019_s24, 4  ;;  %s2020_s29 = smov [#allocation8]   ;;  %s34_s25 = int_to_ptr.vmem [resolvable:$true] %s33_s25 }
   0x5   :  { %36 = dma.hbm_to_vmem [thread:$0]  %s32_s23, 128, %s34_s25, [#allocation6]  }
   0x6   :  { %s56_s30 = sshll.u32 %s2020_s29, 4  ;;  %s20_s9 = sshll.u32 %s2905_s0, 4  ;;  %s57_s30 = int_to_ptr.vmem [resolvable:$true] %s56_s30  ;;  %s21_s9 = int_to_ptr.hbm [resolvable:$true] %s20_s9 }
   0x7   :  { %s2021_s1 = smov 512   ;;  %s2022_s10 = smov 32  }
   0x8   :  { %62 = dma.hbm_to_vmem [thread:$0]  %s55_s28, 8192, %s57_s30, [#allocation9], %s2021_s1, %s2021_s1, %s2022_s10  }
   0x9   :  { %s41_s13 = sshll.u32 %s2907_s2, 4  ;;  %s2023_s14 = smov [#allocation2]   ;;  %s42_s13 = int_to_ptr.hbm [resolvable:$true] %s41_s13 }
   0xa   :  { %s22_s15 = sshll.u32 %s2023_s14, 4  ;;  %s2024_s3 = smov [#allocation7]   ;;  %s23_s15 = int_to_ptr.vmem [resolvable:$true] %s22_s15 }
   0xb   :  { %25 = dma.hbm_to_vmem [thread:$0]  %s21_s9, 128, %s23_s15, [#allocation3]  }
   0xc   :  { %s43_s16 = sshll.u32 %s2024_s3, 4  ;;  %s67_s0 = sshll.u32 %s2909_s4, 4  ;;  %s44_s16 = int_to_ptr.vmem [resolvable:$true] %s43_s16  ;;  %s68_s0 = int_to_ptr.hbm [resolvable:$true] %s67_s0 }
   0xd   :  { %49 = dma.hbm_to_vmem [thread:$0]  %s42_s13, 8192, %s44_s16, [#allocation6], %s2021_s1, %s2021_s1, %s2022_s10  }
   0xe   :  { %s2025_s19 = smov [#allocation10]  }
   0xf   :  { %s69_s20 = sshll.u32 %s2025_s19, 4  ;;  %s70_s20 = int_to_ptr.vmem [resolvable:$true] %s69_s20 }
  0x10   :  { %75 = dma.hbm_to_vmem [thread:$0]  %s68_s0, 8192, %s70_s20, [#allocation9], %s2021_s1, %s2021_s1, %s2022_s10  }
  0x11   :  { %2011 = dma.done.wait [#allocation3], 128  }
  0x12   :  { %2012 = vsyncadd [#allocation3], 4294967168 }
  0x13   :  { %2013 = dma.done.wait [#allocation6], 8320  }
  0x14   :  { %2014 = vsyncadd [#allocation6], 4294958976 }
  0x15   :  { %2015 = dma.done.wait [#allocation9], 16384  }
  0x16   :  { %2016 = vsyncadd [#allocation9], 4294950912  ;;  %v99_v0 = vld [vmem:[#allocation5] sm:$0xff]  ;;  %v2077_v1 = vld [vmem:[#allocation2] sm:$0xff]  ;;  %vm121_vm0 = vcmask 64512   ;;  %s1625_s24 = sshll.u32 %s2911_s6, 4  ;;  %s1626_s24 = int_to_ptr.hbm [resolvable:$true] %s1625_s24 }
  0x17   :  { %116 = vmatpush.xpose.msra.mxu0 %v99_v0  ;;  %154 = vmatpush.msra.mxu1 %v99_v0  ;;  %v283_v9 = vld [vmem:[#allocation8 + $0x1e0] sm:$0xff]  ;;  %v284_v10 = vld [vmem:[#allocation8 + $0x1e8] sm:$0xff]  ;;  %v285_v11 = vld [vmem:[#allocation8 + $0x1f0] sm:$0xff] }
  0x18   :  { %287 = vmatpush.msra.mxu2 %v283_v9  ;;  %307 = vmatpush.msra.mxu3 %v284_v10  ;;  %v286_v12 = vld [vmem:[#allocation8 + $0x1f8] sm:$0xff]  ;;  %v279_v13 = vld [vmem:[#allocation8 + $0x1c0] sm:$0xff]  ;;  %v280_v14 = vld [vmem:[#allocation8 + $0x1c8] sm:$0xff] }
  0x19   :  { %327 = vmatpush.msrb.mxu1 %v285_v11  ;;  %v281_v15 = vld [vmem:[#allocation8 + $0x1d0] sm:$0xff]  ;;  %v282_v16 = vld [vmem:[#allocation8 + $0x1d8] sm:$0xff]  ;;  %v275_v17 = vld [vmem:[#allocation8 + $0x1a0] sm:$0xff] }
  0x1a   :  { %117 = vmatmul.f32.vlgmr.msra.gmra.mxu0 %v2077_v1  ;;  %288 = vmatpush.msra.mxu2 %v279_v13  ;;  %v276_v18 = vld [vmem:[#allocation8 + $0x1a8] sm:$0xff]  ;;  %v277_v19 = vld [vmem:[#allocation8 + $0x1b0] sm:$0xff]  ;;  %v278_v20 = vld [vmem:[#allocation8 + $0x1b8] sm:$0xff] }
  0x1b   :  { %347 = vmatpush.msrb.mxu0 %v286_v12  ;;  %308 = vmatpush.msra.mxu3 %v280_v14  ;;  %v271_v21 = vld [vmem:[#allocation8 + $0x180] sm:$0xff]  ;;  %v272_v22 = vld [vmem:[#allocation8 + $0x188] sm:$0xff]  ;;  %v273_v23 = vld [vmem:[#allocation8 + $0x190] sm:$0xff] }
  0x1c   :  { %328 = vmatpush.msrb.mxu1 %v281_v15  ;;  %289 = vmatpush.msra.mxu2 %v275_v17  ;;  %v274_v24 = vld [vmem:[#allocation8 + $0x198] sm:$0xff]  ;;  %v267_v25 = vld [vmem:[#allocation8 + $0x160] sm:$0xff]  ;;  %v268_v26 = vld [vmem:[#allocation8 + $0x168] sm:$0xff] }
  0x1d   :  { %348 = vmatpush.msrb.mxu0 %v282_v16  ;;  %309 = vmatpush.msra.mxu3 %v276_v18  ;;  %v269_v27 = vld [vmem:[#allocation8 + $0x170] sm:$0xff]  ;;  %v270_v28 = vld [vmem:[#allocation8 + $0x178] sm:$0xff]  ;;  %v263_v29 = vld [vmem:[#allocation8 + $0x140] sm:$0xff] }
  0x1e   :  { %329 = vmatpush.msrb.mxu1 %v277_v19  ;;  %290 = vmatpush.msra.mxu2 %v271_v21  ;;  %v264_v30 = vld [vmem:[#allocation8 + $0x148] sm:$0xff]  ;;  %v265_v31 = vld [vmem:[#allocation8 + $0x150] sm:$0xff]  ;;  %v266_v32 = vld [vmem:[#allocation8 + $0x158] sm:$0xff] }
  0x1f   :  { %349 = vmatpush.msrb.mxu0 %v278_v20  ;;  %310 = vmatpush.msra.mxu3 %v272_v22  ;;  %v259_v33 = vld [vmem:[#allocation8 + $0x120] sm:$0xff]  ;;  %v260_v34 = vld [vmem:[#allocation8 + $0x128] sm:$0xff]  ;;  %v261_v35 = vld [vmem:[#allocation8 + $0x130] sm:$0xff] }
  0x20   :  { %330 = vmatpush.msrb.mxu1 %v273_v23  ;;  %291 = vmatpush.msra.mxu2 %v267_v25  ;;  %v262_v36 = vld [vmem:[#allocation8 + $0x138] sm:$0xff]  ;;  %v255_v37 = vld [vmem:[#allocation8 + $0x100] sm:$0xff]  ;;  %v256_v38 = vld [vmem:[#allocation8 + $0x108] sm:$0xff] }
  0x21   :  { %350 = vmatpush.msrb.mxu0 %v274_v24  ;;  %311 = vmatpush.msra.mxu3 %v268_v26  ;;  %v257_v39 = vld [vmem:[#allocation8 + $0x110] sm:$0xff]  ;;  %v258_v40 = vld [vmem:[#allocation8 + $0x118] sm:$0xff]  ;;  %v251_v41 = vld [vmem:[#allocation8 + $0xe0] sm:$0xff] }
  0x22   :  { %331 = vmatpush.msrb.mxu1 %v269_v27  ;;  %292 = vmatpush.msra.mxu2 %v263_v29  ;;  %v252_v42 = vld [vmem:[#allocation8 + $0xe8] sm:$0xff]  ;;  %v253_v43 = vld [vmem:[#allocation8 + $0xf0] sm:$0xff]  ;;  %v254_v44 = vld [vmem:[#allocation8 + $0xf8] sm:$0xff] }
  0x23   :  { %351 = vmatpush.msrb.mxu0 %v270_v28  ;;  %312 = vmatpush.msra.mxu3 %v264_v30  ;;  %v247_v46 = vld [vmem:[#allocation8 + $0xc0] sm:$0xff]  ;;  %v248_v47 = vld [vmem:[#allocation8 + $0xc8] sm:$0xff]  ;;  %v249_v48 = vld [vmem:[#allocation8 + $0xd0] sm:$0xff] }
  0x24   :  { %332 = vmatpush.msrb.mxu1 %v265_v31  ;;  %293 = vmatpush.msra.mxu2 %v259_v33  ;;  %v250_v49 = vld [vmem:[#allocation8 + $0xd8] sm:$0xff]  ;;  %v243_v50 = vld [vmem:[#allocation8 + $0xa0] sm:$0xff]  ;;  %v244_v51 = vld [vmem:[#allocation8 + $0xa8] sm:$0xff] }
  0x25   :  { %352 = vmatpush.msrb.mxu0 %v266_v32  ;;  %313 = vmatpush.msra.mxu3 %v260_v34  ;;  %v245_v52 = vld [vmem:[#allocation8 + $0xb0] sm:$0xff]  ;;  %v246_v53 = vld [vmem:[#allocation8 + $0xb8] sm:$0xff]  ;;  %v239_v54 = vld [vmem:[#allocation8 + $0x80] sm:$0xff] }
  0x26   :  { %333 = vmatpush.msrb.mxu1 %v261_v35  ;;  %294 = vmatpush.msra.mxu2 %v255_v37  ;;  %v240_v55 = vld [vmem:[#allocation8 + $0x88] sm:$0xff]  ;;  %v241_v56 = vld [vmem:[#allocation8 + $0x90] sm:$0xff]  ;;  %v242_v57 = vld [vmem:[#allocation8 + $0x98] sm:$0xff] }
  0x27   :  { %353 = vmatpush.msrb.mxu0 %v262_v36  ;;  %314 = vmatpush.msra.mxu3 %v256_v38  ;;  %v235_v58 = vld [vmem:[#allocation8 + $0x60] sm:$0xff]  ;;  %v236_v59 = vld [vmem:[#allocation8 + $0x68] sm:$0xff]  ;;  %v237_v61 = vld [vmem:[#allocation8 + $0x70] sm:$0xff] }
  0x28   :  { %334 = vmatpush.msrb.mxu1 %v257_v39  ;;  %295 = vmatpush.msra.mxu2 %v251_v41  ;;  %v238_v62 = vld [vmem:[#allocation8 + $0x78] sm:$0xff]  ;;  %v231_v0 = vld [vmem:[#allocation8 + $0x40] sm:$0xff]  ;;  %v229_v9 = vld [vmem:[#allocation8 + $0x30] sm:$0xff] }
  0x29   :  { %354 = vmatpush.msrb.mxu0 %v258_v40  ;;  %315 = vmatpush.msra.mxu3 %v252_v42  ;;  %v230_v10 = vld [vmem:[#allocation8 + $0x38] sm:$0xff]  ;;  %v223_v12 = vld [vmem:[#allocation8] sm:$0xff]  ;;  %v224_v13 = vld [vmem:[#allocation8 + $0x8] sm:$0xff] }
  0x2a   :  { %335 = vmatpush.msrb.mxu1 %v253_v43  ;;  %296 = vmatpush.msra.mxu2 %v247_v46  ;;  %v226_v14 = vld [vmem:[#allocation8 + $0x18] sm:$0xff]  ;;  %v225_v16 = vld [vmem:[#allocation8 + $0x10] sm:$0xff]  ;;  %v219_v17 = vld [vmem:[#allocation7 + $0x1e0] sm:$0xff] }
  0x2b   :  { %355 = vmatpush.msrb.mxu0 %v254_v44  ;;  %316 = vmatpush.msra.mxu3 %v248_v47  ;;  %v220_v18 = vld [vmem:[#allocation7 + $0x1e8] sm:$0xff]  ;;  %v221_v19 = vld [vmem:[#allocation7 + $0x1f0] sm:$0xff]  ;;  %v222_v20 = vld [vmem:[#allocation7 + $0x1f8] sm:$0xff] }
  0x2c   :  { %336 = vmatpush.msrb.mxu1 %v249_v48  ;;  %297 = vmatpush.msra.mxu2 %v243_v50  ;;  %v215_v21 = vld [vmem:[#allocation7 + $0x1c0] sm:$0xff]  ;;  %v216_v22 = vld [vmem:[#allocation7 + $0x1c8] sm:$0xff]  ;;  %v217_v23 = vld [vmem:[#allocation7 + $0x1d0] sm:$0xff] }
  0x2d   :  { %356 = vmatpush.msrb.mxu0 %v250_v49  ;;  %317 = vmatpush.msra.mxu3 %v244_v51  ;;  %v211_v24 = vld [vmem:[#allocation7 + $0x1a0] sm:$0xff]  ;;  %v212_v25 = vld [vmem:[#allocation7 + $0x1a8] sm:$0xff]  ;;  %v213_v26 = vld [vmem:[#allocation7 + $0x1b0] sm:$0xff] }
  0x2e   :  { %337 = vmatpush.msrb.mxu1 %v245_v52  ;;  %298 = vmatpush.msra.mxu2 %v239_v54  ;;  %v214_v27 = vld [vmem:[#allocation7 + $0x1b8] sm:$0xff]  ;;  %v207_v28 = vld [vmem:[#allocation7 + $0x180] sm:$0xff]  ;;  %v208_v29 = vld [vmem:[#allocation7 + $0x188] sm:$0xff] }
  0x2f   :  { %357 = vmatpush.msrb.mxu0 %v246_v53  ;;  %318 = vmatpush.msra.mxu3 %v240_v55  ;;  %v209_v30 = vld [vmem:[#allocation7 + $0x190] sm:$0xff]  ;;  %v210_v31 = vld [vmem:[#allocation7 + $0x198] sm:$0xff]  ;;  %v203_v32 = vld [vmem:[#allocation7 + $0x160] sm:$0xff] }
  0x30   :  { %338 = vmatpush.msrb.mxu1 %v241_v56  ;;  %299 = vmatpush.msra.mxu2 %v235_v58  ;;  %v204_v33 = vld [vmem:[#allocation7 + $0x168] sm:$0xff]  ;;  %v205_v34 = vld [vmem:[#allocation7 + $0x170] sm:$0xff]  ;;  %v206_v35 = vld [vmem:[#allocation7 + $0x178] sm:$0xff] }
  0x31   :  { %358 = vmatpush.msrb.mxu0 %v242_v57  ;;  %319 = vmatpush.msra.mxu3 %v236_v59  ;;  %v199_v36 = vld [vmem:[#allocation7 + $0x140] sm:$0xff]  ;;  %v200_v37 = vld [vmem:[#allocation7 + $0x148] sm:$0xff]  ;;  %v201_v38 = vld [vmem:[#allocation7 + $0x150] sm:$0xff] }
  0x32   :  { %339 = vmatpush.msrb.mxu1 %v237_v61  ;;  %300 = vmatpush.msra.mxu2 %v231_v0  ;;  %v202_v39 = vld [vmem:[#allocation7 + $0x158] sm:$0xff]  ;;  %v195_v40 = vld [vmem:[#allocation7 + $0x120] sm:$0xff]  ;;  %v196_v41 = vld [vmem:[#allocation7 + $0x128] sm:$0xff] }
  0x33   :  { %359 = vmatpush.msrb.mxu0 %v238_v62  ;;  %v197_v42 = vld [vmem:[#allocation7 + $0x130] sm:$0xff]  ;;  %v198_v43 = vld [vmem:[#allocation7 + $0x138] sm:$0xff]  ;;  %v191_v44 = vld [vmem:[#allocation7 + $0x100] sm:$0xff] }
  0x34   :  { %v193_v46 = vld [vmem:[#allocation7 + $0x110] sm:$0xff]  ;;  %v194_v47 = vld [vmem:[#allocation7 + $0x118] sm:$0xff]  ;;  %v187_v48 = vld [vmem:[#allocation7 + $0xe0] sm:$0xff] }
  0x35   :  { %v188_v49 = vld [vmem:[#allocation7 + $0xe8] sm:$0xff]  ;;  %v189_v50 = vld [vmem:[#allocation7 + $0xf0] sm:$0xff]  ;;  %v190_v51 = vld [vmem:[#allocation7 + $0xf8] sm:$0xff] }
  0x36   :  { %v183_v52 = vld [vmem:[#allocation7 + $0xc0] sm:$0xff]  ;;  %v184_v53 = vld [vmem:[#allocation7 + $0xc8] sm:$0xff]  ;;  %v185_v54 = vld [vmem:[#allocation7 + $0xd0] sm:$0xff] }
  0x37   :  { %v186_v55 = vld [vmem:[#allocation7 + $0xd8] sm:$0xff]  ;;  %v179_v56 = vld [vmem:[#allocation7 + $0xa0] sm:$0xff]  ;;  %v180_v57 = vld [vmem:[#allocation7 + $0xa8] sm:$0xff] }
  0x38   :  { %v181_v58 = vld [vmem:[#allocation7 + $0xb0] sm:$0xff]  ;;  %v182_v59 = vld [vmem:[#allocation7 + $0xb8] sm:$0xff]  ;;  %v176_v61 = vld [vmem:[#allocation7 + $0x88] sm:$0xff] }
  0x39   :  { %v177_v62 = vld [vmem:[#allocation7 + $0x90] sm:$0xff]  ;;  %v171_v0 = vld [vmem:[#allocation7 + $0x60] sm:$0xff] }
  0x97   :  { %v118_v2 = vpop.f32.mrf.mxu0 }
  0x98   :  { %v122_v3 = vsel %vm121_vm0, %v118_v2, -inf }
  0x99   :  { %123 = vmax.xlane.f32.xlu0 %v122_v3  ;;  %v233_v3 = vld [vmem:[#allocation8 + $0x50] sm:$0xff] }
  0x9a   :  { %340 = vmatpush.msrb.mxu1 %v233_v3  ;;  %v173_v3 = vld [vmem:[#allocation7 + $0x70] sm:$0xff] }
  0x9c   :  { %341 = vmatpush.msrb.mxu1 %v229_v9  ;;  %v170_v9 = vld [vmem:[#allocation7 + $0x58] sm:$0xff] }
  0x9e   :  { %342 = vmatpush.msrb.mxu1 %v225_v16  ;;  %v161_v16 = vld [vmem:[#allocation7 + $0x10] sm:$0xff] }
 0x10c   :  { %v124_v4 = vpop.xlane.xlu0 %123 }
 0x10d   :  { %v125_v5 = vsub.f32 %v118_v2, %v124_v4  ;;  %v232_v2 = vld [vmem:[#allocation8 + $0x48] sm:$0xff]  ;;  %v234_v4 = vld [vmem:[#allocation8 + $0x58] sm:$0xff] }
 0x10e   :  { %320 = vmatpush.msra.mxu3 %v232_v2  ;;  %360 = vmatpush.msrb.mxu0 %v234_v4  ;;  %v172_v2 = vld [vmem:[#allocation7 + $0x68] sm:$0xff]  ;;  %v174_v4 = vld [vmem:[#allocation7 + $0x78] sm:$0xff] }
 0x10f   :  { %v126_v6 = vmul.f32 1.442695, %v125_v5 }
 0x110   :  { %361 = vmatpush.msrb.mxu0 %v230_v10  ;;  %v163_v10 = vld [vmem:[#allocation7 + $0x20] sm:$0xff] }
 0x111   :  { %1670 = vpow2.f32 %v126_v6  ;;  %v227_v6 = vld [vmem:[#allocation8 + $0x20] sm:$0xff] }
 0x112   :  { %301 = vmatpush.msra.mxu2 %v227_v6  ;;  %362 = vmatpush.msrb.mxu0 %v226_v14  ;;  %v168_v6 = vld [vmem:[#allocation7 + $0x48] sm:$0xff]  ;;  %v159_v14 = vld [vmem:[#allocation7] sm:$0xff] }
 0x114   :  { %302 = vmatpush.msra.mxu2 %v223_v12  ;;  %427 = vmatpush.msra.mxu0 %v222_v20  ;;  %v165_v12 = vld [vmem:[#allocation7 + $0x30] sm:$0xff]  ;;  %v2093_v20 = vld [vmem:[#allocation10 + $0x1e8] sm:$0xff] }
 0x115   :  { %3043 = vst [vmem:[#allocation16_spill] sm:$0xff] %v2093_v20 }
 0x116   :  { %367 = vmatpush.msrb.mxu2 %v219_v17  ;;  %v162_v17 = vld [vmem:[#allocation7 + $0x18] sm:$0xff] }
 0x117   :  { %v2081_v7 = vpop.eup %1670 }
 0x118   :  { %v128_v8 = vsel %vm121_vm0, %v2081_v7, 0.0  ;;  %368 = vmatpush.msrb.mxu2 %v215_v21  ;;  %v2095_v21 = vld [vmem:[#allocation10 + $0x1f0] sm:$0xff] }
 0x119   :  { %129 = vadd.xlane.f32.xlu0 %v128_v8  ;;  %v228_v8 = vld [vmem:[#allocation8 + $0x28] sm:$0xff] }
 0x11a   :  { %321 = vmatpush.msra.mxu3 %v228_v8  ;;  %369 = vmatpush.msrb.mxu2 %v211_v24  ;;  %v169_v8 = vld [vmem:[#allocation7 + $0x50] sm:$0xff]  ;;  %v2109_v24 = vld [vmem:[#allocation10 + $0x1d8] sm:$0xff] }
 0x11c   :  { %322 = vmatpush.msra.mxu3 %v224_v13  ;;  %370 = vmatpush.msrb.mxu2 %v207_v28  ;;  %v166_v13 = vld [vmem:[#allocation7 + $0x38] sm:$0xff] }
 0x11d   :  { %v2119_v28 = vld [vmem:[#allocation10 + $0x1b8] sm:$0xff] }
 0x11e   :  { %387 = vmatpush.msrb.mxu3 %v220_v18  ;;  %371 = vmatpush.msrb.mxu2 %v203_v32  ;;  %v2131_v32 = vld [vmem:[#allocation10 + $0x198] sm:$0xff] }
 0x11f   :  { %3045 = vst [vmem:[#allocation18_spill] sm:$0xff] %v2131_v32 }
 0x120   :  { %388 = vmatpush.msrb.mxu3 %v216_v22  ;;  %372 = vmatpush.msrb.mxu2 %v199_v36  ;;  %v2099_v22 = vld [vmem:[#allocation10 + $0x1f8] sm:$0xff] }
 0x121   :  { %v2143_v36 = vld [vmem:[#allocation10 + $0x178] sm:$0xff] }
 0x122   :  { %389 = vmatpush.msrb.mxu3 %v212_v25  ;;  %373 = vmatpush.msrb.mxu2 %v195_v40  ;;  %v2111_v25 = vld [vmem:[#allocation10 + $0x1a0] sm:$0xff]  ;;  %v2155_v40 = vld [vmem:[#allocation10 + $0x158] sm:$0xff] }
 0x123   :  { %3047 = vst [vmem:[#allocation20_spill] sm:$0xff] %v2155_v40 }
 0x124   :  { %390 = vmatpush.msrb.mxu3 %v208_v29  ;;  %374 = vmatpush.msrb.mxu2 %v191_v44  ;;  %v2123_v29 = vld [vmem:[#allocation10 + $0x180] sm:$0xff]  ;;  %v2165_v44 = vld [vmem:[#allocation10 + $0x130] sm:$0xff] }
 0x126   :  { %391 = vmatpush.msrb.mxu3 %v204_v33  ;;  %375 = vmatpush.msrb.mxu2 %v187_v48  ;;  %v2135_v33 = vld [vmem:[#allocation10 + $0x160] sm:$0xff]  ;;  %v2177_v48 = vld [vmem:[#allocation10 + $0x110] sm:$0xff] }
 0x127   :  { %3050 = vst [vmem:[#allocation23_spill] sm:$0xff] %v2177_v48 }
 0x128   :  { %392 = vmatpush.msrb.mxu3 %v200_v37  ;;  %376 = vmatpush.msrb.mxu2 %v183_v52  ;;  %v2147_v37 = vld [vmem:[#allocation10 + $0x140] sm:$0xff]  ;;  %v2190_v52 = vld [vmem:[%s2910_s5] sm:$0xf]  ;;  %s2026_s5 = smov [#allocation11]  }
 0x129   :  { %s1623_s21 = sshll.u32 %s2026_s5, 4  ;;  %s1624_s21 = int_to_ptr.vmem [resolvable:$true] %s1623_s21 }
 0x12a   :  { %393 = vmatpush.msrb.mxu3 %v196_v41  ;;  %377 = vmatpush.msrb.mxu2 %v179_v56  ;;  %v2159_v41 = vld [vmem:[#allocation10 + $0x120] sm:$0xff] }
 0x18c   :  { %v130_v45 = vpop.xlane.xlu0 %129 }
 0x18d   :  { %1672 = vrcp.f32 %v130_v45 }
 0x193   :  { %v1673_v60 = vpop.eup %1672 }
 0x194   :  { %v132_v63 = vmul.f32 %v1673_v60, %v130_v45  ;;  %v192_v45 = vld [vmem:[#allocation7 + $0x108] sm:$0xff] }
 0x195   :  { %394 = vmatpush.msrb.mxu3 %v192_v45  ;;  %v2167_v45 = vld [vmem:[#allocation10 + $0x138] sm:$0xff] }
 0x196   :  { %v133_v5 = vsub.f32 2.0, %v132_v63  ;;  %v178_v63 = vld [vmem:[#allocation7 + $0x98] sm:$0xff]  ;;  %3049 = vst [vmem:[#allocation22_spill] sm:$0xff] %v2167_v45 }
 0x197   :  { %395 = vmatpush.msrb.mxu3 %v188_v49  ;;  %v2179_v49 = vld [vmem:[#allocation10 + $0x118] sm:$0xff] }
 0x198   :  { %v134_v11 = vmul.f32 %v1673_v60, %v133_v5  ;;  %v175_v60 = vld [vmem:[#allocation7 + $0x80] sm:$0xff]  ;;  %3051 = vst [vmem:[#allocation24_spill] sm:$0xff] %v2179_v49 }
 0x199   :  { %396 = vmatpush.msrb.mxu3 %v184_v53  ;;  %378 = vmatpush.msrb.mxu2 %v175_v60  ;;  %v167_v5 = vld [vmem:[#allocation7 + $0x40] sm:$0xff]  ;;  %v2194_v53 = vld [vmem:[#allocation10 + $0xf0] sm:$0xff]  ;;  %v2208_v60 = vld [vmem:[#allocation10 + $0xd8] sm:$0xff] }
 0x19a   :  { %v135_v15 = vmul.f32 %v2081_v7, %v134_v11  ;;  %v218_v7 = vld [vmem:[#allocation7 + $0x1d8] sm:$0xff]  ;;  %v164_v11 = vld [vmem:[#allocation7 + $0x28] sm:$0xff]  ;;  %3057 = vst [vmem:[#allocation30_spill] sm:$0xff] %v2208_v60 }
 0x19b   :  { %428 = vmatpush.msra.mxu0 %v218_v7  ;;  %397 = vmatpush.msrb.mxu3 %v180_v57  ;;  %v2103_v7 = vld [vmem:[#allocation10 + $0x1c8] sm:$0xff]  ;;  %v2200_v57 = vld [vmem:[#allocation10 + $0xc0] sm:$0xff] }
 0x19c   :  { %1637 = vmatmul.msk.f32.vlgmr.msra.gmra.mxu1 %vm121_vm0, %v135_v15  ;;  %379 = vmatpush.msrb.mxu2 %v171_v0  ;;  %v160_v15 = vld [vmem:[#allocation7 + $0x8] sm:$0xff]  ;;  %3054 = vst [vmem:[#allocation27_spill] sm:$0xff] %v2200_v57 }
 0x19d   :  { %407 = vmatpush.msra.mxu1 %v221_v19  ;;  %429 = vmatpush.msra.mxu0 %v214_v27  ;;  %v2091_v19 = vld [vmem:[#allocation10 + $0x1e0] sm:$0xff]  ;;  %v2117_v27 = vld [vmem:[#allocation10 + $0x1b0] sm:$0xff] }
 0x19e   :  { %398 = vmatpush.msrb.mxu3 %v176_v61  ;;  %380 = vmatpush.msrb.mxu2 %v167_v5  ;;  %v451_v61 = vperm.slane %v2190_v52, 3  ;;  %v2225_v5 = vld [vmem:[#allocation10 + $0x80] sm:$0xff] }
 0x19f   :  { %408 = vmatpush.msra.mxu1 %v217_v23  ;;  %430 = vmatpush.msra.mxu0 %v210_v31  ;;  %v2101_v23 = vld [vmem:[#allocation10 + $0x1c0] sm:$0xff]  ;;  %v2129_v31 = vld [vmem:[#allocation10 + $0x190] sm:$0xff]  ;;  %3062 = vst [vmem:[#allocation35_spill] sm:$0xff] %v2225_v5 }
 0x1a0   :  { %399 = vmatpush.msrb.mxu3 %v172_v2  ;;  %381 = vmatpush.msrb.mxu2 %v163_v10  ;;  %3044 = vst [vmem:[#allocation17_spill] sm:$0xff] %v2101_v23  ;;  %v2219_v2 = vld [vmem:[#allocation10 + $0xb0] sm:$0xff] }
 0x1a1   :  { %409 = vmatpush.msra.mxu1 %v213_v26  ;;  %431 = vmatpush.msra.mxu0 %v206_v35  ;;  %v2115_v26 = vld [vmem:[#allocation10 + $0x1a8] sm:$0xff]  ;;  %v2141_v35 = vld [vmem:[#allocation10 + $0x170] sm:$0xff]  ;;  %3060 = vst [vmem:[#allocation33_spill] sm:$0xff] %v2219_v2 }
 0x1a2   :  { %400 = vmatpush.msrb.mxu3 %v168_v6  ;;  %382 = vmatpush.msrb.mxu2 %v159_v14  ;;  %v2227_v6 = vld [vmem:[#allocation10 + $0x88] sm:$0xff]  ;;  %v449_v14 = vperm.slane %v2190_v52, 1 }
 0x1a3   :  { %410 = vmatpush.msra.mxu1 %v209_v30  ;;  %432 = vmatpush.msra.mxu0 %v202_v39  ;;  %v2125_v30 = vld [vmem:[#allocation10 + $0x188] sm:$0xff]  ;;  %v2153_v39 = vld [vmem:[#allocation10 + $0x150] sm:$0xff]  ;;  %3063 = vst [vmem:[#allocation36_spill] sm:$0xff] %v2227_v6 }
 0x1a4   :  { %401 = vmatpush.msrb.mxu3 %v164_v11  ;;  %v2239_v11 = vld [vmem:[#allocation10 + $0x60] sm:$0xff] }
 0x1a5   :  { %411 = vmatpush.msra.mxu1 %v205_v34  ;;  %433 = vmatpush.msra.mxu0 %v198_v43  ;;  %v2137_v34 = vld [vmem:[#allocation10 + $0x168] sm:$0xff]  ;;  %3067 = vst [vmem:[#allocation40_spill] sm:$0xff] %v2239_v11 }
 0x1a6   :  { %402 = vmatpush.msrb.mxu3 %v160_v15  ;;  %v2247_v15 = vld [vmem:[#allocation10 + $0x70] sm:$0xff] }
 0x1a7   :  { %412 = vmatpush.msra.mxu1 %v201_v38  ;;  %434 = vmatpush.msra.mxu0 %v194_v47  ;;  %v2149_v38 = vld [vmem:[#allocation10 + $0x148] sm:$0xff]  ;;  %3069 = vst [vmem:[#allocation42_spill] sm:$0xff] %v2247_v15 }
 0x1a8   :  { %3046 = vst [vmem:[#allocation19_spill] sm:$0xff] %v2149_v38  ;;  %v2173_v47 = vld [vmem:[#allocation10 + $0x108] sm:$0xff] }
 0x1a9   :  { %413 = vmatpush.msra.mxu1 %v197_v42  ;;  %435 = vmatpush.msra.mxu0 %v190_v51  ;;  %v2161_v42 = vld [vmem:[#allocation10 + $0x128] sm:$0xff] }
 0x1aa   :  { %3048 = vst [vmem:[#allocation21_spill] sm:$0xff] %v2161_v42  ;;  %v2185_v51 = vld [vmem:[#allocation10 + $0xe8] sm:$0xff] }
 0x1ab   :  { %414 = vmatpush.msra.mxu1 %v193_v46  ;;  %436 = vmatpush.msra.mxu0 %v186_v55  ;;  %v2171_v46 = vld [vmem:[#allocation10 + $0x100] sm:$0xff]  ;;  %3053 = vst [vmem:[#allocation26_spill] sm:$0xff] %v2185_v51 }
 0x1ad   :  { %415 = vmatpush.msra.mxu1 %v189_v50  ;;  %437 = vmatpush.msra.mxu0 %v182_v59  ;;  %v2183_v50 = vld [vmem:[#allocation10 + $0xe0] sm:$0xff]  ;;  %v2206_v59 = vld [vmem:[#allocation10 + $0xd0] sm:$0xff] }
 0x1ae   :  { %3052 = vst [vmem:[#allocation25_spill] sm:$0xff] %v2183_v50 }
 0x1af   :  { %416 = vmatpush.msra.mxu1 %v185_v54  ;;  %438 = vmatpush.msra.mxu0 %v178_v63  ;;  %v2196_v54 = vld [vmem:[#allocation10 + $0xf8] sm:$0xff]  ;;  %3056 = vst [vmem:[#allocation29_spill] sm:$0xff] %v2206_v59  ;;  %v2215_v63 = vld [vmem:[#allocation10 + $0xa8] sm:$0xff] }
 0x1b0   :  { %3059 = vst [vmem:[#allocation32_spill] sm:$0xff] %v2215_v63 }
 0x1b1   :  { %417 = vmatpush.msra.mxu1 %v181_v58  ;;  %439 = vmatpush.msra.mxu0 %v174_v4  ;;  %v2202_v58 = vld [vmem:[#allocation10 + $0xc8] sm:$0xff] }
 0x1b2   :  { %3055 = vst [vmem:[#allocation28_spill] sm:$0xff] %v2202_v58 }
 0x1b3   :  { %418 = vmatpush.msra.mxu1 %v177_v62  ;;  %440 = vmatpush.msra.mxu0 %v170_v9  ;;  %v2213_v62 = vld [vmem:[#allocation10 + $0xa0] sm:$0xff]  ;;  %v2233_v9 = vld [vmem:[#allocation10 + $0x98] sm:$0xff] }
 0x1b4   :  { %3058 = vst [vmem:[#allocation31_spill] sm:$0xff] %v2213_v62 }
 0x1b5   :  { %419 = vmatpush.msra.mxu1 %v173_v3  ;;  %441 = vmatpush.msra.mxu0 %v166_v13  ;;  %v2221_v3 = vld [vmem:[#allocation10 + $0xb8] sm:$0xff]  ;;  %3065 = vst [vmem:[#allocation38_spill] sm:$0xff] %v2233_v9  ;;  %v448_v13 = vperm.slane %v2190_v52, 0 }
 0x1b6   :  { %3061 = vst [vmem:[#allocation34_spill] sm:$0xff] %v2221_v3 }
 0x1b7   :  { %420 = vmatpush.msra.mxu1 %v169_v8  ;;  %442 = vmatpush.msra.mxu0 %v162_v17  ;;  %v2231_v8 = vld [vmem:[#allocation10 + $0x90] sm:$0xff] }
 0x1b8   :  { %3064 = vst [vmem:[#allocation37_spill] sm:$0xff] %v2231_v8 }
 0x1b9   :  { %421 = vmatpush.msra.mxu1 %v165_v12  ;;  %v2241_v12 = vld [vmem:[#allocation10 + $0x68] sm:$0xff] }
 0x1ba   :  { %3068 = vst [vmem:[#allocation41_spill] sm:$0xff] %v2241_v12 }
 0x1bb   :  { %422 = vmatpush.msra.mxu1 %v161_v16  ;;  %v2249_v16 = vld [vmem:[#allocation10 + $0x78] sm:$0xff] }
 0x1bc   :  { %3070 = vst [vmem:[#allocation43_spill] sm:$0xff] %v2249_v16 }
 0x219   :  { %v156_v18 = vpop.f32.mrf.mxu1 }
 0x21a   :  { %303 = vmatmul.f32.vlgmr.msra.gmra.mxu2 %v156_v18  ;;  %323 = vmatmul.f32.vlgmr.msra.gmra.mxu3 %v156_v18 }
 0x21b   :  { %343 = vmatmul.f32.vlgmr.msrb.gmra.mxu1 %v156_v18  ;;  %363 = vmatmul.f32.vlgmr.msrb.gmra.mxu0 %v156_v18 }
 0x21c   :  { %587 = vmatpush.msra.mxu2 %v2091_v19  ;;  %607 = vmatpush.msra.mxu3 %v2093_v20 }
 0x21d   :  { %627 = vmatpush.msrb.mxu1 %v2095_v21  ;;  %647 = vmatpush.msrb.mxu0 %v2099_v22 }
 0x21e   :  { %588 = vmatpush.msra.mxu2 %v2101_v23  ;;  %608 = vmatpush.msra.mxu3 %v2103_v7 }
 0x21f   :  { %648 = vmatpush.msrb.mxu0 %v2109_v24 }
 0x220   :  { %589 = vmatpush.msra.mxu2 %v2111_v25  ;;  %609 = vmatpush.msra.mxu3 %v2115_v26 }
 0x221   :  { %649 = vmatpush.msrb.mxu0 %v2119_v28 }
 0x222   :  { %383 = vmatmul.f32.vlgmr.msrb.gmra.mxu2 %v2077_v1  ;;  %403 = vmatmul.f32.vlgmr.msrb.gmra.mxu3 %v2077_v1 }
 0x223   :  { %423 = vmatmul.f32.vlgmr.msra.gmra.mxu1 %v2077_v1  ;;  %443 = vmatmul.f32.vlgmr.msra.gmra.mxu0 %v2077_v1  ;;  %v2107_v1 = vld [vmem:[#allocation10 + $0x1d0] sm:$0xff] }
 0x224   :  { %628 = vmatpush.msrb.mxu1 %v2107_v1  ;;  %590 = vmatpush.msra.mxu2 %v2123_v29 }
 0x225   :  { %610 = vmatpush.msra.mxu3 %v2125_v30  ;;  %650 = vmatpush.msrb.mxu0 %v2131_v32 }
 0x226   :  { %629 = vmatpush.msrb.mxu1 %v2117_v27  ;;  %591 = vmatpush.msra.mxu2 %v2135_v33 }
 0x227   :  { %611 = vmatpush.msra.mxu3 %v2137_v34  ;;  %651 = vmatpush.msrb.mxu0 %v2143_v36 }
 0x228   :  { %630 = vmatpush.msrb.mxu1 %v2129_v31  ;;  %592 = vmatpush.msra.mxu2 %v2147_v37 }
 0x229   :  { %612 = vmatpush.msra.mxu3 %v2149_v38  ;;  %652 = vmatpush.msrb.mxu0 %v2155_v40 }
 0x22a   :  { %631 = vmatpush.msrb.mxu1 %v2141_v35  ;;  %593 = vmatpush.msra.mxu2 %v2159_v41 }
 0x22b   :  { %613 = vmatpush.msra.mxu3 %v2161_v42  ;;  %653 = vmatpush.msrb.mxu0 %v2167_v45 }
 0x22c   :  { %632 = vmatpush.msrb.mxu1 %v2153_v39  ;;  %594 = vmatpush.msra.mxu2 %v2171_v46 }
 0x22d   :  { %614 = vmatpush.msra.mxu3 %v2173_v47  ;;  %654 = vmatpush.msrb.mxu0 %v2179_v49 }
 0x22e   :  { %633 = vmatpush.msrb.mxu1 %v2165_v44  ;;  %595 = vmatpush.msra.mxu2 %v2183_v50 }
 0x22f   :  { %615 = vmatpush.msra.mxu3 %v2185_v51  ;;  %655 = vmatpush.msrb.mxu0 %v2196_v54 }
 0x230   :  { %634 = vmatpush.msrb.mxu1 %v2177_v48  ;;  %596 = vmatpush.msra.mxu2 %v2200_v57 }
 0x231   :  { %616 = vmatpush.msra.mxu3 %v2202_v58  ;;  %656 = vmatpush.msrb.mxu0 %v2208_v60 }
 0x232   :  { %635 = vmatpush.msrb.mxu1 %v2194_v53  ;;  %597 = vmatpush.msra.mxu2 %v2213_v62 }
 0x233   :  { %617 = vmatpush.msra.mxu3 %v2215_v63  ;;  %657 = vmatpush.msrb.mxu0 %v2221_v3  ;;  %v2262_v3 = vld [vmem:[#allocation10 + $0x58] sm:$0xff] }
 0x234   :  { %636 = vmatpush.msrb.mxu1 %v2206_v59  ;;  %598 = vmatpush.msra.mxu2 %v2225_v5  ;;  %3074 = vst [vmem:[#allocation47_spill] sm:$0xff] %v2262_v3 }
 0x235   :  { %618 = vmatpush.msra.mxu3 %v2227_v6  ;;  %658 = vmatpush.msrb.mxu0 %v2233_v9  ;;  %v2260_v6 = vld [vmem:[#allocation10 + $0x50] sm:$0xff]  ;;  %v2266_v9 = vld [vmem:[#allocation10 + $0x20] sm:$0xff] }
 0x236   :  { %637 = vmatpush.msrb.mxu1 %v2219_v2  ;;  %599 = vmatpush.msra.mxu2 %v2239_v11  ;;  %3073 = vst [vmem:[#allocation46_spill] sm:$0xff] %v2260_v6 }
 0x237   :  { %619 = vmatpush.msra.mxu3 %v2241_v12  ;;  %659 = vmatpush.msrb.mxu0 %v2249_v16  ;;  %3075 = vst [vmem:[#allocation48_spill] sm:$0xff] %v2266_v9  ;;  %v2284_v16 = vld [vmem:[#allocation10 + $0x8] sm:$0xff] }
 0x238   :  { %638 = vmatpush.msrb.mxu1 %v2231_v8  ;;  %v2268_v8 = vld [vmem:[#allocation10 + $0x28] sm:$0xff]  ;;  %3082 = vst [vmem:[#allocation55_spill] sm:$0xff] %v2284_v16 }
 0x239   :  { %3076 = vst [vmem:[#allocation49_spill] sm:$0xff] %v2268_v8  ;;  %660 = vmatpush.msrb.mxu0 %v2262_v3 }
 0x23a   :  { %639 = vmatpush.msrb.mxu1 %v2247_v15 }
 0x23c   :  { %640 = vmatpush.msrb.mxu1 %v2260_v6 }
 0x298   :  { %v364_v43 = vpop.f32.mrf.mxu0 }
 0x29d   :  { %v304_v55 = vpop.f32.mrf.mxu2  ;;  %v324_v56 = vpop.f32.mrf.mxu3 }
 0x2a0   :  { %v444_v0 = vpop.f32.mrf.mxu0 }
 0x2a1   :  { %v445_v4 = vadd.f32 %v444_v0, %v364_v43  ;;  %v2253_v43 = vld [vmem:[#allocation10 + $0x40] sm:$0xff] }
 0x2a2   :  { %3071 = vst [vmem:[#allocation44_spill] sm:$0xff] %v2253_v43  ;;  %600 = vmatpush.msra.mxu2 %v2253_v43 }
 0x2a3   :  { %v2235_v10 = vadd.f32 %v451_v61, %v445_v4  ;;  %v2255_v61 = vld [vmem:[#allocation10 + $0x48] sm:$0xff] }
 0x2a4   :  { %3072 = vst [vmem:[#allocation45_spill] sm:$0xff] %v2255_v61  ;;  %620 = vmatpush.msra.mxu3 %v2255_v61  ;;  %601 = vmatpush.msra.mxu2 %v2266_v9 }
 0x2a5   :  { %3066 = vst [vmem:[#allocation39_spill] sm:$0xff] %v2235_v10  ;;  %v384_v17 = vpop.f32.mrf.mxu2  ;;  %v404_v18 = vpop.f32.mrf.mxu3  ;;  %v1640_v0 = vmul.f32 -1.442695, %v2235_v10 }
 0x2a6   :  { %v385_v4 = vadd.f32 %v384_v17, %v304_v55  ;;  %v405_v5 = vadd.f32 %v404_v18, %v324_v56  ;;  %v2276_v56 = vld [vmem:[#allocation10 + $0x30] sm:$0xff]  ;;  %v2278_v17 = vld [vmem:[#allocation10 + $0x38] sm:$0xff]  ;;  %v2282_v18 = vld [vmem:[#allocation10] sm:$0xff]  ;;  %621 = vmatpush.msra.mxu3 %v2268_v8 }
 0x2a7   :  { %1674 = vpow2.f32 %v1640_v0  ;;  %3079 = vst [vmem:[#allocation52_spill] sm:$0xff] %v2276_v56  ;;  %v2290_v0 = vld [vmem:[#allocation10 + $0x10] sm:$0xff]  ;;  %641 = vmatpush.msrb.mxu1 %v2276_v56  ;;  %661 = vmatpush.msrb.mxu0 %v2278_v17 }
 0x2a8   :  { %v2270_v10 = vadd.f32 %v448_v13, %v385_v4  ;;  %v2272_v55 = vadd.f32 %v449_v14, %v405_v5  ;;  %3080 = vst [vmem:[#allocation53_spill] sm:$0xff] %v2278_v17  ;;  %v344_v13 = vpop.f32.mrf.mxu1  ;;  %v2292_v4 = vld [vmem:[#allocation10 + $0x18] sm:$0xff]  ;;  %602 = vmatpush.msra.mxu2 %v2282_v18  ;;  %622 = vmatpush.msra.mxu3 %v2284_v16 }
 0x2a9   :  { %3081 = vst [vmem:[#allocation54_spill] sm:$0xff] %v2282_v18  ;;  %642 = vmatpush.msrb.mxu1 %v2290_v0  ;;  %662 = vmatpush.msrb.mxu0 %v2292_v4 }
 0x2aa   :  { %3077 = vst [vmem:[#allocation50_spill] sm:$0xff] %v2270_v10  ;;  %v1638_v5 = vmul.f32 -1.442695, %v2270_v10  ;;  %v1639_v14 = vmul.f32 -1.442695, %v2272_v55  ;;  %734 = vmatpush.msrb.mxu2 %v2091_v19  ;;  %754 = vmatpush.msrb.mxu3 %v2093_v20 }
 0x2ab   :  { %3078 = vst [vmem:[#allocation51_spill] sm:$0xff] %v2272_v55  ;;  %774 = vmatpush.msra.mxu1 %v2095_v21  ;;  %794 = vmatpush.msra.mxu0 %v2099_v22 }
 0x2ac   :  { %3083 = vst [vmem:[#allocation56_spill] sm:$0xff] %v2290_v0  ;;  %1676 = vpow2.f32 %v1638_v5  ;;  %735 = vmatpush.msrb.mxu2 %v2101_v23  ;;  %755 = vmatpush.msrb.mxu3 %v2103_v7 }
 0x2ad   :  { %3084 = vst [vmem:[#allocation57_spill] sm:$0xff] %v2292_v4  ;;  %v1675_v10 = vpop.eup %1674  ;;  %1678 = vpow2.f32 %v1639_v14  ;;  %775 = vmatpush.msra.mxu1 %v2107_v1  ;;  %795 = vmatpush.msra.mxu0 %v2109_v24 }
 0x2ae   :  { %v2304_v55 = vadd.f32 1.0, %v1675_v10  ;;  %736 = vmatpush.msrb.mxu2 %v2111_v25  ;;  %756 = vmatpush.msrb.mxu3 %v2115_v26 }
 0x2af   :  { %776 = vmatpush.msra.mxu1 %v2117_v27  ;;  %796 = vmatpush.msra.mxu0 %v2119_v28 }
 0x2b0   :  { %v424_v10 = vpop.f32.mrf.mxu1  ;;  %1680 = vrcp.f32 %v2304_v55  ;;  %737 = vmatpush.msrb.mxu2 %v2123_v29  ;;  %757 = vmatpush.msrb.mxu3 %v2125_v30  ;;  %vm508_vm10 = vweird.f32 %v2304_v55 }
 0x2b1   :  { %777 = vmatpush.msra.mxu1 %v2129_v31  ;;  %797 = vmatpush.msra.mxu0 %v2131_v32 }
 0x2b2   :  { %v1677_v5 = vpop.eup %1676  ;;  %738 = vmatpush.msrb.mxu2 %v2135_v33  ;;  %758 = vmatpush.msrb.mxu3 %v2137_v34 }
 0x2b3   :  { %v1679_v14 = vpop.eup %1678  ;;  %v2312_v20 = vadd.f32 1.0, %v1677_v5  ;;  %v425_v5 = vadd.f32 %v424_v10, %v344_v13  ;;  %778 = vmatpush.msra.mxu1 %v2141_v35  ;;  %798 = vmatpush.msra.mxu0 %v2143_v36 }
 0x2b4   :  { %v2316_v23 = vadd.f32 1.0, %v1679_v14  ;;  %v450_v14 = vperm.slane %v2190_v52, 2  ;;  %739 = vmatpush.msrb.mxu2 %v2147_v37  ;;  %759 = vmatpush.msrb.mxu3 %v2149_v38 }
 0x2b5   :  { %1682 = vrcp.f32 %v2312_v20  ;;  %779 = vmatpush.msra.mxu1 %v2153_v39  ;;  %799 = vmatpush.msra.mxu0 %v2155_v40  ;;  %vm469_vm3 = vweird.f32 %v2312_v20 }
 0x2b6   :  { %1684 = vrcp.f32 %v2316_v23  ;;  %v2334_v32 = vpop.eup %1680  ;;  %740 = vmatpush.msrb.mxu2 %v2159_v41  ;;  %760 = vmatpush.msrb.mxu3 %v2161_v42  ;;  %v2338_v52 = vadd.f32 %v450_v14, %v425_v5  ;;  %v475_v14 = vand.u32 2147483648, %v2312_v20  ;;  %vm488_vm5 = vweird.f32 %v2316_v23 }
 0x2b7   :  { %780 = vmatpush.msra.mxu1 %v2165_v44  ;;  %800 = vmatpush.msra.mxu0 %v2167_v45  ;;  %v504_v5 = vmul.f32 %v2334_v32, %v2304_v55  ;;  %vm509_vm9 = vweird.f32 %v2334_v32 }
 0x2b8   :  { %3085 = vst [vmem:[#allocation58_spill] sm:$0xff] %v2338_v52  ;;  %741 = vmatpush.msrb.mxu2 %v2171_v46  ;;  %761 = vmatpush.msrb.mxu3 %v2173_v47  ;;  %1686 = vtanh.f32 %v2338_v52  ;;  %vm510_vm11 = vmor %vm508_vm10, %vm509_vm9 }
 0x2b9   :  { %781 = vmatpush.msra.mxu1 %v2177_v48  ;;  %801 = vmatpush.msra.mxu0 %v2179_v49  ;;  %v494_v49 = vand.u32 2147483648, %v2316_v23 }
 0x2ba   :  { %742 = vmatpush.msrb.mxu2 %v2183_v50  ;;  %762 = vmatpush.msrb.mxu3 %v2185_v51 }
 0x2bb   :  { %v1683_v13 = vpop.eup %1682  ;;  %782 = vmatpush.msra.mxu1 %v2194_v53  ;;  %802 = vmatpush.msra.mxu0 %v2196_v54 }
 0x2bc   :  { %v1685_v10 = vpop.eup %1684  ;;  %v465_v38 = vmul.f32 %v1683_v13, %v2312_v20  ;;  %vm470_vm1 = vweird.f32 %v1683_v13  ;;  %743 = vmatpush.msrb.mxu2 %v2200_v57  ;;  %763 = vmatpush.msrb.mxu3 %v2202_v58  ;;  %v476_v57 = vor.u32 1.1754944e-38, %v475_v14 }
 0x2bd   :  { %v484_v40 = vmul.f32 %v1685_v10, %v2316_v23  ;;  %vm489_vm2 = vweird.f32 %v1685_v10  ;;  %783 = vmatpush.msra.mxu1 %v2206_v59  ;;  %803 = vmatpush.msra.mxu0 %v2208_v60  ;;  %vm471_vm4 = vmor %vm469_vm3, %vm470_vm1 }
 0x2be   :  { %v466_v42 = vsub.f32 1.0, %v465_v38  ;;  %v473_v38 = vand.u32 2147483647, %v2312_v20  ;;  %744 = vmatpush.msrb.mxu2 %v2213_v62  ;;  %764 = vmatpush.msrb.mxu3 %v2215_v63  ;;  %vm490_vm7 = vmor %vm488_vm5, %vm489_vm2  ;;  %v495_v20 = vor.u32 1.1754944e-38, %v494_v49  ;;  %v1687_v63 = vpop.eup %1686 }
 0x2bf   :  { %v485_v45 = vsub.f32 1.0, %v484_v40  ;;  %v492_v40 = vand.u32 2147483647, %v2316_v23  ;;  %784 = vmatpush.msra.mxu1 %v2219_v2  ;;  %v3090_v23 = vld [vmem:[#allocation38_spill] sm:$0xff] }
 0x2c0   :  { %v467_v48 = vmul.f32 %v1683_v13, %v466_v42  ;;  %v505_v42 = vsub.f32 1.0, %v504_v5  ;;  %vm474_vm6 = vcmp.eq.f32.partialorder %v473_v38, 8.507059e+37  ;;  %v3088_v5 = vld [vmem:[#allocation36_spill] sm:$0xff] }
 0x2c1   :  { %v486_v51 = vmul.f32 %v1685_v10, %v485_v45  ;;  %v3086_v45 = vld [vmem:[#allocation34_spill] sm:$0xff]  ;;  %765 = vmatpush.msrb.mxu3 %v3088_v5  ;;  %vm493_vm8 = vcmp.eq.f32.partialorder %v492_v40, 8.507059e+37 }
 0x2c2   :  { %v468_v52 = vadd.f32 %v1683_v13, %v467_v48  ;;  %804 = vmatpush.msra.mxu0 %v3086_v45  ;;  %v3087_v48 = vld [vmem:[#allocation35_spill] sm:$0xff]  ;;  %v506_v45 = vmul.f32 %v2334_v32, %v505_v42  ;;  %v3093_v42 = vld [vmem:[#allocation17_spill] sm:$0xff] }
 0x2c3   :  { %v487_v58 = vadd.f32 %v1685_v10, %v486_v51  ;;  %745 = vmatpush.msrb.mxu2 %v3087_v48  ;;  %v3089_v51 = vld [vmem:[#allocation37_spill] sm:$0xff]  ;;  %766 = vmatpush.msrb.mxu3 %v2241_v12 }
 0x2c4   :  { %v472_v59 = vsel %vm471_vm4, %v1683_v13, %v468_v52  ;;  %785 = vmatpush.msra.mxu1 %v3089_v51  ;;  %805 = vmatpush.msra.mxu0 %v3090_v23  ;;  %v3091_v52 = vld [vmem:[#allocation43_spill] sm:$0xff] }
 0x2c5   :  { %v477_v62 = vsel %vm474_vm6, %v476_v57, %v472_v59  ;;  %v491_v60 = vsel %vm490_vm7, %v1685_v10, %v487_v58  ;;  %746 = vmatpush.msrb.mxu2 %v2239_v11  ;;  %767 = vmatpush.msrb.mxu3 %v2255_v61  ;;  %v507_v58 = vadd.f32 %v2334_v32, %v506_v45  ;;  %v514_v59 = vand.u32 2147483648, %v2304_v55  ;;  %v3095_v45 = vld [vmem:[#allocation19_spill] sm:$0xff] }
 0x2c6   :  { %v496_v14 = vsel %vm493_vm8, %v495_v20, %v491_v60  ;;  %v519_v13 = vmul.f32 %v1687_v63, %v477_v62  ;;  %786 = vmatpush.msra.mxu1 %v2247_v15  ;;  %806 = vmatpush.msra.mxu0 %v3091_v52  ;;  %v512_v60 = vand.u32 2147483647, %v2304_v55  ;;  %v3092_v55 = vld [vmem:[#allocation16_spill] sm:$0xff] }
 0x2c7   :  { %v518_v49 = vmul.f32 0.0, %v496_v14  ;;  %747 = vmatpush.msrb.mxu2 %v2253_v43  ;;  %768 = vmatpush.msrb.mxu3 %v2268_v8  ;;  %v511_v62 = vsel %vm510_vm11, %v2334_v32, %v507_v58  ;;  %v515_v63 = vor.u32 1.1754944e-38, %v514_v59  ;;  %v3094_v32 = vld [vmem:[#allocation18_spill] sm:$0xff]  ;;  %v3096_v20 = vld [vmem:[#allocation20_spill] sm:$0xff]  ;;  %v3097_v14 = vld [vmem:[#allocation21_spill] sm:$0xff] }
 0x2c8   :  { %787 = vmatpush.msra.mxu1 %v2260_v6  ;;  %807 = vmatpush.msra.mxu0 %v2262_v3  ;;  %vm513_vm12 = vcmp.eq.f32.partialorder %v512_v60, 8.507059e+37  ;;  %v3100_v58 = vld [vmem:[#allocation24_spill] sm:$0xff]  ;;  %v3101_v59 = vld [vmem:[#allocation26_spill] sm:$0xff]  ;;  %v3102_v60 = vld [vmem:[#allocation27_spill] sm:$0xff] }
 0x2c9   :  { %v2382_v57 = vadd.f32 %v519_v13, %v518_v49  ;;  %748 = vmatpush.msrb.mxu2 %v2266_v9  ;;  %769 = vmatpush.msrb.mxu3 %v2284_v16  ;;  %v516_v38 = vsel %vm513_vm12, %v515_v63, %v511_v62  ;;  %v3098_v13 = vld [vmem:[#allocation22_spill] sm:$0xff]  ;;  %v3099_v49 = vld [vmem:[#allocation23_spill] sm:$0xff]  ;;  %v3103_v62 = vld [vmem:[#allocation28_spill] sm:$0xff] }
 0x2ca   :  { %788 = vmatpush.msra.mxu1 %v2276_v56  ;;  %808 = vmatpush.msra.mxu0 %v2278_v17  ;;  %v3104_v63 = vld [vmem:[#allocation29_spill] sm:$0xff] }
 0x2cb   :  { %1688 = vtanh.f32 %v2382_v57  ;;  %749 = vmatpush.msrb.mxu2 %v2282_v18 }
 0x2cc   :  { %789 = vmatpush.msra.mxu1 %v2290_v0  ;;  %809 = vmatpush.msra.mxu0 %v2292_v4 }
 0x2d1   :  { %v1689_v10 = vpop.eup %1688 }
 0x2d2   :  { %v522_v40 = vmul.f32 %v1689_v10, %v516_v38  ;;  %v3105_v10 = vld [vmem:[#allocation30_spill] sm:$0xff]  ;;  %v3106_v38 = vld [vmem:[#allocation31_spill] sm:$0xff] }
 0x2d4   :  { %603 = vmatmul.f32.vlgmr.msra.gmra.mxu2 %v522_v40  ;;  %623 = vmatmul.f32.vlgmr.msra.gmra.mxu3 %v522_v40 }
 0x2d5   :  { %643 = vmatmul.f32.vlgmr.msrb.gmra.mxu1 %v522_v40  ;;  %663 = vmatmul.f32.vlgmr.msrb.gmra.mxu0 %v522_v40  ;;  %v3107_v40 = vld [vmem:[#allocation32_spill] sm:$0xff] }
 0x2d6   :  { %881 = vmatpush.msra.mxu2 %v2091_v19  ;;  %901 = vmatpush.msra.mxu3 %v3092_v55 }
 0x2d7   :  { %921 = vmatpush.msrb.mxu1 %v2095_v21  ;;  %941 = vmatpush.msrb.mxu0 %v2099_v22 }
 0x2d8   :  { %882 = vmatpush.msra.mxu2 %v3093_v42  ;;  %902 = vmatpush.msra.mxu3 %v2103_v7 }
 0x2d9   :  { %922 = vmatpush.msrb.mxu1 %v2107_v1  ;;  %942 = vmatpush.msrb.mxu0 %v2109_v24 }
 0x2da   :  { %883 = vmatpush.msra.mxu2 %v2111_v25  ;;  %903 = vmatpush.msra.mxu3 %v2115_v26 }
 0x2db   :  { %923 = vmatpush.msrb.mxu1 %v2117_v27  ;;  %943 = vmatpush.msrb.mxu0 %v2119_v28 }
 0x2dc   :  { %884 = vmatpush.msra.mxu2 %v2123_v29  ;;  %904 = vmatpush.msra.mxu3 %v2125_v30 }
 0x2dd   :  { %924 = vmatpush.msrb.mxu1 %v2129_v31  ;;  %944 = vmatpush.msrb.mxu0 %v3094_v32 }
 0x2de   :  { %885 = vmatpush.msra.mxu2 %v2135_v33  ;;  %905 = vmatpush.msra.mxu3 %v2137_v34 }
 0x2df   :  { %925 = vmatpush.msrb.mxu1 %v2141_v35  ;;  %945 = vmatpush.msrb.mxu0 %v2143_v36 }
 0x2e0   :  { %886 = vmatpush.msra.mxu2 %v2147_v37  ;;  %906 = vmatpush.msra.mxu3 %v3095_v45 }
 0x2e1   :  { %926 = vmatpush.msrb.mxu1 %v2153_v39  ;;  %946 = vmatpush.msrb.mxu0 %v3096_v20 }
 0x2e2   :  { %887 = vmatpush.msra.mxu2 %v2159_v41  ;;  %907 = vmatpush.msra.mxu3 %v3097_v14 }
 0x2e3   :  { %927 = vmatpush.msrb.mxu1 %v2165_v44  ;;  %947 = vmatpush.msrb.mxu0 %v3098_v13 }
 0x2e4   :  { %888 = vmatpush.msra.mxu2 %v2171_v46  ;;  %908 = vmatpush.msra.mxu3 %v2173_v47 }
 0x2e5   :  { %928 = vmatpush.msrb.mxu1 %v3099_v49  ;;  %948 = vmatpush.msrb.mxu0 %v3100_v58 }
 0x2e6   :  { %889 = vmatpush.msra.mxu2 %v2183_v50  ;;  %909 = vmatpush.msra.mxu3 %v3101_v59  ;;  %v3108_v50 = vld [vmem:[#allocation34_spill] sm:$0xff] }
 0x2e7   :  { %929 = vmatpush.msrb.mxu1 %v2194_v53  ;;  %949 = vmatpush.msrb.mxu0 %v2196_v54 }
 0x2e8   :  { %890 = vmatpush.msra.mxu2 %v3102_v60  ;;  %910 = vmatpush.msra.mxu3 %v3103_v62 }
 0x2e9   :  { %930 = vmatpush.msrb.mxu1 %v3104_v63  ;;  %950 = vmatpush.msrb.mxu0 %v3105_v10 }
 0x2ea   :  { %891 = vmatpush.msra.mxu2 %v3106_v38  ;;  %911 = vmatpush.msra.mxu3 %v3107_v40 }
 0x2eb   :  { %931 = vmatpush.msrb.mxu1 %v2219_v2  ;;  %951 = vmatpush.msrb.mxu0 %v3108_v50 }
 0x2ec   :  { %892 = vmatpush.msra.mxu2 %v3087_v48  ;;  %912 = vmatpush.msra.mxu3 %v3088_v5 }
 0x2ed   :  { %932 = vmatpush.msrb.mxu1 %v3089_v51  ;;  %952 = vmatpush.msrb.mxu0 %v3090_v23 }
 0x2ee   :  { %893 = vmatpush.msra.mxu2 %v2239_v11  ;;  %913 = vmatpush.msra.mxu3 %v2241_v12 }
 0x2ef   :  { %933 = vmatpush.msrb.mxu1 %v2247_v15  ;;  %953 = vmatpush.msrb.mxu0 %v3091_v52 }
 0x2f0   :  { %894 = vmatpush.msra.mxu2 %v2253_v43  ;;  %914 = vmatpush.msra.mxu3 %v2255_v61 }
 0x2f1   :  { %934 = vmatpush.msrb.mxu1 %v2260_v6  ;;  %954 = vmatpush.msrb.mxu0 %v2262_v3  ;;  %v3109_v6 = vld [vmem:[#allocation39_spill] sm:$0xff] }
 0x2f2   :  { %895 = vmatpush.msra.mxu2 %v2266_v9  ;;  %915 = vmatpush.msra.mxu3 %v2268_v8  ;;  %v3110_v8 = vld [vmem:[#allocation50_spill] sm:$0xff] }
 0x2f3   :  { %935 = vmatpush.msrb.mxu1 %v2276_v56  ;;  %955 = vmatpush.msrb.mxu0 %v2278_v17  ;;  %v3111_v56 = vld [vmem:[#allocation51_spill] sm:$0xff] }
 0x2f4   :  { %896 = vmatpush.msra.mxu2 %v2282_v18  ;;  %916 = vmatpush.msra.mxu3 %v2284_v16 }
 0x2f5   :  { %936 = vmatpush.msrb.mxu1 %v2290_v0  ;;  %956 = vmatpush.msrb.mxu0 %v2292_v4 }
 0x352   :  { %v664_v61 = vpop.f32.mrf.mxu0 }
 0x353   :  { %v670_v43 = vadd.f32 %v664_v61, %v3109_v6  ;;  %v3112_v6 = vld [vmem:[#allocation58_spill] sm:$0xff] }
 0x355   :  { %v1643_v3 = vmul.f32 -1.442695, %v670_v43 }
 0x357   :  { %1690 = vpow2.f32 %v1643_v3  ;;  %v604_v9 = vpop.f32.mrf.mxu2  ;;  %v624_v52 = vpop.f32.mrf.mxu3 }
 0x358   :  { %v667_v15 = vadd.f32 %v604_v9, %v3110_v8  ;;  %v668_v12 = vadd.f32 %v624_v52, %v3111_v56  ;;  %v644_v3 = vpop.f32.mrf.mxu1 }
 0x359   :  { %v669_v9 = vadd.f32 %v644_v3, %v3112_v6 }
 0x35a   :  { %v1641_v17 = vmul.f32 -1.442695, %v667_v15  ;;  %v1642_v11 = vmul.f32 -1.442695, %v668_v12 }
 0x35c   :  { %1692 = vpow2.f32 %v1641_v17 }
 0x35d   :  { %v1691_v18 = vpop.eup %1690  ;;  %1694 = vpow2.f32 %v1642_v11 }
 0x35e   :  { %v713_v16 = vadd.f32 1.0, %v1691_v18 }
 0x360   :  { %1696 = vrcp.f32 %v713_v16  ;;  %vm719_vm6 = vweird.f32 %v713_v16 }
 0x362   :  { %v1693_v0 = vpop.eup %1692 }
 0x363   :  { %v1695_v23 = vpop.eup %1694  ;;  %v674_v4 = vadd.f32 1.0, %v1693_v0 }
 0x364   :  { %v693_v51 = vadd.f32 1.0, %v1695_v23 }
 0x365   :  { %1698 = vrcp.f32 %v674_v4  ;;  %v686_v11 = vand.u32 2147483648, %v674_v4  ;;  %v684_v0 = vand.u32 2147483647, %v674_v4  ;;  %vm680_vm15 = vweird.f32 %v674_v4 }
 0x366   :  { %1700 = vrcp.f32 %v693_v51  ;;  %v1697_v43 = vpop.eup %1696  ;;  %v705_v5 = vand.u32 2147483648, %v693_v51  ;;  %v703_v48 = vand.u32 2147483647, %v693_v51  ;;  %vm699_vm1 = vweird.f32 %v693_v51 }
 0x367   :  { %v715_v12 = vmul.f32 %v1697_v43, %v713_v16  ;;  %1702 = vtanh.f32 %v669_v9  ;;  %v687_v3 = vor.u32 1.1754944e-38, %v686_v11  ;;  %vm685_vm2 = vcmp.eq.f32.partialorder %v684_v0, 8.507059e+37 }
 0x368   :  { %v706_v9 = vor.u32 1.1754944e-38, %v705_v5  ;;  %vm704_vm4 = vcmp.eq.f32.partialorder %v703_v48, 8.507059e+37  ;;  %vm720_vm5 = vweird.f32 %v1697_v43 }
 0x369   :  { %v716_v50 = vsub.f32 1.0, %v715_v12  ;;  %vm721_vm7 = vmor %vm719_vm6, %vm720_vm5 }
 0x36b   :  { %v1699_v61 = vpop.eup %1698  ;;  %v717_v10 = vmul.f32 %v1697_v43, %v716_v50  ;;  %v3136_v50 = vld [vmem:[#allocation54_spill] sm:$0xff] }
 0x36c   :  { %v1701_v8 = vpop.eup %1700  ;;  %v676_v52 = vmul.f32 %v1699_v61, %v674_v4  ;;  %vm681_vm13 = vweird.f32 %v1699_v61  ;;  %v725_v4 = vand.u32 2147483648, %v713_v16 }
 0x36d   :  { %v695_v15 = vmul.f32 %v1701_v8, %v693_v51  ;;  %vm700_vm14 = vweird.f32 %v1701_v8  ;;  %vm682_vm0 = vmor %vm680_vm15, %vm681_vm13 }
 0x36e   :  { %v677_v17 = vsub.f32 1.0, %v676_v52  ;;  %vm701_vm3 = vmor %vm699_vm1, %vm700_vm14  ;;  %v1703_v52 = vpop.eup %1702  ;;  %v726_v51 = vor.u32 1.1754944e-38, %v725_v4 }
 0x36f   :  { %v696_v18 = vsub.f32 1.0, %v695_v15 }
 0x370   :  { %v678_v56 = vmul.f32 %v1699_v61, %v677_v17 }
 0x371   :  { %v697_v23 = vmul.f32 %v1701_v8, %v696_v18 }
 0x372   :  { %v679_v2 = vadd.f32 %v1699_v61, %v678_v56  ;;  %v718_v56 = vadd.f32 %v1697_v43, %v717_v10 }
 0x373   :  { %v698_v6 = vadd.f32 %v1701_v8, %v697_v23  ;;  %v3143_v23 = vld [vmem:[#allocation58_spill] sm:$0xff] }
 0x374   :  { %v683_v40 = vsel %vm682_vm0, %v1699_v61, %v679_v2  ;;  %v723_v2 = vand.u32 2147483647, %v713_v16  ;;  %v722_v5 = vsel %vm721_vm7, %v1697_v43, %v718_v56  ;;  %v3139_v16 = vld [vmem:[#allocation57_spill] sm:$0xff] }
 0x375   :  { %v688_v15 = vsel %vm685_vm2, %v687_v3, %v683_v40  ;;  %v702_v17 = vsel %vm701_vm3, %v1701_v8, %v698_v6 }
 0x376   :  { %v707_v38 = vsel %vm704_vm4, %v706_v9, %v702_v17  ;;  %v730_v18 = vmul.f32 %v1703_v52, %v688_v15  ;;  %vm724_vm8 = vcmp.eq.f32.partialorder %v723_v2, 8.507059e+37 }
 0x377   :  { %v729_v63 = vmul.f32 %v707_v38, %v2382_v57  ;;  %v727_v8 = vsel %vm724_vm8, %v726_v51, %v722_v5 }
 0x379   :  { %v2470_v12 = vadd.f32 %v730_v18, %v729_v63 }
 0x37b   :  { %1704 = vtanh.f32 %v2470_v12 }
 0x381   :  { %v1705_v6 = vpop.eup %1704 }
 0x382   :  { %v733_v48 = vmul.f32 %v1705_v6, %v727_v8 }
 0x384   :  { %750 = vmatmul.f32.vlgmr.msrb.gmra.mxu2 %v733_v48  ;;  %770 = vmatmul.f32.vlgmr.msrb.gmra.mxu3 %v733_v48 }
 0x385   :  { %790 = vmatmul.f32.vlgmr.msra.gmra.mxu1 %v733_v48  ;;  %810 = vmatmul.f32.vlgmr.msra.gmra.mxu0 %v733_v48 }
 0x386   :  { %1028 = vmatpush.msrb.mxu2 %v2091_v19  ;;  %1048 = vmatpush.msrb.mxu3 %v3092_v55  ;;  %v3113_v19 = vld [vmem:[#allocation25_spill] sm:$0xff]  ;;  %v3140_v55 = vld [vmem:[#allocation39_spill] sm:$0xff] }
 0x387   :  { %1068 = vmatpush.msra.mxu1 %v2095_v21  ;;  %1088 = vmatpush.msra.mxu0 %v2099_v22  ;;  %v3114_v21 = vld [vmem:[#allocation29_spill] sm:$0xff]  ;;  %v3115_v22 = vld [vmem:[#allocation30_spill] sm:$0xff] }
 0x388   :  { %1029 = vmatpush.msrb.mxu2 %v3093_v42  ;;  %1049 = vmatpush.msrb.mxu3 %v2103_v7  ;;  %v3116_v7 = vld [vmem:[#allocation31_spill] sm:$0xff] }
 0x389   :  { %1069 = vmatpush.msra.mxu1 %v2107_v1  ;;  %1089 = vmatpush.msra.mxu0 %v2109_v24  ;;  %v3117_v1 = vld [vmem:[#allocation32_spill] sm:$0xff]  ;;  %v3118_v24 = vld [vmem:[#allocation33_spill] sm:$0xff] }
 0x38a   :  { %1030 = vmatpush.msrb.mxu2 %v2111_v25  ;;  %1050 = vmatpush.msrb.mxu3 %v2115_v26  ;;  %v3119_v25 = vld [vmem:[#allocation34_spill] sm:$0xff]  ;;  %v3120_v26 = vld [vmem:[#allocation35_spill] sm:$0xff] }
 0x38b   :  { %1070 = vmatpush.msra.mxu1 %v2117_v27  ;;  %1090 = vmatpush.msra.mxu0 %v2119_v28  ;;  %v3121_v27 = vld [vmem:[#allocation36_spill] sm:$0xff]  ;;  %v3122_v28 = vld [vmem:[#allocation37_spill] sm:$0xff] }
 0x38c   :  { %1031 = vmatpush.msrb.mxu2 %v2123_v29  ;;  %1051 = vmatpush.msrb.mxu3 %v2125_v30  ;;  %v3123_v29 = vld [vmem:[#allocation38_spill] sm:$0xff]  ;;  %v3124_v30 = vld [vmem:[#allocation40_spill] sm:$0xff] }
 0x38d   :  { %1071 = vmatpush.msra.mxu1 %v2129_v31  ;;  %1091 = vmatpush.msra.mxu0 %v3094_v32  ;;  %v3125_v31 = vld [vmem:[#allocation41_spill] sm:$0xff] }
 0x38e   :  { %1032 = vmatpush.msrb.mxu2 %v2135_v33  ;;  %1052 = vmatpush.msrb.mxu3 %v2137_v34  ;;  %v3126_v33 = vld [vmem:[#allocation42_spill] sm:$0xff]  ;;  %v3127_v34 = vld [vmem:[#allocation43_spill] sm:$0xff] }
 0x38f   :  { %1072 = vmatpush.msra.mxu1 %v2141_v35  ;;  %1092 = vmatpush.msra.mxu0 %v2143_v36  ;;  %v3128_v35 = vld [vmem:[#allocation44_spill] sm:$0xff]  ;;  %v3129_v36 = vld [vmem:[#allocation45_spill] sm:$0xff] }
 0x390   :  { %1033 = vmatpush.msrb.mxu2 %v2147_v37  ;;  %1053 = vmatpush.msrb.mxu3 %v3095_v45  ;;  %v3130_v37 = vld [vmem:[#allocation46_spill] sm:$0xff] }
 0x391   :  { %1073 = vmatpush.msra.mxu1 %v2153_v39  ;;  %1093 = vmatpush.msra.mxu0 %v3096_v20  ;;  %v3131_v39 = vld [vmem:[#allocation47_spill] sm:$0xff] }
 0x392   :  { %1034 = vmatpush.msrb.mxu2 %v2159_v41  ;;  %1054 = vmatpush.msrb.mxu3 %v3097_v14  ;;  %v3132_v41 = vld [vmem:[#allocation48_spill] sm:$0xff]  ;;  %v3141_v14 = vld [vmem:[#allocation50_spill] sm:$0xff] }
 0x393   :  { %1074 = vmatpush.msra.mxu1 %v2165_v44  ;;  %1094 = vmatpush.msra.mxu0 %v3098_v13  ;;  %v3133_v44 = vld [vmem:[#allocation49_spill] sm:$0xff] }
 0x394   :  { %1035 = vmatpush.msrb.mxu2 %v2171_v46  ;;  %1055 = vmatpush.msrb.mxu3 %v2173_v47  ;;  %v3134_v46 = vld [vmem:[#allocation52_spill] sm:$0xff]  ;;  %v3135_v47 = vld [vmem:[#allocation53_spill] sm:$0xff] }
 0x395   :  { %1075 = vmatpush.msra.mxu1 %v3099_v49  ;;  %1095 = vmatpush.msra.mxu0 %v3100_v58  ;;  %v3142_v49 = vld [vmem:[#allocation51_spill] sm:$0xff] }
 0x396   :  { %1036 = vmatpush.msrb.mxu2 %v3113_v19  ;;  %1056 = vmatpush.msrb.mxu3 %v3101_v59 }
 0x397   :  { %1076 = vmatpush.msra.mxu1 %v2194_v53  ;;  %1096 = vmatpush.msra.mxu0 %v2196_v54  ;;  %v3137_v53 = vld [vmem:[#allocation55_spill] sm:$0xff]  ;;  %v3138_v54 = vld [vmem:[#allocation56_spill] sm:$0xff] }
 0x398   :  { %1037 = vmatpush.msrb.mxu2 %v3102_v60  ;;  %1057 = vmatpush.msrb.mxu3 %v3103_v62 }
 0x399   :  { %1077 = vmatpush.msra.mxu1 %v3114_v21  ;;  %1097 = vmatpush.msra.mxu0 %v3115_v22 }
 0x39a   :  { %1038 = vmatpush.msrb.mxu2 %v3116_v7  ;;  %1058 = vmatpush.msrb.mxu3 %v3117_v1 }
 0x39b   :  { %1078 = vmatpush.msra.mxu1 %v3118_v24  ;;  %1098 = vmatpush.msra.mxu0 %v3119_v25 }
 0x39c   :  { %1039 = vmatpush.msrb.mxu2 %v3120_v26  ;;  %1059 = vmatpush.msrb.mxu3 %v3121_v27 }
 0x39d   :  { %1079 = vmatpush.msra.mxu1 %v3122_v28  ;;  %1099 = vmatpush.msra.mxu0 %v3123_v29 }
 0x39e   :  { %1040 = vmatpush.msrb.mxu2 %v3124_v30  ;;  %1060 = vmatpush.msrb.mxu3 %v3125_v31 }
 0x39f   :  { %1080 = vmatpush.msra.mxu1 %v3126_v33  ;;  %1100 = vmatpush.msra.mxu0 %v3127_v34 }
 0x3a0   :  { %1041 = vmatpush.msrb.mxu2 %v3128_v35  ;;  %1061 = vmatpush.msrb.mxu3 %v3129_v36 }
 0x3a1   :  { %1081 = vmatpush.msra.mxu1 %v3130_v37  ;;  %1101 = vmatpush.msra.mxu0 %v3131_v39 }
 0x3a2   :  { %1042 = vmatpush.msrb.mxu2 %v3132_v41  ;;  %1062 = vmatpush.msrb.mxu3 %v3133_v44 }
 0x3a3   :  { %1082 = vmatpush.msra.mxu1 %v3134_v46  ;;  %1102 = vmatpush.msra.mxu0 %v3135_v47 }
 0x3a4   :  { %1043 = vmatpush.msrb.mxu2 %v3136_v50  ;;  %1063 = vmatpush.msrb.mxu3 %v3137_v53 }
 0x3a5   :  { %1083 = vmatpush.msra.mxu1 %v3138_v54  ;;  %1103 = vmatpush.msra.mxu0 %v3139_v16 }
 0x402   :  { %v811_v57 = vpop.f32.mrf.mxu0  ;;  %v791_v61 = vpop.f32.mrf.mxu1 }
 0x403   :  { %v817_v42 = vadd.f32 %v811_v57, %v3140_v55  ;;  %v816_v3 = vadd.f32 %v791_v61, %v3143_v23  ;;  %v2569_v61 = vld [vmem:[#allocation10 + $0x1a0] sm:$0xff] }
 0x405   :  { %v1646_v32 = vmul.f32 -1.442695, %v817_v42 }
 0x407   :  { %1706 = vpow2.f32 %v1646_v32  ;;  %v751_v45 = vpop.f32.mrf.mxu2  ;;  %v771_v20 = vpop.f32.mrf.mxu3 }
 0x408   :  { %v814_v13 = vadd.f32 %v751_v45, %v3141_v14  ;;  %v815_v58 = vadd.f32 %v771_v20, %v3142_v49 }
 0x40a   :  { %v1644_v59 = vmul.f32 -1.442695, %v814_v13  ;;  %v1645_v60 = vmul.f32 -1.442695, %v815_v58 }
 0x40c   :  { %1708 = vpow2.f32 %v1644_v59 }
 0x40d   :  { %v1707_v62 = vpop.eup %1706  ;;  %1710 = vpow2.f32 %v1645_v60  ;;  %v2548_v60 = vld [vmem:[#allocation10 + $0x1e8] sm:$0xff] }
 0x40e   :  { %v860_v63 = vadd.f32 1.0, %v1707_v62  ;;  %v2551_v62 = vld [vmem:[#allocation10 + $0x1f0] sm:$0xff] }
 0x410   :  { %1712 = vrcp.f32 %v860_v63  ;;  %v872_v42 = vand.u32 2147483648, %v860_v63  ;;  %vm866_vm2 = vweird.f32 %v860_v63  ;;  %v870_v32 = vand.u32 2147483647, %v860_v63 }
 0x412   :  { %v1709_v10 = vpop.eup %1708  ;;  %v873_v20 = vor.u32 1.1754944e-38, %v872_v42  ;;  %vm871_vm4 = vcmp.eq.f32.partialorder %v870_v32, 8.507059e+37  ;;  %v2659_v42 = vld [vmem:[#allocation10 + $0xd0] sm:$0xff]  ;;  %v2662_v32 = vld [vmem:[#allocation10 + $0xd8] sm:$0xff] }
 0x413   :  { %v1711_v38 = vpop.eup %1710  ;;  %v821_v40 = vadd.f32 1.0, %v1709_v10  ;;  %v2557_v10 = vld [vmem:[#allocation10 + $0x1c0] sm:$0xff]  ;;  %3145 = vst [vmem:[#allocation17_spill] sm:$0xff] %v2659_v42 }
 0x414   :  { %v840_v43 = vadd.f32 1.0, %v1711_v38  ;;  %v2560_v38 = vld [vmem:[#allocation10 + $0x1c8] sm:$0xff]  ;;  %3146 = vst [vmem:[#allocation18_spill] sm:$0xff] %v2662_v32 }
 0x415   :  { %1714 = vrcp.f32 %v821_v40  ;;  %v833_v56 = vand.u32 2147483648, %v821_v40  ;;  %v831_v5 = vand.u32 2147483647, %v821_v40  ;;  %vm827_vm11 = vweird.f32 %v821_v40 }
 0x416   :  { %1716 = vrcp.f32 %v840_v43  ;;  %v1713_v11 = vpop.eup %1712  ;;  %v852_v51 = vand.u32 2147483648, %v840_v43  ;;  %v850_v8 = vand.u32 2147483647, %v840_v43  ;;  %vm846_vm13 = vweird.f32 %v840_v43 }
 0x417   :  { %v862_v17 = vmul.f32 %v1713_v11, %v860_v63  ;;  %1718 = vtanh.f32 %v816_v3  ;;  %v834_v21 = vor.u32 1.1754944e-38, %v833_v56  ;;  %vm832_vm14 = vcmp.eq.f32.partialorder %v831_v5, 8.507059e+37  ;;  %v2554_v63 = vld [vmem:[#allocation10 + $0x1f8] sm:$0xff]  ;;  %v2596_v56 = vld [vmem:[#allocation10 + $0x168] sm:$0xff]  ;;  %v2605_v5 = vld [vmem:[#allocation10 + $0x140] sm:$0xff] }
 0x418   :  { %v853_v1 = vor.u32 1.1754944e-38, %v852_v51  ;;  %vm851_vm0 = vcmp.eq.f32.partialorder %v850_v8, 8.507059e+37  ;;  %vm867_vm1 = vweird.f32 %v1713_v11  ;;  %v2578_v3 = vld [vmem:[#allocation10 + $0x1b8] sm:$0xff]  ;;  %v2608_v51 = vld [vmem:[#allocation10 + $0x148] sm:$0xff] }
 0x419   :  { %v863_v48 = vsub.f32 1.0, %v862_v17  ;;  %vm868_vm3 = vmor %vm866_vm2, %vm867_vm1  ;;  %v2590_v17 = vld [vmem:[#allocation10 + $0x198] sm:$0xff] }
 0x41a   :  { %v2614_v8 = vld [vmem:[#allocation10 + $0x158] sm:$0xff] }
 0x41b   :  { %v1715_v0 = vpop.eup %1714  ;;  %v864_v28 = vmul.f32 %v1713_v11, %v863_v48  ;;  %v2617_v48 = vld [vmem:[#allocation10 + $0x120] sm:$0xff] }
 0x41c   :  { %v1717_v9 = vpop.eup %1716  ;;  %v823_v52 = vmul.f32 %v1715_v0, %v821_v40  ;;  %vm828_vm9 = vweird.f32 %v1715_v0  ;;  %v2563_v40 = vld [vmem:[#allocation10 + $0x1d0] sm:$0xff] }
 0x41d   :  { %v842_v15 = vmul.f32 %v1717_v9, %v840_v43  ;;  %vm847_vm10 = vweird.f32 %v1717_v9  ;;  %vm829_vm12 = vmor %vm827_vm11, %vm828_vm9  ;;  %v1719_v24 = vpop.eup %1718  ;;  %v865_v57 = vadd.f32 %v1713_v11, %v864_v28  ;;  %v2566_v43 = vld [vmem:[#allocation10 + $0x1d8] sm:$0xff]  ;;  %v2647_v28 = vld [vmem:[#allocation10 + $0xf0] sm:$0xff] }
 0x41e   :  { %v824_v18 = vsub.f32 1.0, %v823_v52  ;;  %vm848_vm15 = vmor %vm846_vm13, %vm847_vm10  ;;  %v2584_v52 = vld [vmem:[#allocation10 + $0x188] sm:$0xff] }
 0x41f   :  { %v843_v4 = vsub.f32 1.0, %v842_v15  ;;  %v869_v45 = vsel %vm868_vm3, %v1713_v11, %v865_v57  ;;  %v2572_v11 = vld [vmem:[#allocation10 + $0x1a8] sm:$0xff]  ;;  %v2587_v15 = vld [vmem:[#allocation10 + $0x190] sm:$0xff] }
 0x420   :  { %v825_v2 = vmul.f32 %v1715_v0, %v824_v18  ;;  %v874_v58 = vsel %vm871_vm4, %v873_v20, %v869_v45  ;;  %v2593_v18 = vld [vmem:[#allocation10 + $0x160] sm:$0xff]  ;;  %v2656_v57 = vld [vmem:[#allocation10 + $0xc8] sm:$0xff] }
 0x421   :  { %v844_v6 = vmul.f32 %v1717_v9, %v843_v4  ;;  %v2599_v4 = vld [vmem:[#allocation10 + $0x170] sm:$0xff]  ;;  %3144 = vst [vmem:[#allocation16_spill] sm:$0xff] %v2656_v57  ;;  %v2665_v45 = vld [vmem:[#allocation10 + $0xa0] sm:$0xff]  ;;  %v2668_v20 = vld [vmem:[#allocation10 + $0xa8] sm:$0xff] }
 0x422   :  { %v826_v19 = vadd.f32 %v1715_v0, %v825_v2  ;;  %v2602_v2 = vld [vmem:[#allocation10 + $0x178] sm:$0xff]  ;;  %3147 = vst [vmem:[#allocation19_spill] sm:$0xff] %v2665_v45 }
 0x423   :  { %v845_v22 = vadd.f32 %v1717_v9, %v844_v6  ;;  %v2611_v6 = vld [vmem:[#allocation10 + $0x150] sm:$0xff]  ;;  %3148 = vst [vmem:[#allocation20_spill] sm:$0xff] %v2668_v20 }
 0x424   :  { %v830_v7 = vsel %vm829_vm12, %v1715_v0, %v826_v19  ;;  %v2575_v0 = vld [vmem:[#allocation10 + $0x1b0] sm:$0xff]  ;;  %v2620_v19 = vld [vmem:[#allocation10 + $0x128] sm:$0xff] }
 0x425   :  { %v835_v25 = vsel %vm832_vm14, %v834_v21, %v830_v7  ;;  %v849_v26 = vsel %vm848_vm15, %v1717_v9, %v845_v22  ;;  %v2581_v9 = vld [vmem:[#allocation10 + $0x180] sm:$0xff]  ;;  %v2623_v21 = vld [vmem:[#allocation10 + $0x130] sm:$0xff]  ;;  %v2626_v22 = vld [vmem:[#allocation10 + $0x138] sm:$0xff] }
 0x426   :  { %v854_v27 = vsel %vm851_vm0, %v853_v1, %v849_v26  ;;  %v877_v29 = vmul.f32 %v1719_v24, %v835_v25  ;;  %v2629_v7 = vld [vmem:[#allocation10 + $0x100] sm:$0xff]  ;;  %v2632_v1 = vld [vmem:[#allocation10 + $0x108] sm:$0xff]  ;;  %v2635_v24 = vld [vmem:[#allocation10 + $0x110] sm:$0xff] }
 0x427   :  { %v876_v30 = vmul.f32 %v854_v27, %v2470_v12  ;;  %v2545_v12 = vld [vmem:[#allocation10 + $0x1e0] sm:$0xff]  ;;  %v2638_v25 = vld [vmem:[#allocation10 + $0x118] sm:$0xff]  ;;  %v2644_v27 = vld [vmem:[#allocation10 + $0xe8] sm:$0xff] }
 0x428   :  { %v2641_v26 = vld [vmem:[#allocation10 + $0xe0] sm:$0xff] }
 0x429   :  { %v2542_v31 = vadd.f32 %v877_v29, %v876_v30  ;;  %v2650_v29 = vld [vmem:[#allocation10 + $0xf8] sm:$0xff]  ;;  %v2653_v30 = vld [vmem:[#allocation10 + $0xc0] sm:$0xff] }
 0x42b   :  { %1720 = vtanh.f32 %v2542_v31 }
 0x431   :  { %v1721_v13 = vpop.eup %1720 }
 0x432   :  { %v880_v59 = vmul.f32 %v1721_v13, %v874_v58  ;;  %v2671_v13 = vld [vmem:[#allocation10 + $0xb0] sm:$0xff]  ;;  %v2674_v58 = vld [vmem:[#allocation10 + $0xb8] sm:$0xff] }
 0x433   :  { %3149 = vst [vmem:[#allocation21_spill] sm:$0xff] %v2671_v13 }
 0x434   :  { %897 = vmatmul.f32.vlgmr.msra.gmra.mxu2 %v880_v59  ;;  %917 = vmatmul.f32.vlgmr.msra.gmra.mxu3 %v880_v59  ;;  %3150 = vst [vmem:[#allocation22_spill] sm:$0xff] %v2674_v58 }
 0x435   :  { %937 = vmatmul.f32.vlgmr.msrb.gmra.mxu1 %v880_v59  ;;  %957 = vmatmul.f32.vlgmr.msrb.gmra.mxu0 %v880_v59  ;;  %v2677_v59 = vld [vmem:[#allocation10 + $0x80] sm:$0xff] }
 0x436   :  { %1175 = vmatpush.msra.mxu2 %v2545_v12  ;;  %1195 = vmatpush.msra.mxu3 %v2548_v60  ;;  %3151 = vst [vmem:[#allocation23_spill] sm:$0xff] %v2677_v59 }
 0x437   :  { %1215 = vmatpush.msrb.mxu1 %v2551_v62  ;;  %1235 = vmatpush.msrb.mxu0 %v2554_v63 }
 0x438   :  { %1176 = vmatpush.msra.mxu2 %v2557_v10  ;;  %1196 = vmatpush.msra.mxu3 %v2560_v38 }
 0x439   :  { %1216 = vmatpush.msrb.mxu1 %v2563_v40  ;;  %1236 = vmatpush.msrb.mxu0 %v2566_v43 }
 0x43a   :  { %1177 = vmatpush.msra.mxu2 %v2569_v61  ;;  %1197 = vmatpush.msra.mxu3 %v2572_v11 }
 0x43b   :  { %1217 = vmatpush.msrb.mxu1 %v2575_v0  ;;  %1237 = vmatpush.msrb.mxu0 %v2578_v3 }
 0x43c   :  { %1178 = vmatpush.msra.mxu2 %v2581_v9  ;;  %1198 = vmatpush.msra.mxu3 %v2584_v52 }
 0x43d   :  { %1218 = vmatpush.msrb.mxu1 %v2587_v15  ;;  %1238 = vmatpush.msrb.mxu0 %v2590_v17 }
 0x43e   :  { %1179 = vmatpush.msra.mxu2 %v2593_v18  ;;  %1199 = vmatpush.msra.mxu3 %v2596_v56 }
 0x43f   :  { %1219 = vmatpush.msrb.mxu1 %v2599_v4  ;;  %1239 = vmatpush.msrb.mxu0 %v2602_v2 }
 0x440   :  { %1180 = vmatpush.msra.mxu2 %v2605_v5  ;;  %1200 = vmatpush.msra.mxu3 %v2608_v51 }
 0x441   :  { %1220 = vmatpush.msrb.mxu1 %v2611_v6  ;;  %1240 = vmatpush.msrb.mxu0 %v2614_v8 }
 0x442   :  { %1181 = vmatpush.msra.mxu2 %v2617_v48  ;;  %1201 = vmatpush.msra.mxu3 %v2620_v19 }
 0x443   :  { %1221 = vmatpush.msrb.mxu1 %v2623_v21  ;;  %1241 = vmatpush.msrb.mxu0 %v2626_v22 }
 0x444   :  { %1182 = vmatpush.msra.mxu2 %v2629_v7  ;;  %1202 = vmatpush.msra.mxu3 %v2632_v1 }
 0x445   :  { %1222 = vmatpush.msrb.mxu1 %v2635_v24  ;;  %1242 = vmatpush.msrb.mxu0 %v2638_v25 }
 0x446   :  { %1183 = vmatpush.msra.mxu2 %v2641_v26  ;;  %1203 = vmatpush.msra.mxu3 %v2644_v27 }
 0x447   :  { %1223 = vmatpush.msrb.mxu1 %v2647_v28  ;;  %1243 = vmatpush.msrb.mxu0 %v2650_v29 }
 0x448   :  { %1184 = vmatpush.msra.mxu2 %v2653_v30  ;;  %1204 = vmatpush.msra.mxu3 %v2656_v57 }
 0x449   :  { %1224 = vmatpush.msrb.mxu1 %v2659_v42  ;;  %1244 = vmatpush.msrb.mxu0 %v2662_v32  ;;  %v2680_v32 = vld [vmem:[#allocation10 + $0x88] sm:$0xff] }
 0x44a   :  { %1185 = vmatpush.msra.mxu2 %v2665_v45  ;;  %1205 = vmatpush.msra.mxu3 %v2668_v20  ;;  %3152 = vst [vmem:[#allocation24_spill] sm:$0xff] %v2680_v32  ;;  %v2683_v45 = vld [vmem:[#allocation10 + $0x90] sm:$0xff]  ;;  %v2686_v20 = vld [vmem:[#allocation10 + $0x98] sm:$0xff] }
 0x44b   :  { %1225 = vmatpush.msrb.mxu1 %v2671_v13  ;;  %1245 = vmatpush.msrb.mxu0 %v2674_v58  ;;  %3153 = vst [vmem:[#allocation26_spill] sm:$0xff] %v2683_v45  ;;  %v2689_v13 = vld [vmem:[#allocation10 + $0x60] sm:$0xff]  ;;  %v2692_v58 = vld [vmem:[#allocation10 + $0x68] sm:$0xff] }
 0x44c   :  { %1186 = vmatpush.msra.mxu2 %v2677_v59  ;;  %1206 = vmatpush.msra.mxu3 %v2680_v32  ;;  %3154 = vst [vmem:[#allocation27_spill] sm:$0xff] %v2686_v20 }
 0x44d   :  { %1226 = vmatpush.msrb.mxu1 %v2683_v45  ;;  %1246 = vmatpush.msrb.mxu0 %v2686_v20  ;;  %3155 = vst [vmem:[#allocation28_spill] sm:$0xff] %v2689_v13 }
 0x44e   :  { %1187 = vmatpush.msra.mxu2 %v2689_v13  ;;  %3156 = vst [vmem:[#allocation25_spill] sm:$0xff] %v2692_v58  ;;  %1207 = vmatpush.msra.mxu3 %v2692_v58 }
 0x44f   :  { %1227 = vmatpush.msrb.mxu1 %v3126_v33  ;;  %1247 = vmatpush.msrb.mxu0 %v3127_v34 }
 0x450   :  { %1188 = vmatpush.msra.mxu2 %v3128_v35  ;;  %1208 = vmatpush.msra.mxu3 %v3129_v36 }
 0x451   :  { %1228 = vmatpush.msrb.mxu1 %v3130_v37  ;;  %1248 = vmatpush.msrb.mxu0 %v3131_v39 }
 0x452   :  { %1189 = vmatpush.msra.mxu2 %v3132_v41  ;;  %1209 = vmatpush.msra.mxu3 %v3133_v44 }
 0x453   :  { %1229 = vmatpush.msrb.mxu1 %v3134_v46  ;;  %1249 = vmatpush.msrb.mxu0 %v3135_v47 }
 0x454   :  { %1190 = vmatpush.msra.mxu2 %v3136_v50  ;;  %1210 = vmatpush.msra.mxu3 %v3137_v53 }
 0x455   :  { %1230 = vmatpush.msrb.mxu1 %v3138_v54  ;;  %1250 = vmatpush.msrb.mxu0 %v3139_v16 }
 0x4b2   :  { %v958_v33 = vpop.f32.mrf.mxu0 }
 0x4b3   :  { %v964_v34 = vadd.f32 %v958_v33, %v3140_v55  ;;  %v938_v33 = vpop.f32.mrf.mxu1 }
 0x4b5   :  { %v1649_v35 = vmul.f32 -1.442695, %v964_v34 }
 0x4b7   :  { %1722 = vpow2.f32 %v1649_v35  ;;  %v898_v36 = vpop.f32.mrf.mxu2  ;;  %v918_v37 = vpop.f32.mrf.mxu3 }
 0x4b8   :  { %v961_v39 = vadd.f32 %v898_v36, %v3141_v14  ;;  %v962_v41 = vadd.f32 %v918_v37, %v3142_v49  ;;  %v963_v36 = vadd.f32 %v938_v33, %v3143_v23 }
 0x4ba   :  { %v1647_v44 = vmul.f32 -1.442695, %v961_v39  ;;  %v1648_v46 = vmul.f32 -1.442695, %v962_v41 }
 0x4bc   :  { %1724 = vpow2.f32 %v1647_v44 }
 0x4bd   :  { %v1723_v47 = vpop.eup %1722  ;;  %1726 = vpow2.f32 %v1648_v46 }
 0x4be   :  { %v1007_v50 = vadd.f32 1.0, %v1723_v47 }
 0x4c0   :  { %1728 = vrcp.f32 %v1007_v50  ;;  %vm1013_vm14 = vweird.f32 %v1007_v50 }
 0x4c2   :  { %v1725_v53 = vpop.eup %1724 }
 0x4c3   :  { %v1727_v54 = vpop.eup %1726  ;;  %v968_v16 = vadd.f32 1.0, %v1725_v53 }
 0x4c4   :  { %v987_v58 = vadd.f32 1.0, %v1727_v54 }
 0x4c5   :  { %1730 = vrcp.f32 %v968_v16  ;;  %v980_v46 = vand.u32 2147483648, %v968_v16  ;;  %v978_v53 = vand.u32 2147483647, %v968_v16  ;;  %vm974_vm7 = vweird.f32 %v968_v16 }
 0x4c6   :  { %1732 = vrcp.f32 %v987_v58  ;;  %v1729_v34 = vpop.eup %1728  ;;  %v999_v55 = vand.u32 2147483648, %v987_v58  ;;  %v997_v13 = vand.u32 2147483647, %v987_v58  ;;  %vm993_vm9 = vweird.f32 %v987_v58 }
 0x4c7   :  { %v1009_v41 = vmul.f32 %v1729_v34, %v1007_v50  ;;  %1734 = vtanh.f32 %v963_v36  ;;  %v981_v33 = vor.u32 1.1754944e-38, %v980_v46  ;;  %vm979_vm10 = vcmp.eq.f32.partialorder %v978_v53, 8.507059e+37  ;;  %v3166_v46 = vld [vmem:[#allocation26_spill] sm:$0xff]  ;;  %v3167_v53 = vld [vmem:[#allocation27_spill] sm:$0xff] }
 0x4c8   :  { %v1000_v36 = vor.u32 1.1754944e-38, %v999_v55  ;;  %vm998_vm12 = vcmp.eq.f32.partialorder %v997_v13, 8.507059e+37  ;;  %vm1014_vm13 = vweird.f32 %v1729_v34  ;;  %v3161_v13 = vld [vmem:[#allocation20_spill] sm:$0xff] }
 0x4c9   :  { %v1010_v20 = vsub.f32 1.0, %v1009_v41  ;;  %vm1015_vm15 = vmor %vm1013_vm14, %vm1014_vm13 }
 0x4cb   :  { %v1731_v35 = vpop.eup %1730  ;;  %v1011_v42 = vmul.f32 %v1729_v34, %v1010_v20  ;;  %v3160_v20 = vld [vmem:[#allocation19_spill] sm:$0xff] }
 0x4cc   :  { %v1733_v14 = vpop.eup %1732  ;;  %v970_v37 = vmul.f32 %v1731_v35, %v968_v16  ;;  %vm975_vm5 = vweird.f32 %v1731_v35  ;;  %v1019_v16 = vand.u32 2147483648, %v1007_v50 }
 0x4cd   :  { %v989_v39 = vmul.f32 %v1733_v14, %v987_v58  ;;  %vm994_vm6 = vweird.f32 %v1733_v14  ;;  %vm976_vm8 = vmor %vm974_vm7, %vm975_vm5 }
 0x4ce   :  { %v971_v44 = vsub.f32 1.0, %v970_v37  ;;  %vm995_vm11 = vmor %vm993_vm9, %vm994_vm6  ;;  %v1735_v37 = vpop.eup %1734  ;;  %v1020_v58 = vor.u32 1.1754944e-38, %v1019_v16  ;;  %v2785_v16 = vld [vmem:[#allocation10 + $0x20] sm:$0xff] }
 0x4cf   :  { %v990_v47 = vsub.f32 1.0, %v989_v39  ;;  %3176 = vst [vmem:[#allocation35_spill] sm:$0xff] %v2785_v16 }
 0x4d0   :  { %v972_v49 = vmul.f32 %v1731_v35, %v971_v44 }
 0x4d1   :  { %v991_v54 = vmul.f32 %v1733_v14, %v990_v47 }
 0x4d2   :  { %v973_v45 = vadd.f32 %v1731_v35, %v972_v49  ;;  %v1012_v49 = vadd.f32 %v1729_v34, %v1011_v42  ;;  %v3159_v42 = vld [vmem:[#allocation18_spill] sm:$0xff] }
 0x4d3   :  { %v992_v23 = vadd.f32 %v1733_v14, %v991_v54  ;;  %v3168_v54 = vld [vmem:[#allocation28_spill] sm:$0xff] }
 0x4d4   :  { %v977_v32 = vsel %vm976_vm8, %v1731_v35, %v973_v45  ;;  %v1017_v45 = vand.u32 2147483647, %v1007_v50  ;;  %v1016_v55 = vsel %vm1015_vm15, %v1729_v34, %v1012_v49  ;;  %v3163_v50 = vld [vmem:[#allocation22_spill] sm:$0xff]  ;;  %v3164_v34 = vld [vmem:[#allocation23_spill] sm:$0xff]  ;;  %v3165_v35 = vld [vmem:[#allocation24_spill] sm:$0xff] }
 0x4d5   :  { %v982_v39 = vsel %vm979_vm10, %v981_v33, %v977_v32  ;;  %v996_v44 = vsel %vm995_vm11, %v1733_v14, %v992_v23  ;;  %v3169_v33 = vld [vmem:[#allocation25_spill] sm:$0xff]  ;;  %v2782_v49 = vld [vmem:[#allocation10 + $0x58] sm:$0xff] }
 0x4d6   :  { %v1001_v59 = vsel %vm998_vm12, %v1000_v36, %v996_v44  ;;  %v1024_v47 = vmul.f32 %v1735_v37, %v982_v39  ;;  %vm1018_vm0 = vcmp.eq.f32.partialorder %v1017_v45, 8.507059e+37  ;;  %v2767_v36 = vld [vmem:[#allocation10 + $0x70] sm:$0xff]  ;;  %v2770_v37 = vld [vmem:[#allocation10 + $0x78] sm:$0xff]  ;;  %v2773_v39 = vld [vmem:[#allocation10 + $0x40] sm:$0xff]  ;;  %3175 = vst [vmem:[#allocation34_spill] sm:$0xff] %v2782_v49 }
 0x4d7   :  { %v1023_v57 = vmul.f32 %v1001_v59, %v2542_v31  ;;  %v1021_v23 = vsel %vm1018_vm0, %v1020_v58, %v1016_v55  ;;  %v3157_v31 = vld [vmem:[#allocation16_spill] sm:$0xff]  ;;  %v3162_v59 = vld [vmem:[#allocation21_spill] sm:$0xff]  ;;  %3170 = vst [vmem:[#allocation29_spill] sm:$0xff] %v2767_v36  ;;  %v2794_v58 = vld [vmem:[#allocation10 + $0x38] sm:$0xff] }
 0x4d8   :  { %3171 = vst [vmem:[#allocation30_spill] sm:$0xff] %v2770_v37  ;;  %v2776_v44 = vld [vmem:[#allocation10 + $0x48] sm:$0xff]  ;;  %v2791_v55 = vld [vmem:[#allocation10 + $0x30] sm:$0xff] }
 0x4d9   :  { %v2714_v41 = vadd.f32 %v1024_v47, %v1023_v57  ;;  %v3158_v57 = vld [vmem:[#allocation17_spill] sm:$0xff]  ;;  %3172 = vst [vmem:[#allocation31_spill] sm:$0xff] %v2773_v39  ;;  %v2788_v45 = vld [vmem:[#allocation10 + $0x28] sm:$0xff] }
 0x4da   :  { %3173 = vst [vmem:[#allocation32_spill] sm:$0xff] %v2776_v44  ;;  %v2779_v47 = vld [vmem:[#allocation10 + $0x50] sm:$0xff] }
 0x4db   :  { %1736 = vtanh.f32 %v2714_v41  ;;  %3174 = vst [vmem:[#allocation33_spill] sm:$0xff] %v2779_v47 }
 0x4dc   :  { %3177 = vst [vmem:[#allocation36_spill] sm:$0xff] %v2788_v45 }
 0x4dd   :  { %3178 = vst [vmem:[#allocation37_spill] sm:$0xff] %v2791_v55 }
 0x4de   :  { %3179 = vst [vmem:[#allocation38_spill] sm:$0xff] %v2794_v58 }
 0x4e1   :  { %v1737_v14 = vpop.eup %1736 }
 0x4e2   :  { %v1027_v32 = vmul.f32 %v1737_v14, %v1021_v23  ;;  %v2797_v14 = vld [vmem:[#allocation10] sm:$0xff]  ;;  %v2800_v23 = vld [vmem:[#allocation10 + $0x8] sm:$0xff] }
 0x4e3   :  { %3180 = vst [vmem:[#allocation40_spill] sm:$0xff] %v2797_v14 }
 0x4e4   :  { %1044 = vmatmul.f32.vlgmr.msrb.gmra.mxu2 %v1027_v32  ;;  %1064 = vmatmul.f32.vlgmr.msrb.gmra.mxu3 %v1027_v32  ;;  %3181 = vst [vmem:[#allocation41_spill] sm:$0xff] %v2800_v23 }
 0x4e5   :  { %1084 = vmatmul.f32.vlgmr.msra.gmra.mxu1 %v1027_v32  ;;  %1104 = vmatmul.f32.vlgmr.msra.gmra.mxu0 %v1027_v32  ;;  %v2803_v32 = vld [vmem:[#allocation10 + $0x10] sm:$0xff] }
 0x4e6   :  { %1322 = vmatpush.msrb.mxu2 %v2545_v12  ;;  %1342 = vmatpush.msrb.mxu3 %v2548_v60  ;;  %3182 = vst [vmem:[#allocation42_spill] sm:$0xff] %v2803_v32 }
 0x4e7   :  { %1362 = vmatpush.msra.mxu1 %v2551_v62  ;;  %1382 = vmatpush.msra.mxu0 %v2554_v63 }
 0x4e8   :  { %1323 = vmatpush.msrb.mxu2 %v2557_v10  ;;  %1343 = vmatpush.msrb.mxu3 %v2560_v38 }
 0x4e9   :  { %1363 = vmatpush.msra.mxu1 %v2563_v40  ;;  %1383 = vmatpush.msra.mxu0 %v2566_v43 }
 0x4ea   :  { %1324 = vmatpush.msrb.mxu2 %v2569_v61  ;;  %1344 = vmatpush.msrb.mxu3 %v2572_v11 }
 0x4eb   :  { %1364 = vmatpush.msra.mxu1 %v2575_v0  ;;  %1384 = vmatpush.msra.mxu0 %v2578_v3 }
 0x4ec   :  { %1325 = vmatpush.msrb.mxu2 %v2581_v9  ;;  %1345 = vmatpush.msrb.mxu3 %v2584_v52 }
 0x4ed   :  { %1365 = vmatpush.msra.mxu1 %v2587_v15  ;;  %1385 = vmatpush.msra.mxu0 %v2590_v17 }
 0x4ee   :  { %1326 = vmatpush.msrb.mxu2 %v2593_v18  ;;  %1346 = vmatpush.msrb.mxu3 %v2596_v56 }
 0x4ef   :  { %1366 = vmatpush.msra.mxu1 %v2599_v4  ;;  %1386 = vmatpush.msra.mxu0 %v2602_v2 }
 0x4f0   :  { %1327 = vmatpush.msrb.mxu2 %v2605_v5  ;;  %1347 = vmatpush.msrb.mxu3 %v2608_v51 }
 0x4f1   :  { %1367 = vmatpush.msra.mxu1 %v2611_v6  ;;  %1387 = vmatpush.msra.mxu0 %v2614_v8 }
 0x4f2   :  { %1328 = vmatpush.msrb.mxu2 %v2617_v48  ;;  %1348 = vmatpush.msrb.mxu3 %v2620_v19 }
 0x4f3   :  { %1368 = vmatpush.msra.mxu1 %v2623_v21  ;;  %1388 = vmatpush.msra.mxu0 %v2626_v22 }
 0x4f4   :  { %1329 = vmatpush.msrb.mxu2 %v2629_v7  ;;  %1349 = vmatpush.msrb.mxu3 %v2632_v1 }
 0x4f5   :  { %1369 = vmatpush.msra.mxu1 %v2635_v24  ;;  %1389 = vmatpush.msra.mxu0 %v2638_v25 }
 0x4f6   :  { %1330 = vmatpush.msrb.mxu2 %v2641_v26  ;;  %1350 = vmatpush.msrb.mxu3 %v2644_v27 }
 0x4f7   :  { %1370 = vmatpush.msra.mxu1 %v2647_v28  ;;  %1390 = vmatpush.msra.mxu0 %v2650_v29 }
 0x4f8   :  { %1331 = vmatpush.msrb.mxu2 %v2653_v30  ;;  %1351 = vmatpush.msrb.mxu3 %v3157_v31 }
 0x4f9   :  { %1371 = vmatpush.msra.mxu1 %v3158_v57  ;;  %1391 = vmatpush.msra.mxu0 %v3159_v42 }
 0x4fa   :  { %1332 = vmatpush.msrb.mxu2 %v3160_v20  ;;  %1352 = vmatpush.msrb.mxu3 %v3161_v13 }
 0x4fb   :  { %1372 = vmatpush.msra.mxu1 %v3162_v59  ;;  %1392 = vmatpush.msra.mxu0 %v3163_v50 }
 0x4fc   :  { %1333 = vmatpush.msrb.mxu2 %v3164_v34  ;;  %1353 = vmatpush.msrb.mxu3 %v3165_v35 }
 0x4fd   :  { %1373 = vmatpush.msra.mxu1 %v3166_v46  ;;  %1393 = vmatpush.msra.mxu0 %v3167_v53 }
 0x4fe   :  { %1334 = vmatpush.msrb.mxu2 %v3168_v54  ;;  %1354 = vmatpush.msrb.mxu3 %v3169_v33 }
 0x4ff   :  { %1374 = vmatpush.msra.mxu1 %v2767_v36  ;;  %1394 = vmatpush.msra.mxu0 %v2770_v37  ;;  %v3186_v37 = vld [vmem:[#allocation51_spill] sm:$0xff] }
 0x500   :  { %1335 = vmatpush.msrb.mxu2 %v2773_v39  ;;  %1355 = vmatpush.msrb.mxu3 %v2776_v44 }
 0x501   :  { %1375 = vmatpush.msra.mxu1 %v2779_v47  ;;  %1395 = vmatpush.msra.mxu0 %v2782_v49 }
 0x502   :  { %1336 = vmatpush.msrb.mxu2 %v2785_v16  ;;  %1356 = vmatpush.msrb.mxu3 %v2788_v45  ;;  %v2806_v45 = vld [vmem:[#allocation10 + $0x18] sm:$0xff]  ;;  %v3184_v16 = vld [vmem:[#allocation39_spill] sm:$0xff] }
 0x503   :  { %1376 = vmatpush.msra.mxu1 %v2791_v55  ;;  %1396 = vmatpush.msra.mxu0 %v2794_v58  ;;  %3183 = vst [vmem:[#allocation43_spill] sm:$0xff] %v2806_v45 }
 0x504   :  { %1337 = vmatpush.msrb.mxu2 %v2797_v14  ;;  %1357 = vmatpush.msrb.mxu3 %v2800_v23  ;;  %v3185_v14 = vld [vmem:[#allocation50_spill] sm:$0xff] }
 0x505   :  { %1377 = vmatpush.msra.mxu1 %v2803_v32  ;;  %1397 = vmatpush.msra.mxu0 %v2806_v45 }
 0x562   :  { %v1105_v55 = vpop.f32.mrf.mxu0 }
 0x563   :  { %v1111_v49 = vadd.f32 %v1105_v55, %v3184_v16  ;;  %v3187_v16 = vld [vmem:[#allocation58_spill] sm:$0xff] }
 0x565   :  { %v1652_v58 = vmul.f32 -1.442695, %v1111_v49  ;;  %v1085_v49 = vpop.f32.mrf.mxu1 }
 0x567   :  { %1738 = vpow2.f32 %v1652_v58  ;;  %v1045_v47 = vpop.f32.mrf.mxu2  ;;  %v1065_v44 = vpop.f32.mrf.mxu3 }
 0x568   :  { %v1108_v39 = vadd.f32 %v1045_v47, %v3185_v14  ;;  %v1109_v36 = vadd.f32 %v1065_v44, %v3186_v37  ;;  %v1110_v47 = vadd.f32 %v1085_v49, %v3187_v16 }
 0x56a   :  { %v1650_v23 = vmul.f32 -1.442695, %v1108_v39  ;;  %v1651_v33 = vmul.f32 -1.442695, %v1109_v36 }
 0x56c   :  { %1740 = vpow2.f32 %v1650_v23 }
 0x56d   :  { %v1739_v54 = vpop.eup %1738  ;;  %1742 = vpow2.f32 %v1651_v33 }
 0x56e   :  { %v1154_v32 = vadd.f32 1.0, %v1739_v54 }
 0x570   :  { %1744 = vrcp.f32 %v1154_v32  ;;  %vm1160_vm10 = vweird.f32 %v1154_v32 }
 0x572   :  { %v1741_v53 = vpop.eup %1740 }
 0x573   :  { %v1743_v46 = vpop.eup %1742  ;;  %v1115_v45 = vadd.f32 1.0, %v1741_v53 }
 0x574   :  { %v1134_v35 = vadd.f32 1.0, %v1743_v46 }
 0x575   :  { %1746 = vrcp.f32 %v1115_v45  ;;  %v1127_v33 = vand.u32 2147483648, %v1115_v45  ;;  %v1125_v53 = vand.u32 2147483647, %v1115_v45  ;;  %vm1121_vm3 = vweird.f32 %v1115_v45 }
 0x576   :  { %1748 = vrcp.f32 %v1134_v35  ;;  %v1745_v55 = vpop.eup %1744  ;;  %v1146_v34 = vand.u32 2147483648, %v1134_v35  ;;  %v1144_v50 = vand.u32 2147483647, %v1134_v35  ;;  %vm1140_vm5 = vweird.f32 %v1134_v35 }
 0x577   :  { %v1156_v36 = vmul.f32 %v1745_v55, %v1154_v32  ;;  %1750 = vtanh.f32 %v1110_v47  ;;  %v1128_v49 = vor.u32 1.1754944e-38, %v1127_v33  ;;  %vm1126_vm6 = vcmp.eq.f32.partialorder %v1125_v53, 8.507059e+37 }
 0x578   :  { %v1147_v47 = vor.u32 1.1754944e-38, %v1146_v34  ;;  %vm1145_vm8 = vcmp.eq.f32.partialorder %v1144_v50, 8.507059e+37  ;;  %vm1161_vm9 = vweird.f32 %v1745_v55 }
 0x579   :  { %v1157_v59 = vsub.f32 1.0, %v1156_v36  ;;  %vm1162_vm11 = vmor %vm1160_vm10, %vm1161_vm9 }
 0x57b   :  { %v1747_v58 = vpop.eup %1746  ;;  %v1158_v57 = vmul.f32 %v1745_v55, %v1157_v59 }
 0x57c   :  { %v1749_v14 = vpop.eup %1748  ;;  %v1117_v44 = vmul.f32 %v1747_v58, %v1115_v45  ;;  %vm1122_vm1 = vweird.f32 %v1747_v58  ;;  %v1166_v45 = vand.u32 2147483648, %v1154_v32 }
 0x57d   :  { %v1136_v39 = vmul.f32 %v1749_v14, %v1134_v35  ;;  %vm1141_vm2 = vweird.f32 %v1749_v14  ;;  %vm1123_vm4 = vmor %vm1121_vm3, %vm1122_vm1 }
 0x57e   :  { %v1118_v23 = vsub.f32 1.0, %v1117_v44  ;;  %vm1142_vm7 = vmor %vm1140_vm5, %vm1141_vm2  ;;  %v1751_v44 = vpop.eup %1750  ;;  %v1167_v35 = vor.u32 1.1754944e-38, %v1166_v45 }
 0x57f   :  { %v1137_v54 = vsub.f32 1.0, %v1136_v39 }
 0x580   :  { %v1119_v37 = vmul.f32 %v1747_v58, %v1118_v23 }
 0x581   :  { %v1138_v46 = vmul.f32 %v1749_v14, %v1137_v54 }
 0x582   :  { %v1120_v13 = vadd.f32 %v1747_v58, %v1119_v37  ;;  %v1159_v37 = vadd.f32 %v1745_v55, %v1158_v57 }
 0x583   :  { %v1139_v16 = vadd.f32 %v1749_v14, %v1138_v46  ;;  %v3218_v46 = vld [vmem:[#allocation58_spill] sm:$0xff] }
 0x584   :  { %v1124_v20 = vsel %vm1123_vm4, %v1747_v58, %v1120_v13  ;;  %v1164_v13 = vand.u32 2147483647, %v1154_v32  ;;  %v1163_v34 = vsel %vm1162_vm11, %v1745_v55, %v1159_v37 }
 0x585   :  { %v1129_v39 = vsel %vm1126_vm6, %v1128_v49, %v1124_v20  ;;  %v1143_v23 = vsel %vm1142_vm7, %v1749_v14, %v1139_v16 }
 0x586   :  { %v1148_v42 = vsel %vm1145_vm8, %v1147_v47, %v1143_v23  ;;  %v1171_v54 = vmul.f32 %v1751_v44, %v1129_v39  ;;  %vm1165_vm12 = vcmp.eq.f32.partialorder %v1164_v13, 8.507059e+37 }
 0x587   :  { %v1170_v31 = vmul.f32 %v1148_v42, %v2714_v41  ;;  %v1168_v50 = vsel %vm1165_vm12, %v1167_v35, %v1163_v34 }
 0x589   :  { %v2814_v36 = vadd.f32 %v1171_v54, %v1170_v31 }
 0x58b   :  { %1752 = vtanh.f32 %v2814_v36 }
 0x591   :  { %v1753_v20 = vpop.eup %1752 }
 0x592   :  { %v1174_v16 = vmul.f32 %v1753_v20, %v1168_v50 }
 0x594   :  { %1191 = vmatmul.f32.vlgmr.msra.gmra.mxu2 %v1174_v16  ;;  %1211 = vmatmul.f32.vlgmr.msra.gmra.mxu3 %v1174_v16 }
 0x595   :  { %1231 = vmatmul.f32.vlgmr.msrb.gmra.mxu1 %v1174_v16  ;;  %1251 = vmatmul.f32.vlgmr.msrb.gmra.mxu0 %v1174_v16 }
 0x596   :  { %1469 = vmatpush.msra.mxu2 %v2545_v12  ;;  %1489 = vmatpush.msra.mxu3 %v2548_v60  ;;  %v3188_v12 = vld [vmem:[#allocation16_spill] sm:$0xff]  ;;  %v3189_v60 = vld [vmem:[#allocation17_spill] sm:$0xff] }
 0x597   :  { %1509 = vmatpush.msrb.mxu1 %v2551_v62  ;;  %1529 = vmatpush.msrb.mxu0 %v2554_v63  ;;  %v3190_v62 = vld [vmem:[#allocation18_spill] sm:$0xff]  ;;  %v3191_v63 = vld [vmem:[#allocation19_spill] sm:$0xff] }
 0x598   :  { %1470 = vmatpush.msra.mxu2 %v2557_v10  ;;  %1490 = vmatpush.msra.mxu3 %v2560_v38  ;;  %v3192_v10 = vld [vmem:[#allocation20_spill] sm:$0xff]  ;;  %v3193_v38 = vld [vmem:[#allocation21_spill] sm:$0xff] }
 0x599   :  { %1510 = vmatpush.msrb.mxu1 %v2563_v40  ;;  %1530 = vmatpush.msrb.mxu0 %v2566_v43  ;;  %v3194_v40 = vld [vmem:[#allocation22_spill] sm:$0xff]  ;;  %v3195_v43 = vld [vmem:[#allocation23_spill] sm:$0xff] }
 0x59a   :  { %1471 = vmatpush.msra.mxu2 %v2569_v61  ;;  %1491 = vmatpush.msra.mxu3 %v2572_v11  ;;  %v3196_v61 = vld [vmem:[#allocation24_spill] sm:$0xff]  ;;  %v3197_v11 = vld [vmem:[#allocation26_spill] sm:$0xff] }
 0x59b   :  { %1511 = vmatpush.msrb.mxu1 %v2575_v0  ;;  %1531 = vmatpush.msrb.mxu0 %v2578_v3  ;;  %v3198_v0 = vld [vmem:[#allocation27_spill] sm:$0xff]  ;;  %v3199_v3 = vld [vmem:[#allocation28_spill] sm:$0xff] }
 0x59c   :  { %1472 = vmatpush.msra.mxu2 %v2581_v9  ;;  %1492 = vmatpush.msra.mxu3 %v2584_v52  ;;  %v3200_v9 = vld [vmem:[#allocation25_spill] sm:$0xff] }
 0x59d   :  { %1512 = vmatpush.msrb.mxu1 %v2587_v15  ;;  %1532 = vmatpush.msrb.mxu0 %v2590_v17  ;;  %v3201_v52 = vld [vmem:[#allocation29_spill] sm:$0xff]  ;;  %v3202_v15 = vld [vmem:[#allocation30_spill] sm:$0xff]  ;;  %v3203_v17 = vld [vmem:[#allocation31_spill] sm:$0xff] }
 0x59e   :  { %1473 = vmatpush.msra.mxu2 %v2593_v18  ;;  %1493 = vmatpush.msra.mxu3 %v2596_v56  ;;  %v3204_v18 = vld [vmem:[#allocation32_spill] sm:$0xff]  ;;  %v3205_v56 = vld [vmem:[#allocation33_spill] sm:$0xff] }
 0x59f   :  { %1513 = vmatpush.msrb.mxu1 %v2599_v4  ;;  %1533 = vmatpush.msrb.mxu0 %v2602_v2  ;;  %v3206_v4 = vld [vmem:[#allocation34_spill] sm:$0xff]  ;;  %v3207_v2 = vld [vmem:[#allocation35_spill] sm:$0xff] }
 0x5a0   :  { %1474 = vmatpush.msra.mxu2 %v2605_v5  ;;  %1494 = vmatpush.msra.mxu3 %v2608_v51  ;;  %v3208_v5 = vld [vmem:[#allocation36_spill] sm:$0xff]  ;;  %v3209_v51 = vld [vmem:[#allocation37_spill] sm:$0xff] }
 0x5a1   :  { %1514 = vmatpush.msrb.mxu1 %v2611_v6  ;;  %1534 = vmatpush.msrb.mxu0 %v2614_v8  ;;  %v3210_v6 = vld [vmem:[#allocation38_spill] sm:$0xff]  ;;  %v3211_v8 = vld [vmem:[#allocation40_spill] sm:$0xff] }
 0x5a2   :  { %1475 = vmatpush.msra.mxu2 %v2617_v48  ;;  %1495 = vmatpush.msra.mxu3 %v2620_v19  ;;  %v3212_v48 = vld [vmem:[#allocation41_spill] sm:$0xff]  ;;  %v3213_v19 = vld [vmem:[#allocation42_spill] sm:$0xff] }
 0x5a3   :  { %1515 = vmatpush.msrb.mxu1 %v2623_v21  ;;  %1535 = vmatpush.msrb.mxu0 %v2626_v22  ;;  %v3214_v21 = vld [vmem:[#allocation43_spill] sm:$0xff] }
 0x5a4   :  { %1476 = vmatpush.msra.mxu2 %v2629_v7  ;;  %1496 = vmatpush.msra.mxu3 %v2632_v1  ;;  %v3215_v7 = vld [vmem:[#allocation39_spill] sm:$0xff] }
 0x5a5   :  { %1516 = vmatpush.msrb.mxu1 %v2635_v24  ;;  %1536 = vmatpush.msrb.mxu0 %v2638_v25 }
 0x5a6   :  { %1477 = vmatpush.msra.mxu2 %v2641_v26  ;;  %1497 = vmatpush.msra.mxu3 %v2644_v27  ;;  %v3216_v27 = vld [vmem:[#allocation50_spill] sm:$0xff] }
 0x5a7   :  { %1517 = vmatpush.msrb.mxu1 %v2647_v28  ;;  %1537 = vmatpush.msrb.mxu0 %v2650_v29  ;;  %v3217_v29 = vld [vmem:[#allocation51_spill] sm:$0xff] }
 0x5a8   :  { %1478 = vmatpush.msra.mxu2 %v2653_v30  ;;  %1498 = vmatpush.msra.mxu3 %v3188_v12 }
 0x5a9   :  { %1518 = vmatpush.msrb.mxu1 %v3189_v60  ;;  %1538 = vmatpush.msrb.mxu0 %v3190_v62 }
 0x5aa   :  { %1479 = vmatpush.msra.mxu2 %v3191_v63  ;;  %1499 = vmatpush.msra.mxu3 %v3192_v10 }
 0x5ab   :  { %1519 = vmatpush.msrb.mxu1 %v3193_v38  ;;  %1539 = vmatpush.msrb.mxu0 %v3194_v40 }
 0x5ac   :  { %1480 = vmatpush.msra.mxu2 %v3195_v43  ;;  %1500 = vmatpush.msra.mxu3 %v3196_v61 }
 0x5ad   :  { %1520 = vmatpush.msrb.mxu1 %v3197_v11  ;;  %1540 = vmatpush.msrb.mxu0 %v3198_v0 }
 0x5ae   :  { %1481 = vmatpush.msra.mxu2 %v3199_v3  ;;  %1501 = vmatpush.msra.mxu3 %v3200_v9 }
 0x5af   :  { %1521 = vmatpush.msrb.mxu1 %v3201_v52  ;;  %1541 = vmatpush.msrb.mxu0 %v3202_v15 }
 0x5b0   :  { %1482 = vmatpush.msra.mxu2 %v3203_v17  ;;  %1502 = vmatpush.msra.mxu3 %v3204_v18 }
 0x5b1   :  { %1522 = vmatpush.msrb.mxu1 %v3205_v56  ;;  %1542 = vmatpush.msrb.mxu0 %v3206_v4 }
 0x5b2   :  { %1483 = vmatpush.msra.mxu2 %v3207_v2  ;;  %1503 = vmatpush.msra.mxu3 %v3208_v5 }
 0x5b3   :  { %1523 = vmatpush.msrb.mxu1 %v3209_v51  ;;  %1543 = vmatpush.msrb.mxu0 %v3210_v6 }
 0x5b4   :  { %1484 = vmatpush.msra.mxu2 %v3211_v8  ;;  %1504 = vmatpush.msra.mxu3 %v3212_v48 }
 0x5b5   :  { %1524 = vmatpush.msrb.mxu1 %v3213_v19  ;;  %1544 = vmatpush.msrb.mxu0 %v3214_v21 }
 0x612   :  { %v1252_v22 = vpop.f32.mrf.mxu0  ;;  %v1232_v58 = vpop.f32.mrf.mxu1 }
 0x613   :  { %v1258_v1 = vadd.f32 %v1252_v22, %v3215_v7  ;;  %v1257_v49 = vadd.f32 %v1232_v58, %v3218_v46 }
 0x615   :  { %v1655_v24 = vmul.f32 -1.442695, %v1258_v1 }
 0x617   :  { %1754 = vpow2.f32 %v1655_v24  ;;  %v1192_v25 = vpop.f32.mrf.mxu2  ;;  %v1212_v26 = vpop.f32.mrf.mxu3 }
 0x618   :  { %v1255_v28 = vadd.f32 %v1192_v25, %v3216_v27  ;;  %v1256_v30 = vadd.f32 %v1212_v26, %v3217_v29 }
 0x61a   :  { %v1653_v41 = vmul.f32 -1.442695, %v1255_v28  ;;  %v1654_v31 = vmul.f32 -1.442695, %v1256_v30 }
 0x61c   :  { %1756 = vpow2.f32 %v1653_v41 }
 0x61d   :  { %v1755_v57 = vpop.eup %1754  ;;  %1758 = vpow2.f32 %v1654_v31 }
 0x61e   :  { %v1301_v42 = vadd.f32 1.0, %v1755_v57 }
 0x620   :  { %1760 = vrcp.f32 %v1301_v42  ;;  %v1313_v15 = vand.u32 2147483648, %v1301_v42  ;;  %vm1307_vm6 = vweird.f32 %v1301_v42  ;;  %v1311_v17 = vand.u32 2147483647, %v1301_v42 }
 0x622   :  { %v1757_v59 = vpop.eup %1756  ;;  %v1314_v56 = vor.u32 1.1754944e-38, %v1313_v15  ;;  %vm1312_vm8 = vcmp.eq.f32.partialorder %v1311_v17, 8.507059e+37 }
 0x623   :  { %v1759_v14 = vpop.eup %1758  ;;  %v1262_v32 = vadd.f32 1.0, %v1757_v59 }
 0x624   :  { %v1281_v55 = vadd.f32 1.0, %v1759_v14 }
 0x625   :  { %1762 = vrcp.f32 %v1262_v32  ;;  %v1274_v37 = vand.u32 2147483648, %v1262_v32  ;;  %v1272_v34 = vand.u32 2147483647, %v1262_v32  ;;  %vm1268_vm15 = vweird.f32 %v1262_v32 }
 0x626   :  { %1764 = vrcp.f32 %v1281_v55  ;;  %v1761_v33 = vpop.eup %1760  ;;  %v1293_v35 = vand.u32 2147483648, %v1281_v55  ;;  %v1291_v50 = vand.u32 2147483647, %v1281_v55  ;;  %vm1287_vm1 = vweird.f32 %v1281_v55 }
 0x627   :  { %v1303_v23 = vmul.f32 %v1761_v33, %v1301_v42  ;;  %1766 = vtanh.f32 %v1257_v49  ;;  %v1275_v60 = vor.u32 1.1754944e-38, %v1274_v37  ;;  %vm1273_vm2 = vcmp.eq.f32.partialorder %v1272_v34, 8.507059e+37 }
 0x628   :  { %v1294_v10 = vor.u32 1.1754944e-38, %v1293_v35  ;;  %vm1292_vm4 = vcmp.eq.f32.partialorder %v1291_v50, 8.507059e+37  ;;  %vm1308_vm5 = vweird.f32 %v1761_v33 }
 0x629   :  { %v1304_v16 = vsub.f32 1.0, %v1303_v23  ;;  %vm1309_vm7 = vmor %vm1307_vm6, %vm1308_vm5 }
 0x62b   :  { %v1763_v53 = vpop.eup %1762  ;;  %v1305_v11 = vmul.f32 %v1761_v33, %v1304_v16 }
 0x62c   :  { %v1765_v47 = vpop.eup %1764  ;;  %v1264_v44 = vmul.f32 %v1763_v53, %v1262_v32  ;;  %vm1269_vm13 = vweird.f32 %v1763_v53 }
 0x62d   :  { %v1283_v39 = vmul.f32 %v1765_v47, %v1281_v55  ;;  %vm1288_vm14 = vweird.f32 %v1765_v47  ;;  %vm1270_vm0 = vmor %vm1268_vm15, %vm1269_vm13  ;;  %v1767_v38 = vpop.eup %1766  ;;  %v1306_v52 = vadd.f32 %v1761_v33, %v1305_v11 }
 0x62e   :  { %v1265_v54 = vsub.f32 1.0, %v1264_v44  ;;  %vm1289_vm3 = vmor %vm1287_vm1, %vm1288_vm14 }
 0x62f   :  { %v1284_v45 = vsub.f32 1.0, %v1283_v39  ;;  %v1310_v18 = vsel %vm1309_vm7, %v1761_v33, %v1306_v52 }
 0x630   :  { %v1266_v13 = vmul.f32 %v1763_v53, %v1265_v54  ;;  %v1315_v2 = vsel %vm1312_vm8, %v1314_v56, %v1310_v18 }
 0x631   :  { %v1285_v20 = vmul.f32 %v1765_v47, %v1284_v45 }
 0x632   :  { %v1267_v12 = vadd.f32 %v1763_v53, %v1266_v13 }
 0x633   :  { %v1286_v62 = vadd.f32 %v1765_v47, %v1285_v20 }
 0x634   :  { %v1271_v63 = vsel %vm1270_vm0, %v1763_v53, %v1267_v12 }
 0x635   :  { %v1276_v40 = vsel %vm1273_vm2, %v1275_v60, %v1271_v63  ;;  %v1290_v43 = vsel %vm1289_vm3, %v1765_v47, %v1286_v62 }
 0x636   :  { %v1295_v61 = vsel %vm1292_vm4, %v1294_v10, %v1290_v43  ;;  %v1318_v0 = vmul.f32 %v1767_v38, %v1276_v40 }
 0x637   :  { %v1317_v3 = vmul.f32 %v1295_v61, %v2814_v36 }
 0x639   :  { %v2886_v9 = vadd.f32 %v1318_v0, %v1317_v3 }
 0x63b   :  { %1768 = vtanh.f32 %v2886_v9 }
 0x641   :  { %v1769_v4 = vpop.eup %1768 }
 0x642   :  { %v1321_v5 = vmul.f32 %v1769_v4, %v1315_v2 }
 0x644   :  { %1338 = vmatmul.f32.vlgmr.msrb.gmra.mxu2 %v1321_v5  ;;  %1358 = vmatmul.f32.vlgmr.msrb.gmra.mxu3 %v1321_v5 }
 0x645   :  { %1378 = vmatmul.f32.vlgmr.msra.gmra.mxu1 %v1321_v5  ;;  %1398 = vmatmul.f32.vlgmr.msra.gmra.mxu0 %v1321_v5 }
 0x6c2   :  { %v1399_v36 = vpop.f32.mrf.mxu0  ;;  %v1379_v31 = vpop.f32.mrf.mxu1 }
 0x6c3   :  { %v1405_v51 = vadd.f32 %v1399_v36, %v3215_v7  ;;  %v1404_v59 = vadd.f32 %v1379_v31, %v3218_v46 }
 0x6c5   :  { %v1658_v6 = vmul.f32 -1.442695, %v1405_v51 }
 0x6c7   :  { %1770 = vpow2.f32 %v1658_v6  ;;  %v1339_v8 = vpop.f32.mrf.mxu2  ;;  %v1359_v48 = vpop.f32.mrf.mxu3 }
 0x6c8   :  { %v1402_v19 = vadd.f32 %v1339_v8, %v3216_v27  ;;  %v1403_v21 = vadd.f32 %v1359_v48, %v3217_v29 }
 0x6ca   :  { %v1656_v22 = vmul.f32 -1.442695, %v1402_v19  ;;  %v1657_v1 = vmul.f32 -1.442695, %v1403_v21 }
 0x6cc   :  { %1772 = vpow2.f32 %v1656_v22 }
 0x6cd   :  { %v1771_v24 = vpop.eup %1770  ;;  %1774 = vpow2.f32 %v1657_v1 }
 0x6ce   :  { %v1448_v25 = vadd.f32 1.0, %v1771_v24 }
 0x6d0   :  { %1776 = vrcp.f32 %v1448_v25  ;;  %v1460_v43 = vand.u32 2147483648, %v1448_v25  ;;  %vm1454_vm2 = vweird.f32 %v1448_v25  ;;  %v1458_v61 = vand.u32 2147483647, %v1448_v25 }
 0x6d2   :  { %v1773_v26 = vpop.eup %1772  ;;  %v1461_v0 = vor.u32 1.1754944e-38, %v1460_v43  ;;  %vm1459_vm4 = vcmp.eq.f32.partialorder %v1458_v61, 8.507059e+37 }
 0x6d3   :  { %v1775_v28 = vpop.eup %1774  ;;  %v1409_v30 = vadd.f32 1.0, %v1773_v26 }
 0x6d4   :  { %v1428_v41 = vadd.f32 1.0, %v1775_v28 }
 0x6d5   :  { %1778 = vrcp.f32 %v1409_v30  ;;  %v1421_v53 = vand.u32 2147483648, %v1409_v30  ;;  %v1419_v44 = vand.u32 2147483647, %v1409_v30  ;;  %vm1415_vm11 = vweird.f32 %v1409_v30 }
 0x6d6   :  { %1780 = vrcp.f32 %v1428_v41  ;;  %v1777_v57 = vpop.eup %1776  ;;  %v1440_v39 = vand.u32 2147483648, %v1428_v41  ;;  %v1438_v54 = vand.u32 2147483647, %v1428_v41  ;;  %vm1434_vm13 = vweird.f32 %v1428_v41 }
 0x6d7   :  { %v1450_v58 = vmul.f32 %v1777_v57, %v1448_v25  ;;  %1782 = vtanh.f32 %v1404_v59  ;;  %v1422_v13 = vor.u32 1.1754944e-38, %v1421_v53  ;;  %vm1420_vm14 = vcmp.eq.f32.partialorder %v1419_v44, 8.507059e+37 }
 0x6d8   :  { %v1441_v20 = vor.u32 1.1754944e-38, %v1440_v39  ;;  %vm1439_vm0 = vcmp.eq.f32.partialorder %v1438_v54, 8.507059e+37  ;;  %vm1455_vm1 = vweird.f32 %v1777_v57 }
 0x6d9   :  { %v1451_v37 = vsub.f32 1.0, %v1450_v58  ;;  %vm1456_vm3 = vmor %vm1454_vm2, %vm1455_vm1 }
 0x6db   :  { %v1779_v42 = vpop.eup %1778  ;;  %v1452_v62 = vmul.f32 %v1777_v57, %v1451_v37 }
 0x6dc   :  { %v1781_v14 = vpop.eup %1780  ;;  %v1411_v32 = vmul.f32 %v1779_v42, %v1409_v30  ;;  %vm1416_vm9 = vweird.f32 %v1779_v42 }
 0x6dd   :  { %v1430_v55 = vmul.f32 %v1781_v14, %v1428_v41  ;;  %vm1435_vm10 = vweird.f32 %v1781_v14  ;;  %vm1417_vm12 = vmor %vm1415_vm11, %vm1416_vm9  ;;  %v1783_v50 = vpop.eup %1782  ;;  %v1453_v40 = vadd.f32 %v1777_v57, %v1452_v62 }
 0x6de   :  { %v1412_v33 = vsub.f32 1.0, %v1411_v32  ;;  %vm1436_vm15 = vmor %vm1434_vm13, %vm1435_vm10 }
 0x6df   :  { %v1431_v49 = vsub.f32 1.0, %v1430_v55  ;;  %v1457_v11 = vsel %vm1456_vm3, %v1777_v57, %v1453_v40 }
 0x6e0   :  { %v1413_v47 = vmul.f32 %v1779_v42, %v1412_v33  ;;  %v1462_v52 = vsel %vm1459_vm4, %v1461_v0, %v1457_v11 }
 0x6e1   :  { %v1432_v23 = vmul.f32 %v1781_v14, %v1431_v49 }
 0x6e2   :  { %v1414_v45 = vadd.f32 %v1779_v42, %v1413_v47 }
 0x6e3   :  { %v1433_v34 = vadd.f32 %v1781_v14, %v1432_v23 }
 0x6e4   :  { %v1418_v35 = vsel %vm1417_vm12, %v1779_v42, %v1414_v45 }
 0x6e5   :  { %v1423_v16 = vsel %vm1420_vm14, %v1422_v13, %v1418_v35  ;;  %v1437_v12 = vsel %vm1436_vm15, %v1781_v14, %v1433_v34 }
 0x6e6   :  { %v1442_v60 = vsel %vm1439_vm0, %v1441_v20, %v1437_v12  ;;  %v1465_v63 = vmul.f32 %v1783_v50, %v1423_v16 }
 0x6e7   :  { %v1464_v10 = vmul.f32 %v1442_v60, %v2886_v9 }
 0x6e9   :  { %v2894_v38 = vadd.f32 %v1465_v63, %v1464_v10  ;;  %v1866_v63 = vld [vmem:[#allocation2] sm:$0xff] }
 0x6eb   :  { %1784 = vtanh.f32 %v2894_v38 }
 0x6f1   :  { %v1785_v3 = vpop.eup %1784 }
 0x6f2   :  { %v1468_v15 = vmul.f32 %v1785_v3, %v1462_v52 }
 0x6f4   :  { %1485 = vmatmul.f32.vlgmr.msra.gmra.mxu2 %v1468_v15  ;;  %1505 = vmatmul.f32.vlgmr.msra.gmra.mxu3 %v1468_v15 }
 0x6f5   :  { %1525 = vmatmul.f32.vlgmr.msrb.gmra.mxu1 %v1468_v15  ;;  %1545 = vmatmul.f32.vlgmr.msrb.gmra.mxu0 %v1468_v15 }
 0x772   :  { %v1546_v9 = vpop.f32.mrf.mxu0 }
 0x773   :  { %v1552_v17 = vadd.f32 %v1546_v9, %v3215_v7  ;;  %v1526_v7 = vpop.f32.mrf.mxu1 }
 0x775   :  { %v1661_v18 = vmul.f32 -1.442695, %v1552_v17 }
 0x777   :  { %1786 = vpow2.f32 %v1661_v18  ;;  %v1486_v56 = vpop.f32.mrf.mxu2  ;;  %v1506_v4 = vpop.f32.mrf.mxu3 }
 0x778   :  { %v1549_v2 = vadd.f32 %v1486_v56, %v3216_v27  ;;  %v1550_v5 = vadd.f32 %v1506_v4, %v3217_v29  ;;  %v1551_v27 = vadd.f32 %v1526_v7, %v3218_v46 }
 0x77a   :  { %v1659_v36 = vmul.f32 -1.442695, %v1549_v2  ;;  %v1660_v51 = vmul.f32 -1.442695, %v1550_v5 }
 0x77c   :  { %1788 = vpow2.f32 %v1659_v36 }
 0x77d   :  { %v1787_v6 = vpop.eup %1786  ;;  %1790 = vpow2.f32 %v1660_v51 }
 0x77e   :  { %v1595_v8 = vadd.f32 1.0, %v1787_v6 }
 0x780   :  { %1792 = vrcp.f32 %v1595_v8  ;;  %v1607_v35 = vand.u32 2147483648, %v1595_v8  ;;  %vm1601_vm14 = vweird.f32 %v1595_v8  ;;  %v1605_v20 = vand.u32 2147483647, %v1595_v8 }
 0x782   :  { %v1789_v48 = vpop.eup %1788  ;;  %v1608_v16 = vor.u32 1.1754944e-38, %v1607_v35  ;;  %vm1606_vm0 = vcmp.eq.f32.partialorder %v1605_v20, 8.507059e+37 }
 0x783   :  { %v1791_v19 = vpop.eup %1790  ;;  %v1556_v21 = vadd.f32 1.0, %v1789_v48 }
 0x784   :  { %v1575_v22 = vadd.f32 1.0, %v1791_v19 }
 0x785   :  { %1794 = vrcp.f32 %v1556_v21  ;;  %v1568_v41 = vand.u32 2147483648, %v1556_v21  ;;  %v1566_v42 = vand.u32 2147483647, %v1556_v21  ;;  %vm1562_vm7 = vweird.f32 %v1556_v21 }
 0x786   :  { %1796 = vrcp.f32 %v1575_v22  ;;  %v1793_v1 = vpop.eup %1792  ;;  %v1587_v59 = vand.u32 2147483648, %v1575_v22  ;;  %v1585_v32 = vand.u32 2147483647, %v1575_v22  ;;  %vm1581_vm9 = vweird.f32 %v1575_v22 }
 0x787   :  { %v1597_v28 = vmul.f32 %v1793_v1, %v1595_v8  ;;  %1798 = vtanh.f32 %v1551_v27  ;;  %v1569_v46 = vor.u32 1.1754944e-38, %v1568_v41  ;;  %vm1567_vm10 = vcmp.eq.f32.partialorder %v1566_v42, 8.507059e+37 }
 0x788   :  { %v1588_v49 = vor.u32 1.1754944e-38, %v1587_v59  ;;  %vm1586_vm12 = vcmp.eq.f32.partialorder %v1585_v32, 8.507059e+37  ;;  %vm1602_vm13 = vweird.f32 %v1793_v1 }
 0x789   :  { %v1598_v55 = vsub.f32 1.0, %v1597_v28  ;;  %vm1603_vm15 = vmor %vm1601_vm14, %vm1602_vm13 }
 0x78b   :  { %v1795_v24 = vpop.eup %1794  ;;  %v1599_v54 = vmul.f32 %v1793_v1, %v1598_v55 }
 0x78c   :  { %v1797_v25 = vpop.eup %1796  ;;  %v1558_v29 = vmul.f32 %v1795_v24, %v1556_v21  ;;  %vm1563_vm5 = vweird.f32 %v1795_v24 }
 0x78d   :  { %v1577_v26 = vmul.f32 %v1797_v25, %v1575_v22  ;;  %vm1582_vm6 = vweird.f32 %v1797_v25  ;;  %vm1564_vm8 = vmor %vm1562_vm7, %vm1563_vm5  ;;  %v1799_v47 = vpop.eup %1798  ;;  %v1600_v34 = vadd.f32 %v1793_v1, %v1599_v54 }
 0x78e   :  { %v1559_v30 = vsub.f32 1.0, %v1558_v29  ;;  %vm1583_vm11 = vmor %vm1581_vm9, %vm1582_vm6 }
 0x78f   :  { %v1578_v31 = vsub.f32 1.0, %v1577_v26  ;;  %v1604_v50 = vsel %vm1603_vm15, %v1793_v1, %v1600_v34 }
 0x790   :  { %v1560_v57 = vmul.f32 %v1795_v24, %v1559_v30  ;;  %v1609_v60 = vsel %vm1606_vm0, %v1608_v16, %v1604_v50 }
 0x791   :  { %v1579_v14 = vmul.f32 %v1797_v25, %v1578_v31 }
 0x792   :  { %v1561_v58 = vadd.f32 %v1795_v24, %v1560_v57 }
 0x793   :  { %v1580_v33 = vadd.f32 %v1797_v25, %v1579_v14 }
 0x794   :  { %v1565_v53 = vsel %vm1564_vm8, %v1795_v24, %v1561_v58 }
 0x795   :  { %v1584_v44 = vsel %vm1583_vm11, %v1797_v25, %v1580_v33  ;;  %v1570_v39 = vsel %vm1567_vm10, %v1569_v46, %v1565_v53 }
 0x796   :  { %v1589_v23 = vsel %vm1586_vm12, %v1588_v49, %v1584_v44  ;;  %v1612_v37 = vmul.f32 %v1799_v47, %v1570_v39 }
 0x797   :  { %v1611_v45 = vmul.f32 %v1589_v23, %v2894_v38 }
 0x799   :  { %v1613_v13 = vadd.f32 %v1612_v37, %v1611_v45 }
 0x79b   :  { %1800 = vtanh.f32 %v1613_v13 }
 0x7a1   :  { %v1801_v12 = vpop.eup %1800 }
 0x7a2   :  { %v1615_v62 = vmul.f32 %v1801_v12, %v1609_v60 }
 0x7a4   :  { %v1616_v10 = vadd.f32 %v1866_v63, %v1615_v62 }
 0x7a6   :  { %1617 = vst [vmem:[#allocation11] sm:$0xff] %v1616_v10 }
 0x7a7   :  { %1628 = dma.vmem_to_hbm [thread:$0]  %s1624_s21, 128, %s1626_s24, [#allocation4]  }
 0x7a8   :  { %2017 = dma.done.wait [#allocation4], 128  }
 0x7a9   :  { %2018 = vsyncadd [#allocation4], 4294967168 }
 0x7aa   :  { %1633 = vsyncpa [#allocation3], 1 }
 0x7ab   :  { %1634 = vsyncpa [#allocation6], 1 }
 0x7ac   :  { %1635 = vsyncpa [#allocation9], 1 }
 0x7ad   :  { %1636 = vsyncpa [#allocation4], 1 }

</bundles_post_ra>
